<compile_context>
chip_gen: v6e
topology: v6e:2x2x1
jax: 0.10.0
libtpu: 0.0.40
codegen_flags: <defaults>
</compile_context>

<pallas_src>
import jax
import jax.numpy as jnp
from jax.experimental import pallas as pl
from jax.experimental.pallas import tpu as pltpu


# ---------------------------------------------------------------------------
# Gate nonlinearity + state update — PyTorch gate order: i, f, g, o
# Full-vreg sigmoid + full-vreg tanh, then lane-slice (3 EUP issues per cell).
# ---------------------------------------------------------------------------
def _gates_to_hc(gates, c_prev, H):
    """gates:(B,4H) c_prev:(B,H) -> (h_new, c_new)."""
    sg = jax.nn.sigmoid(gates)          # one EUP pass over the whole (B,4H)
    tg = jnp.tanh(gates)                # one EUP pass over the whole (B,4H)
    i = sg[:, 0 * H:1 * H]
    f = sg[:, 1 * H:2 * H]
    g = tg[:, 2 * H:3 * H]
    o = sg[:, 3 * H:4 * H]
    c_new = f * c_prev + i * g
    h_new = o * jnp.tanh(c_new)         # third (and last) EUP issue
    return h_new, c_new


# ---------------------------------------------------------------------------
# Single fused kernel: encoder LSTM -> classifier -> decoder LSTM -> recon head
# ---------------------------------------------------------------------------
def _fused_kernel(x_ref,
                  enc_wih0_ref, enc_wih_r_ref, enc_whh_ref, enc_b_ref,
                  dec_wih_ref, dec_whh_ref, dec_b_ref,
                  wcls_ref, bcls_ref, wrec_ref, brec_ref,
                  rec_ref, probs_ref):
    B, T, D_in = x_ref.shape
    L = enc_whh_ref.shape[0]
    H = enc_whh_ref.shape[1]

    x = x_ref[...]                       # (B, T, D_in)
    enc_b = enc_b_ref[...]               # (L, 1, 4H)   b_ih + b_hh
    enc_whh = enc_whh_ref[...]           # (L, H, 4H)
    enc_wih_r = enc_wih_r_ref[...]       # (max(L-1,1), H, 4H)

    # --- encoder layer-0 input projection hoisted (single MXU pass) --------
    gx0 = (jnp.dot(x, enc_wih0_ref[...], preferred_element_type=jnp.float32)
           + enc_b[0])                   # (B, T, 4H)

    # ------------------------ encoder (static unroll) ----------------------
    h = [jnp.zeros((B, H), jnp.float32) for _ in range(L)]
    c = [jnp.zeros((B, H), jnp.float32) for _ in range(L)]
    for t in range(T):
        gates0 = gx0[:, t, :] + jnp.dot(h[0], enc_whh[0],
                                        preferred_element_type=jnp.float32)
        h[0], c[0] = _gates_to_hc(gates0, c[0], H)
        layer_in = h[0]
        for l in range(1, L):
            # two matmuls (no lane-concat): h[l] @ W_hh can issue early
            gates = (jnp.dot(layer_in, enc_wih_r[l - 1],
                             preferred_element_type=jnp.float32)
                     + jnp.dot(h[l], enc_whh[l],
                               preferred_element_type=jnp.float32)
                     + enc_b[l])
            h[l], c[l] = _gates_to_hc(gates, c[l], H)
            layer_in = h[l]
    z = h[L - 1]                         # (B, H)  == h_n[-1]

    # ------------------------ classification head --------------------------
    logits = (jnp.dot(z, wcls_ref[...], preferred_element_type=jnp.float32)
              + bcls_ref[...])
    m = jnp.max(logits, axis=-1, keepdims=True)
    e = jnp.exp(logits - m)
    probs_ref[...] = e * pl.reciprocal(jnp.sum(e, axis=-1, keepdims=True),
                                       approx=True)

    # ------------------------ decoder (static unroll) -----------------------
    dec_wih = dec_wih_ref[...]           # (L, H, 4H)
    dec_whh = dec_whh_ref[...]           # (L, H, 4H)
    dec_b = dec_b_ref[...]               # (L, 1, 4H)

    hd = [jnp.zeros((B, H), jnp.float32) for _ in range(L)]
    cd = [jnp.zeros((B, H), jnp.float32) for _ in range(L)]
    # z is constant over time: hoist layer-0 input-side gate contribution.
    gz0 = (jnp.dot(z, dec_wih[0], preferred_element_type=jnp.float32)
           + dec_b[0])

    h_top = []
    for t in range(T):
        gates0 = gz0 + jnp.dot(hd[0], dec_whh[0],
                               preferred_element_type=jnp.float32)
        hd[0], cd[0] = _gates_to_hc(gates0, cd[0], H)
        layer_in = hd[0]
        for l in range(1, L):
            gates = (jnp.dot(layer_in, dec_wih[l],
                             preferred_element_type=jnp.float32)
                     + jnp.dot(hd[l], dec_whh[l],
                               preferred_element_type=jnp.float32)
                     + dec_b[l])
            hd[l], cd[l] = _gates_to_hc(gates, cd[l], H)
            layer_in = hd[l]
        h_top.append(layer_in)

    # --- batched reconstruction head: ONE MXU pass after the loop ----------
    h_all = jnp.stack(h_top, axis=1)                       # (B, T, H)
    rec = (jnp.dot(h_all, wrec_ref[...],
                   preferred_element_type=jnp.float32)
           + brec_ref[...])                                # (B, T, D_in)
    # lane-dense 128-wide unmasked store; wrapper reshapes back (free)
    rec_ref[...] = rec.reshape(B, T * D_in)


# ---------------------------------------------------------------------------
# Wrapper
# ---------------------------------------------------------------------------
@jax.jit
def lstm_autoencoder_forward(x, params):
    """x: (B, T, D_in) float32 — matches PyTorch batch_first input."""
    B, T, D_in = x.shape
    C = params["w_cls"].shape[1]
    vmem = pl.BlockSpec(memory_space=pltpu.MemorySpace.VMEM)
    rec_flat, probs = pl.pallas_call(
        _fused_kernel,
        in_specs=[vmem] * 12,
        out_specs=(vmem, vmem),
        out_shape=(jax.ShapeDtypeStruct((B, T * D_in), jnp.float32),
                   jax.ShapeDtypeStruct((B, C), jnp.float32)),
    )(x,
      params["enc_wih0"], params["enc_wih_r"], params["enc_whh"], params["enc_b"],
      params["dec_wih"], params["dec_whh"], params["dec_b"],
      params["w_cls"], params["b_cls"], params["w_rec"], params["b_rec"])
    return rec_flat.reshape(B, T, D_in), probs


# ---------------------------------------------------------------------------
# Deterministic parameter init (PyTorch-like U(-1/sqrt(H), 1/sqrt(H)))
# ---------------------------------------------------------------------------
def init_params(key, input_size, hidden_size, num_classes, num_layers):
    H, D, C, L = hidden_size, input_size, num_classes, num_layers
    k = 1.0 / jnp.sqrt(jnp.float32(H))
    keys = iter(jax.random.split(key, 8 * L + 8))
    u = lambda shape: jax.random.uniform(next(keys), shape, jnp.float32, -k, k)

    def lstm_layer(in_dim):
        # PyTorch stores W_ih:(4H,in), W_hh:(4H,H), b_ih:(4H,), b_hh:(4H,)
        return u((4 * H, in_dim)), u((4 * H, H)), u((4 * H,)), u((4 * H,))

    enc_layers = [lstm_layer(D if l == 0 else H) for l in range(L)]
    dec_layers = [lstm_layer(H) for _ in range(L)]

    enc_wih0 = enc_layers[0][0].T                                   # (D, 4H)
    if L > 1:
        enc_wih_r = jnp.stack([wl[0].T for wl in enc_layers[1:]], 0)  # (L-1,H,4H)
    else:
        enc_wih_r = jnp.zeros((1, H, 4 * H), jnp.float32)           # dummy, never read
    enc_whh = jnp.stack([wl[1].T for wl in enc_layers], 0)          # (L, H, 4H)
    enc_b = jnp.stack([(wl[2] + wl[3])[None, :] for wl in enc_layers], 0)
    dec_wih = jnp.stack([wl[0].T for wl in dec_layers], 0)          # (L, H, 4H)
    dec_whh = jnp.stack([wl[1].T for wl in dec_layers], 0)          # (L, H, 4H)
    dec_b = jnp.stack([(wl[2] + wl[3])[None, :] for wl in dec_layers], 0)

    params = {
        "enc_wih0": enc_wih0, "enc_wih_r": enc_wih_r,
        "enc_whh": enc_whh, "enc_b": enc_b,
        "dec_wih": dec_wih, "dec_whh": dec_whh, "dec_b": dec_b,
        # heads: Linear(H, C) and Linear(H, D), pre-transposed to (in, out)
        "w_cls": u((C, H)).T, "b_cls": u((C,))[None, :],
        "w_rec": u((D, H)).T, "b_rec": u((D,))[None, :],
    }
    return params, enc_layers, dec_layers


# ---------------------------------------------------------------------------
# Pure-JAX reference (verification only)
# ---------------------------------------------------------------------------
def _lstm_ref(x_seq, layers):
    B, T, _ = x_seq.shape
    seq = x_seq
    h = None
    for (w_ih, w_hh, b_ih, b_hh) in layers:
        H = w_hh.shape[1]
        h = jnp.zeros((B, H), jnp.float32)
        c = jnp.zeros((B, H), jnp.float32)
        outs = []
        for t in range(T):
            g = seq[:, t] @ w_ih.T + b_ih + h @ w_hh.T + b_hh
            i = jax.nn.sigmoid(g[:, :H])
            f = jax.nn.sigmoid(g[:, H:2 * H])
            gg = jnp.tanh(g[:, 2 * H:3 * H])
            o = jax.nn.sigmoid(g[:, 3 * H:])
            c = f * c + i * gg
            h = o * jnp.tanh(c)
            outs.append(h)
        seq = jnp.stack(outs, axis=1)
    return seq, h


def reference_forward(x, params, enc_layers, dec_layers):
    B, T, _ = x.shape
    _, z = _lstm_ref(x, enc_layers)
    logits = z @ params["w_cls"] + params["b_cls"]
    probs = jax.nn.softmax(logits, axis=-1)
    z_rep = jnp.broadcast_to(z[:, None, :], (B, T, z.shape[-1]))
    dec_out, _ = _lstm_ref(z_rep, dec_layers)
    rec = dec_out @ params["w_rec"] + params["b_rec"]
    return rec, probs


# ---------------------------------------------------------------------------
if __name__ == "__main__":
    BATCH, SEQ_LEN = 2, 8
    INPUT_SIZE, HIDDEN_SIZE, NUM_CLASSES, NUM_LAYERS = 16, 32, 10, 2

    key = jax.random.PRNGKey(0)
    kx, kp = jax.random.split(key)
    x = jax.random.normal(kx, (BATCH, SEQ_LEN, INPUT_SIZE), jnp.float32)
    params, enc_layers, dec_layers = init_params(
        kp, INPUT_SIZE, HIDDEN_SIZE, NUM_CLASSES, NUM_LAYERS)

    reconstructed, class_probs = lstm_autoencoder_forward(x, params)
    jax.block_until_ready((reconstructed, class_probs))

    rec_ref, probs_ref = reference_forward(x, params, enc_layers, dec_layers)
    assert reconstructed.shape == (BATCH, SEQ_LEN, INPUT_SIZE)
    assert class_probs.shape == (BATCH, NUM_CLASSES)
    assert jnp.allclose(reconstructed, rec_ref, atol=2e-4, rtol=2e-3)
    # probs tolerance loosened slightly for pl.reciprocal(approx=True)
    assert jnp.allclose(class_probs, probs_ref, atol=1e-3, rtol=2e-3)

    print("KERNEL_OK")
</pallas_src>

<mosaic_0001>
module attributes {stable_mosaic.version = 11 : i64} {
  func.func @_fused_kernel(%arg0: memref<2x8x16xf32, #tpu.memory_space<vmem>>, %arg1: memref<16x128xf32, #tpu.memory_space<vmem>>, %arg2: memref<1x32x128xf32, #tpu.memory_space<vmem>>, %arg3: memref<2x32x128xf32, #tpu.memory_space<vmem>>, %arg4: memref<2x1x128xf32, #tpu.memory_space<vmem>>, %arg5: memref<2x32x128xf32, #tpu.memory_space<vmem>>, %arg6: memref<2x32x128xf32, #tpu.memory_space<vmem>>, %arg7: memref<2x1x128xf32, #tpu.memory_space<vmem>>, %arg8: memref<32x10xf32, #tpu.memory_space<vmem>>, %arg9: memref<1x10xf32, #tpu.memory_space<vmem>>, %arg10: memref<32x16xf32, #tpu.memory_space<vmem>>, %arg11: memref<1x16xf32, #tpu.memory_space<vmem>>, %arg12: memref<2x128xf32, #tpu.memory_space<vmem>>, %arg13: memref<2x10xf32, #tpu.memory_space<vmem>>) attributes {dimension_semantics = [], scalar_prefetch = 0 : i64, scratch_operands = 0 : i64, tpu.core_type = #tpu.core_type<tc>} {
    %c0 = arith.constant 0 : index
    %c0_0 = arith.constant 0 : index
    %c0_1 = arith.constant 0 : index
    %0 = vector.load %arg0[%c0, %c0_0, %c0_1] : memref<2x8x16xf32, #tpu.memory_space<vmem>>, vector<2x8x16xf32>
    %c0_2 = arith.constant 0 : index
    %c0_3 = arith.constant 0 : index
    %c0_4 = arith.constant 0 : index
    %1 = vector.load %arg4[%c0_2, %c0_3, %c0_4] : memref<2x1x128xf32, #tpu.memory_space<vmem>>, vector<2x1x128xf32>
    %c0_5 = arith.constant 0 : index
    %c0_6 = arith.constant 0 : index
    %c0_7 = arith.constant 0 : index
    %2 = vector.load %arg3[%c0_5, %c0_6, %c0_7] : memref<2x32x128xf32, #tpu.memory_space<vmem>>, vector<2x32x128xf32>
    %c0_8 = arith.constant 0 : index
    %c0_9 = arith.constant 0 : index
    %c0_10 = arith.constant 0 : index
    %3 = vector.load %arg2[%c0_8, %c0_9, %c0_10] : memref<1x32x128xf32, #tpu.memory_space<vmem>>, vector<1x32x128xf32>
    %c0_11 = arith.constant 0 : index
    %c0_12 = arith.constant 0 : index
    %4 = vector.load %arg1[%c0_11, %c0_12] : memref<16x128xf32, #tpu.memory_space<vmem>>, vector<16x128xf32>
    %cst = arith.constant dense<0.000000e+00> : vector<2x8x128xf32>
    %5 = tpu.matmul %0, %4, %cst {dimension_numbers = #tpu.dot_dimension_numbers<[2], [0], [0, 1], [1], [0, 0, 0, 1, 1, 1], [], []>} : vector<2x8x16xf32>, vector<16x128xf32>, vector<2x8x128xf32> -> vector<2x8x128xf32>
    %6 = vector.extract_strided_slice %1 {offsets = [0, 0, 0], sizes = [1, 1, 128], strides = [1, 1, 1]} : vector<2x1x128xf32> to vector<1x1x128xf32>
    %7 = vector.shape_cast %6 : vector<1x1x128xf32> to vector<1x128xf32>
    %8 = vector.shape_cast %7 : vector<1x128xf32> to vector<1x1x128xf32>
    %9 = vector.broadcast %8 : vector<1x1x128xf32> to vector<2x8x128xf32>
    %10 = arith.addf %5, %9 : vector<2x8x128xf32>
    %cst_13 = arith.constant 0.000000e+00 : f32
    %11 = vector.broadcast %cst_13 : f32 to vector<2x32xf32>
    %cst_14 = arith.constant 0.000000e+00 : f32
    %12 = vector.broadcast %cst_14 : f32 to vector<2x32xf32>
    %cst_15 = arith.constant 0.000000e+00 : f32
    %13 = vector.broadcast %cst_15 : f32 to vector<2x32xf32>
    %cst_16 = arith.constant 0.000000e+00 : f32
    %14 = vector.broadcast %cst_16 : f32 to vector<2x32xf32>
    %15 = vector.extract_strided_slice %10 {offsets = [0, 0, 0], sizes = [2, 1, 128], strides = [1, 1, 1]} : vector<2x8x128xf32> to vector<2x1x128xf32>
    %16 = vector.shape_cast %15 : vector<2x1x128xf32> to vector<2x128xf32>
    %17 = vector.extract_strided_slice %2 {offsets = [0, 0, 0], sizes = [1, 32, 128], strides = [1, 1, 1]} : vector<2x32x128xf32> to vector<1x32x128xf32>
    %18 = vector.shape_cast %17 : vector<1x32x128xf32> to vector<32x128xf32>
    %cst_17 = arith.constant dense<0.000000e+00> : vector<2x128xf32>
    %19 = tpu.matmul %11, %18, %cst_17 {dimension_numbers = #tpu.dot_dimension_numbers<[1], [0], [0], [1], [0, 0, 1, 1], [], []>} : vector<2x32xf32>, vector<32x128xf32>, vector<2x128xf32> -> vector<2x128xf32>
    %20 = arith.addf %16, %19 : vector<2x128xf32>
    %21 = arith.negf %20 : vector<2x128xf32>
    %22 = math.exp %21 : vector<2x128xf32>
    %cst_18 = arith.constant 1.000000e+00 : f32
    %23 = vector.broadcast %cst_18 : f32 to vector<2x128xf32>
    %24 = arith.addf %23, %22 : vector<2x128xf32>
    %25 = arith.divf %23, %24 : vector<2x128xf32>
    %26 = math.tanh %20 : vector<2x128xf32>
    %27 = vector.extract_strided_slice %25 {offsets = [0, 0], sizes = [2, 32], strides = [1, 1]} : vector<2x128xf32> to vector<2x32xf32>
    %28 = vector.extract_strided_slice %25 {offsets = [0, 32], sizes = [2, 32], strides = [1, 1]} : vector<2x128xf32> to vector<2x32xf32>
    %29 = vector.extract_strided_slice %26 {offsets = [0, 64], sizes = [2, 32], strides = [1, 1]} : vector<2x128xf32> to vector<2x32xf32>
    %30 = vector.extract_strided_slice %25 {offsets = [0, 96], sizes = [2, 32], strides = [1, 1]} : vector<2x128xf32> to vector<2x32xf32>
    %31 = arith.mulf %28, %13 : vector<2x32xf32>
    %32 = arith.mulf %27, %29 : vector<2x32xf32>
    %33 = arith.addf %31, %32 : vector<2x32xf32>
    %34 = math.tanh %33 : vector<2x32xf32>
    %35 = arith.mulf %30, %34 : vector<2x32xf32>
    %36 = vector.shape_cast %3 : vector<1x32x128xf32> to vector<32x128xf32>
    %cst_19 = arith.constant dense<0.000000e+00> : vector<2x128xf32>
    %37 = tpu.matmul %35, %36, %cst_19 {dimension_numbers = #tpu.dot_dimension_numbers<[1], [0], [0], [1], [0, 0, 1, 1], [], []>} : vector<2x32xf32>, vector<32x128xf32>, vector<2x128xf32> -> vector<2x128xf32>
    %38 = vector.extract_strided_slice %2 {offsets = [1, 0, 0], sizes = [1, 32, 128], strides = [1, 1, 1]} : vector<2x32x128xf32> to vector<1x32x128xf32>
    %39 = vector.shape_cast %38 : vector<1x32x128xf32> to vector<32x128xf32>
    %cst_20 = arith.constant dense<0.000000e+00> : vector<2x128xf32>
    %40 = tpu.matmul %12, %39, %cst_20 {dimension_numbers = #tpu.dot_dimension_numbers<[1], [0], [0], [1], [0, 0, 1, 1], [], []>} : vector<2x32xf32>, vector<32x128xf32>, vector<2x128xf32> -> vector<2x128xf32>
    %41 = arith.addf %37, %40 : vector<2x128xf32>
    %42 = vector.extract_strided_slice %1 {offsets = [1, 0, 0], sizes = [1, 1, 128], strides = [1, 1, 1]} : vector<2x1x128xf32> to vector<1x1x128xf32>
    %43 = vector.shape_cast %42 : vector<1x1x128xf32> to vector<1x128xf32>
    %44 = vector.broadcast %43 : vector<1x128xf32> to vector<2x128xf32>
    %45 = arith.addf %41, %44 : vector<2x128xf32>
    %46 = arith.negf %45 : vector<2x128xf32>
    %47 = math.exp %46 : vector<2x128xf32>
    %cst_21 = arith.constant 1.000000e+00 : f32
    %48 = vector.broadcast %cst_21 : f32 to vector<2x128xf32>
    %49 = arith.addf %48, %47 : vector<2x128xf32>
    %50 = arith.divf %48, %49 : vector<2x128xf32>
    %51 = math.tanh %45 : vector<2x128xf32>
    %52 = vector.extract_strided_slice %50 {offsets = [0, 0], sizes = [2, 32], strides = [1, 1]} : vector<2x128xf32> to vector<2x32xf32>
    %53 = vector.extract_strided_slice %50 {offsets = [0, 32], sizes = [2, 32], strides = [1, 1]} : vector<2x128xf32> to vector<2x32xf32>
    %54 = vector.extract_strided_slice %51 {offsets = [0, 64], sizes = [2, 32], strides = [1, 1]} : vector<2x128xf32> to vector<2x32xf32>
    %55 = vector.extract_strided_slice %50 {offsets = [0, 96], sizes = [2, 32], strides = [1, 1]} : vector<2x128xf32> to vector<2x32xf32>
    %56 = arith.mulf %53, %14 : vector<2x32xf32>
    %57 = arith.mulf %52, %54 : vector<2x32xf32>
    %58 = arith.addf %56, %57 : vector<2x32xf32>
    %59 = math.tanh %58 : vector<2x32xf32>
    %60 = arith.mulf %55, %59 : vector<2x32xf32>
    %61 = vector.extract_strided_slice %10 {offsets = [0, 1, 0], sizes = [2, 1, 128], strides = [1, 1, 1]} : vector<2x8x128xf32> to vector<2x1x128xf32>
    %62 = vector.shape_cast %61 : vector<2x1x128xf32> to vector<2x128xf32>
    %63 = vector.extract_strided_slice %2 {offsets = [0, 0, 0], sizes = [1, 32, 128], strides = [1, 1, 1]} : vector<2x32x128xf32> to vector<1x32x128xf32>
    %64 = vector.shape_cast %63 : vector<1x32x128xf32> to vector<32x128xf32>
    %cst_22 = arith.constant dense<0.000000e+00> : vector<2x128xf32>
    %65 = tpu.matmul %35, %64, %cst_22 {dimension_numbers = #tpu.dot_dimension_numbers<[1], [0], [0], [1], [0, 0, 1, 1], [], []>} : vector<2x32xf32>, vector<32x128xf32>, vector<2x128xf32> -> vector<2x128xf32>
    %66 = arith.addf %62, %65 : vector<2x128xf32>
    %67 = arith.negf %66 : vector<2x128xf32>
    %68 = math.exp %67 : vector<2x128xf32>
    %cst_23 = arith.constant 1.000000e+00 : f32
    %69 = vector.broadcast %cst_23 : f32 to vector<2x128xf32>
    %70 = arith.addf %69, %68 : vector<2x128xf32>
    %71 = arith.divf %69, %70 : vector<2x128xf32>
    %72 = math.tanh %66 : vector<2x128xf32>
    %73 = vector.extract_strided_slice %71 {offsets = [0, 0], sizes = [2, 32], strides = [1, 1]} : vector<2x128xf32> to vector<2x32xf32>
    %74 = vector.extract_strided_slice %71 {offsets = [0, 32], sizes = [2, 32], strides = [1, 1]} : vector<2x128xf32> to vector<2x32xf32>
    %75 = vector.extract_strided_slice %72 {offsets = [0, 64], sizes = [2, 32], strides = [1, 1]} : vector<2x128xf32> to vector<2x32xf32>
    %76 = vector.extract_strided_slice %71 {offsets = [0, 96], sizes = [2, 32], strides = [1, 1]} : vector<2x128xf32> to vector<2x32xf32>
    %77 = arith.mulf %74, %33 : vector<2x32xf32>
    %78 = arith.mulf %73, %75 : vector<2x32xf32>
    %79 = arith.addf %77, %78 : vector<2x32xf32>
    %80 = math.tanh %79 : vector<2x32xf32>
    %81 = arith.mulf %76, %80 : vector<2x32xf32>
    %82 = vector.shape_cast %3 : vector<1x32x128xf32> to vector<32x128xf32>
    %cst_24 = arith.constant dense<0.000000e+00> : vector<2x128xf32>
    %83 = tpu.matmul %81, %82, %cst_24 {dimension_numbers = #tpu.dot_dimension_numbers<[1], [0], [0], [1], [0, 0, 1, 1], [], []>} : vector<2x32xf32>, vector<32x128xf32>, vector<2x128xf32> -> vector<2x128xf32>
    %84 = vector.extract_strided_slice %2 {offsets = [1, 0, 0], sizes = [1, 32, 128], strides = [1, 1, 1]} : vector<2x32x128xf32> to vector<1x32x128xf32>
    %85 = vector.shape_cast %84 : vector<1x32x128xf32> to vector<32x128xf32>
    %cst_25 = arith.constant dense<0.000000e+00> : vector<2x128xf32>
    %86 = tpu.matmul %60, %85, %cst_25 {dimension_numbers = #tpu.dot_dimension_numbers<[1], [0], [0], [1], [0, 0, 1, 1], [], []>} : vector<2x32xf32>, vector<32x128xf32>, vector<2x128xf32> -> vector<2x128xf32>
    %87 = arith.addf %83, %86 : vector<2x128xf32>
    %88 = vector.extract_strided_slice %1 {offsets = [1, 0, 0], sizes = [1, 1, 128], strides = [1, 1, 1]} : vector<2x1x128xf32> to vector<1x1x128xf32>
    %89 = vector.shape_cast %88 : vector<1x1x128xf32> to vector<1x128xf32>
    %90 = vector.broadcast %89 : vector<1x128xf32> to vector<2x128xf32>
    %91 = arith.addf %87, %90 : vector<2x128xf32>
    %92 = arith.negf %91 : vector<2x128xf32>
    %93 = math.exp %92 : vector<2x128xf32>
    %cst_26 = arith.constant 1.000000e+00 : f32
    %94 = vector.broadcast %cst_26 : f32 to vector<2x128xf32>
    %95 = arith.addf %94, %93 : vector<2x128xf32>
    %96 = arith.divf %94, %95 : vector<2x128xf32>
    %97 = math.tanh %91 : vector<2x128xf32>
    %98 = vector.extract_strided_slice %96 {offsets = [0, 0], sizes = [2, 32], strides = [1, 1]} : vector<2x128xf32> to vector<2x32xf32>
    %99 = vector.extract_strided_slice %96 {offsets = [0, 32], sizes = [2, 32], strides = [1, 1]} : vector<2x128xf32> to vector<2x32xf32>
    %100 = vector.extract_strided_slice %97 {offsets = [0, 64], sizes = [2, 32], strides = [1, 1]} : vector<2x128xf32> to vector<2x32xf32>
    %101 = vector.extract_strided_slice %96 {offsets = [0, 96], sizes = [2, 32], strides = [1, 1]} : vector<2x128xf32> to vector<2x32xf32>
    %102 = arith.mulf %99, %58 : vector<2x32xf32>
    %103 = arith.mulf %98, %100 : vector<2x32xf32>
    %104 = arith.addf %102, %103 : vector<2x32xf32>
    %105 = math.tanh %104 : vector<2x32xf32>
    %106 = arith.mulf %101, %105 : vector<2x32xf32>
    %107 = vector.extract_strided_slice %10 {offsets = [0, 2, 0], sizes = [2, 1, 128], strides = [1, 1, 1]} : vector<2x8x128xf32> to vector<2x1x128xf32>
    %108 = vector.shape_cast %107 : vector<2x1x128xf32> to vector<2x128xf32>
    %109 = vector.extract_strided_slice %2 {offsets = [0, 0, 0], sizes = [1, 32, 128], strides = [1, 1, 1]} : vector<2x32x128xf32> to vector<1x32x128xf32>
    %110 = vector.shape_cast %109 : vector<1x32x128xf32> to vector<32x128xf32>
    %cst_27 = arith.constant dense<0.000000e+00> : vector<2x128xf32>
    %111 = tpu.matmul %81, %110, %cst_27 {dimension_numbers = #tpu.dot_dimension_numbers<[1], [0], [0], [1], [0, 0, 1, 1], [], []>} : vector<2x32xf32>, vector<32x128xf32>, vector<2x128xf32> -> vector<2x128xf32>
    %112 = arith.addf %108, %111 : vector<2x128xf32>
    %113 = arith.negf %112 : vector<2x128xf32>
    %114 = math.exp %113 : vector<2x128xf32>
    %cst_28 = arith.constant 1.000000e+00 : f32
    %115 = vector.broadcast %cst_28 : f32 to vector<2x128xf32>
    %116 = arith.addf %115, %114 : vector<2x128xf32>
    %117 = arith.divf %115, %116 : vector<2x128xf32>
    %118 = math.tanh %112 : vector<2x128xf32>
    %119 = vector.extract_strided_slice %117 {offsets = [0, 0], sizes = [2, 32], strides = [1, 1]} : vector<2x128xf32> to vector<2x32xf32>
    %120 = vector.extract_strided_slice %117 {offsets = [0, 32], sizes = [2, 32], strides = [1, 1]} : vector<2x128xf32> to vector<2x32xf32>
    %121 = vector.extract_strided_slice %118 {offsets = [0, 64], sizes = [2, 32], strides = [1, 1]} : vector<2x128xf32> to vector<2x32xf32>
    %122 = vector.extract_strided_slice %117 {offsets = [0, 96], sizes = [2, 32], strides = [1, 1]} : vector<2x128xf32> to vector<2x32xf32>
    %123 = arith.mulf %120, %79 : vector<2x32xf32>
    %124 = arith.mulf %119, %121 : vector<2x32xf32>
    %125 = arith.addf %123, %124 : vector<2x32xf32>
    %126 = math.tanh %125 : vector<2x32xf32>
    %127 = arith.mulf %122, %126 : vector<2x32xf32>
    %128 = vector.shape_cast %3 : vector<1x32x128xf32> to vector<32x128xf32>
    %cst_29 = arith.constant dense<0.000000e+00> : vector<2x128xf32>
    %129 = tpu.matmul %127, %128, %cst_29 {dimension_numbers = #tpu.dot_dimension_numbers<[1], [0], [0], [1], [0, 0, 1, 1], [], []>} : vector<2x32xf32>, vector<32x128xf32>, vector<2x128xf32> -> vector<2x128xf32>
    %130 = vector.extract_strided_slice %2 {offsets = [1, 0, 0], sizes = [1, 32, 128], strides = [1, 1, 1]} : vector<2x32x128xf32> to vector<1x32x128xf32>
    %131 = vector.shape_cast %130 : vector<1x32x128xf32> to vector<32x128xf32>
    %cst_30 = arith.constant dense<0.000000e+00> : vector<2x128xf32>
    %132 = tpu.matmul %106, %131, %cst_30 {dimension_numbers = #tpu.dot_dimension_numbers<[1], [0], [0], [1], [0, 0, 1, 1], [], []>} : vector<2x32xf32>, vector<32x128xf32>, vector<2x128xf32> -> vector<2x128xf32>
    %133 = arith.addf %129, %132 : vector<2x128xf32>
    %134 = vector.extract_strided_slice %1 {offsets = [1, 0, 0], sizes = [1, 1, 128], strides = [1, 1, 1]} : vector<2x1x128xf32> to vector<1x1x128xf32>
    %135 = vector.shape_cast %134 : vector<1x1x128xf32> to vector<1x128xf32>
    %136 = vector.broadcast %135 : vector<1x128xf32> to vector<2x128xf32>
    %137 = arith.addf %133, %136 : vector<2x128xf32>
    %138 = arith.negf %137 : vector<2x128xf32>
    %139 = math.exp %138 : vector<2x128xf32>
    %cst_31 = arith.constant 1.000000e+00 : f32
    %140 = vector.broadcast %cst_31 : f32 to vector<2x128xf32>
    %141 = arith.addf %140, %139 : vector<2x128xf32>
    %142 = arith.divf %140, %141 : vector<2x128xf32>
    %143 = math.tanh %137 : vector<2x128xf32>
    %144 = vector.extract_strided_slice %142 {offsets = [0, 0], sizes = [2, 32], strides = [1, 1]} : vector<2x128xf32> to vector<2x32xf32>
    %145 = vector.extract_strided_slice %142 {offsets = [0, 32], sizes = [2, 32], strides = [1, 1]} : vector<2x128xf32> to vector<2x32xf32>
    %146 = vector.extract_strided_slice %143 {offsets = [0, 64], sizes = [2, 32], strides = [1, 1]} : vector<2x128xf32> to vector<2x32xf32>
    %147 = vector.extract_strided_slice %142 {offsets = [0, 96], sizes = [2, 32], strides = [1, 1]} : vector<2x128xf32> to vector<2x32xf32>
    %148 = arith.mulf %145, %104 : vector<2x32xf32>
    %149 = arith.mulf %144, %146 : vector<2x32xf32>
    %150 = arith.addf %148, %149 : vector<2x32xf32>
    %151 = math.tanh %150 : vector<2x32xf32>
    %152 = arith.mulf %147, %151 : vector<2x32xf32>
    %153 = vector.extract_strided_slice %10 {offsets = [0, 3, 0], sizes = [2, 1, 128], strides = [1, 1, 1]} : vector<2x8x128xf32> to vector<2x1x128xf32>
    %154 = vector.shape_cast %153 : vector<2x1x128xf32> to vector<2x128xf32>
    %155 = vector.extract_strided_slice %2 {offsets = [0, 0, 0], sizes = [1, 32, 128], strides = [1, 1, 1]} : vector<2x32x128xf32> to vector<1x32x128xf32>
    %156 = vector.shape_cast %155 : vector<1x32x128xf32> to vector<32x128xf32>
    %cst_32 = arith.constant dense<0.000000e+00> : vector<2x128xf32>
    %157 = tpu.matmul %127, %156, %cst_32 {dimension_numbers = #tpu.dot_dimension_numbers<[1], [0], [0], [1], [0, 0, 1, 1], [], []>} : vector<2x32xf32>, vector<32x128xf32>, vector<2x128xf32> -> vector<2x128xf32>
    %158 = arith.addf %154, %157 : vector<2x128xf32>
    %159 = arith.negf %158 : vector<2x128xf32>
    %160 = math.exp %159 : vector<2x128xf32>
    %cst_33 = arith.constant 1.000000e+00 : f32
    %161 = vector.broadcast %cst_33 : f32 to vector<2x128xf32>
    %162 = arith.addf %161, %160 : vector<2x128xf32>
    %163 = arith.divf %161, %162 : vector<2x128xf32>
    %164 = math.tanh %158 : vector<2x128xf32>
    %165 = vector.extract_strided_slice %163 {offsets = [0, 0], sizes = [2, 32], strides = [1, 1]} : vector<2x128xf32> to vector<2x32xf32>
    %166 = vector.extract_strided_slice %163 {offsets = [0, 32], sizes = [2, 32], strides = [1, 1]} : vector<2x128xf32> to vector<2x32xf32>
    %167 = vector.extract_strided_slice %164 {offsets = [0, 64], sizes = [2, 32], strides = [1, 1]} : vector<2x128xf32> to vector<2x32xf32>
    %168 = vector.extract_strided_slice %163 {offsets = [0, 96], sizes = [2, 32], strides = [1, 1]} : vector<2x128xf32> to vector<2x32xf32>
    %169 = arith.mulf %166, %125 : vector<2x32xf32>
    %170 = arith.mulf %165, %167 : vector<2x32xf32>
    %171 = arith.addf %169, %170 : vector<2x32xf32>
    %172 = math.tanh %171 : vector<2x32xf32>
    %173 = arith.mulf %168, %172 : vector<2x32xf32>
    %174 = vector.shape_cast %3 : vector<1x32x128xf32> to vector<32x128xf32>
    %cst_34 = arith.constant dense<0.000000e+00> : vector<2x128xf32>
    %175 = tpu.matmul %173, %174, %cst_34 {dimension_numbers = #tpu.dot_dimension_numbers<[1], [0], [0], [1], [0, 0, 1, 1], [], []>} : vector<2x32xf32>, vector<32x128xf32>, vector<2x128xf32> -> vector<2x128xf32>
    %176 = vector.extract_strided_slice %2 {offsets = [1, 0, 0], sizes = [1, 32, 128], strides = [1, 1, 1]} : vector<2x32x128xf32> to vector<1x32x128xf32>
    %177 = vector.shape_cast %176 : vector<1x32x128xf32> to vector<32x128xf32>
    %cst_35 = arith.constant dense<0.000000e+00> : vector<2x128xf32>
    %178 = tpu.matmul %152, %177, %cst_35 {dimension_numbers = #tpu.dot_dimension_numbers<[1], [0], [0], [1], [0, 0, 1, 1], [], []>} : vector<2x32xf32>, vector<32x128xf32>, vector<2x128xf32> -> vector<2x128xf32>
    %179 = arith.addf %175, %178 : vector<2x128xf32>
    %180 = vector.extract_strided_slice %1 {offsets = [1, 0, 0], sizes = [1, 1, 128], strides = [1, 1, 1]} : vector<2x1x128xf32> to vector<1x1x128xf32>
    %181 = vector.shape_cast %180 : vector<1x1x128xf32> to vector<1x128xf32>
    %182 = vector.broadcast %181 : vector<1x128xf32> to vector<2x128xf32>
    %183 = arith.addf %179, %182 : vector<2x128xf32>
    %184 = arith.negf %183 : vector<2x128xf32>
    %185 = math.exp %184 : vector<2x128xf32>
    %cst_36 = arith.constant 1.000000e+00 : f32
    %186 = vector.broadcast %cst_36 : f32 to vector<2x128xf32>
    %187 = arith.addf %186, %185 : vector<2x128xf32>
    %188 = arith.divf %186, %187 : vector<2x128xf32>
    %189 = math.tanh %183 : vector<2x128xf32>
    %190 = vector.extract_strided_slice %188 {offsets = [0, 0], sizes = [2, 32], strides = [1, 1]} : vector<2x128xf32> to vector<2x32xf32>
    %191 = vector.extract_strided_slice %188 {offsets = [0, 32], sizes = [2, 32], strides = [1, 1]} : vector<2x128xf32> to vector<2x32xf32>
    %192 = vector.extract_strided_slice %189 {offsets = [0, 64], sizes = [2, 32], strides = [1, 1]} : vector<2x128xf32> to vector<2x32xf32>
    %193 = vector.extract_strided_slice %188 {offsets = [0, 96], sizes = [2, 32], strides = [1, 1]} : vector<2x128xf32> to vector<2x32xf32>
    %194 = arith.mulf %191, %150 : vector<2x32xf32>
    %195 = arith.mulf %190, %192 : vector<2x32xf32>
    %196 = arith.addf %194, %195 : vector<2x32xf32>
    %197 = math.tanh %196 : vector<2x32xf32>
    %198 = arith.mulf %193, %197 : vector<2x32xf32>
    %199 = vector.extract_strided_slice %10 {offsets = [0, 4, 0], sizes = [2, 1, 128], strides = [1, 1, 1]} : vector<2x8x128xf32> to vector<2x1x128xf32>
    %200 = vector.shape_cast %199 : vector<2x1x128xf32> to vector<2x128xf32>
    %201 = vector.extract_strided_slice %2 {offsets = [0, 0, 0], sizes = [1, 32, 128], strides = [1, 1, 1]} : vector<2x32x128xf32> to vector<1x32x128xf32>
    %202 = vector.shape_cast %201 : vector<1x32x128xf32> to vector<32x128xf32>
    %cst_37 = arith.constant dense<0.000000e+00> : vector<2x128xf32>
    %203 = tpu.matmul %173, %202, %cst_37 {dimension_numbers = #tpu.dot_dimension_numbers<[1], [0], [0], [1], [0, 0, 1, 1], [], []>} : vector<2x32xf32>, vector<32x128xf32>, vector<2x128xf32> -> vector<2x128xf32>
    %204 = arith.addf %200, %203 : vector<2x128xf32>
    %205 = arith.negf %204 : vector<2x128xf32>
    %206 = math.exp %205 : vector<2x128xf32>
    %cst_38 = arith.constant 1.000000e+00 : f32
    %207 = vector.broadcast %cst_38 : f32 to vector<2x128xf32>
    %208 = arith.addf %207, %206 : vector<2x128xf32>
    %209 = arith.divf %207, %208 : vector<2x128xf32>
    %210 = math.tanh %204 : vector<2x128xf32>
    %211 = vector.extract_strided_slice %209 {offsets = [0, 0], sizes = [2, 32], strides = [1, 1]} : vector<2x128xf32> to vector<2x32xf32>
    %212 = vector.extract_strided_slice %209 {offsets = [0, 32], sizes = [2, 32], strides = [1, 1]} : vector<2x128xf32> to vector<2x32xf32>
    %213 = vector.extract_strided_slice %210 {offsets = [0, 64], sizes = [2, 32], strides = [1, 1]} : vector<2x128xf32> to vector<2x32xf32>
    %214 = vector.extract_strided_slice %209 {offsets = [0, 96], sizes = [2, 32], strides = [1, 1]} : vector<2x128xf32> to vector<2x32xf32>
    %215 = arith.mulf %212, %171 : vector<2x32xf32>
    %216 = arith.mulf %211, %213 : vector<2x32xf32>
    %217 = arith.addf %215, %216 : vector<2x32xf32>
    %218 = math.tanh %217 : vector<2x32xf32>
    %219 = arith.mulf %214, %218 : vector<2x32xf32>
    %220 = vector.shape_cast %3 : vector<1x32x128xf32> to vector<32x128xf32>
    %cst_39 = arith.constant dense<0.000000e+00> : vector<2x128xf32>
    %221 = tpu.matmul %219, %220, %cst_39 {dimension_numbers = #tpu.dot_dimension_numbers<[1], [0], [0], [1], [0, 0, 1, 1], [], []>} : vector<2x32xf32>, vector<32x128xf32>, vector<2x128xf32> -> vector<2x128xf32>
    %222 = vector.extract_strided_slice %2 {offsets = [1, 0, 0], sizes = [1, 32, 128], strides = [1, 1, 1]} : vector<2x32x128xf32> to vector<1x32x128xf32>
    %223 = vector.shape_cast %222 : vector<1x32x128xf32> to vector<32x128xf32>
    %cst_40 = arith.constant dense<0.000000e+00> : vector<2x128xf32>
    %224 = tpu.matmul %198, %223, %cst_40 {dimension_numbers = #tpu.dot_dimension_numbers<[1], [0], [0], [1], [0, 0, 1, 1], [], []>} : vector<2x32xf32>, vector<32x128xf32>, vector<2x128xf32> -> vector<2x128xf32>
    %225 = arith.addf %221, %224 : vector<2x128xf32>
    %226 = vector.extract_strided_slice %1 {offsets = [1, 0, 0], sizes = [1, 1, 128], strides = [1, 1, 1]} : vector<2x1x128xf32> to vector<1x1x128xf32>
    %227 = vector.shape_cast %226 : vector<1x1x128xf32> to vector<1x128xf32>
    %228 = vector.broadcast %227 : vector<1x128xf32> to vector<2x128xf32>
    %229 = arith.addf %225, %228 : vector<2x128xf32>
    %230 = arith.negf %229 : vector<2x128xf32>
    %231 = math.exp %230 : vector<2x128xf32>
    %cst_41 = arith.constant 1.000000e+00 : f32
    %232 = vector.broadcast %cst_41 : f32 to vector<2x128xf32>
    %233 = arith.addf %232, %231 : vector<2x128xf32>
    %234 = arith.divf %232, %233 : vector<2x128xf32>
    %235 = math.tanh %229 : vector<2x128xf32>
    %236 = vector.extract_strided_slice %234 {offsets = [0, 0], sizes = [2, 32], strides = [1, 1]} : vector<2x128xf32> to vector<2x32xf32>
    %237 = vector.extract_strided_slice %234 {offsets = [0, 32], sizes = [2, 32], strides = [1, 1]} : vector<2x128xf32> to vector<2x32xf32>
    %238 = vector.extract_strided_slice %235 {offsets = [0, 64], sizes = [2, 32], strides = [1, 1]} : vector<2x128xf32> to vector<2x32xf32>
    %239 = vector.extract_strided_slice %234 {offsets = [0, 96], sizes = [2, 32], strides = [1, 1]} : vector<2x128xf32> to vector<2x32xf32>
    %240 = arith.mulf %237, %196 : vector<2x32xf32>
    %241 = arith.mulf %236, %238 : vector<2x32xf32>
    %242 = arith.addf %240, %241 : vector<2x32xf32>
    %243 = math.tanh %242 : vector<2x32xf32>
    %244 = arith.mulf %239, %243 : vector<2x32xf32>
    %245 = vector.extract_strided_slice %10 {offsets = [0, 5, 0], sizes = [2, 1, 128], strides = [1, 1, 1]} : vector<2x8x128xf32> to vector<2x1x128xf32>
    %246 = vector.shape_cast %245 : vector<2x1x128xf32> to vector<2x128xf32>
    %247 = vector.extract_strided_slice %2 {offsets = [0, 0, 0], sizes = [1, 32, 128], strides = [1, 1, 1]} : vector<2x32x128xf32> to vector<1x32x128xf32>
    %248 = vector.shape_cast %247 : vector<1x32x128xf32> to vector<32x128xf32>
    %cst_42 = arith.constant dense<0.000000e+00> : vector<2x128xf32>
    %249 = tpu.matmul %219, %248, %cst_42 {dimension_numbers = #tpu.dot_dimension_numbers<[1], [0], [0], [1], [0, 0, 1, 1], [], []>} : vector<2x32xf32>, vector<32x128xf32>, vector<2x128xf32> -> vector<2x128xf32>
    %250 = arith.addf %246, %249 : vector<2x128xf32>
    %251 = arith.negf %250 : vector<2x128xf32>
    %252 = math.exp %251 : vector<2x128xf32>
    %cst_43 = arith.constant 1.000000e+00 : f32
    %253 = vector.broadcast %cst_43 : f32 to vector<2x128xf32>
    %254 = arith.addf %253, %252 : vector<2x128xf32>
    %255 = arith.divf %253, %254 : vector<2x128xf32>
    %256 = math.tanh %250 : vector<2x128xf32>
    %257 = vector.extract_strided_slice %255 {offsets = [0, 0], sizes = [2, 32], strides = [1, 1]} : vector<2x128xf32> to vector<2x32xf32>
    %258 = vector.extract_strided_slice %255 {offsets = [0, 32], sizes = [2, 32], strides = [1, 1]} : vector<2x128xf32> to vector<2x32xf32>
    %259 = vector.extract_strided_slice %256 {offsets = [0, 64], sizes = [2, 32], strides = [1, 1]} : vector<2x128xf32> to vector<2x32xf32>
    %260 = vector.extract_strided_slice %255 {offsets = [0, 96], sizes = [2, 32], strides = [1, 1]} : vector<2x128xf32> to vector<2x32xf32>
    %261 = arith.mulf %258, %217 : vector<2x32xf32>
    %262 = arith.mulf %257, %259 : vector<2x32xf32>
    %263 = arith.addf %261, %262 : vector<2x32xf32>
    %264 = math.tanh %263 : vector<2x32xf32>
    %265 = arith.mulf %260, %264 : vector<2x32xf32>
    %266 = vector.shape_cast %3 : vector<1x32x128xf32> to vector<32x128xf32>
    %cst_44 = arith.constant dense<0.000000e+00> : vector<2x128xf32>
    %267 = tpu.matmul %265, %266, %cst_44 {dimension_numbers = #tpu.dot_dimension_numbers<[1], [0], [0], [1], [0, 0, 1, 1], [], []>} : vector<2x32xf32>, vector<32x128xf32>, vector<2x128xf32> -> vector<2x128xf32>
    %268 = vector.extract_strided_slice %2 {offsets = [1, 0, 0], sizes = [1, 32, 128], strides = [1, 1, 1]} : vector<2x32x128xf32> to vector<1x32x128xf32>
    %269 = vector.shape_cast %268 : vector<1x32x128xf32> to vector<32x128xf32>
    %cst_45 = arith.constant dense<0.000000e+00> : vector<2x128xf32>
    %270 = tpu.matmul %244, %269, %cst_45 {dimension_numbers = #tpu.dot_dimension_numbers<[1], [0], [0], [1], [0, 0, 1, 1], [], []>} : vector<2x32xf32>, vector<32x128xf32>, vector<2x128xf32> -> vector<2x128xf32>
    %271 = arith.addf %267, %270 : vector<2x128xf32>
    %272 = vector.extract_strided_slice %1 {offsets = [1, 0, 0], sizes = [1, 1, 128], strides = [1, 1, 1]} : vector<2x1x128xf32> to vector<1x1x128xf32>
    %273 = vector.shape_cast %272 : vector<1x1x128xf32> to vector<1x128xf32>
    %274 = vector.broadcast %273 : vector<1x128xf32> to vector<2x128xf32>
    %275 = arith.addf %271, %274 : vector<2x128xf32>
    %276 = arith.negf %275 : vector<2x128xf32>
    %277 = math.exp %276 : vector<2x128xf32>
    %cst_46 = arith.constant 1.000000e+00 : f32
    %278 = vector.broadcast %cst_46 : f32 to vector<2x128xf32>
    %279 = arith.addf %278, %277 : vector<2x128xf32>
    %280 = arith.divf %278, %279 : vector<2x128xf32>
    %281 = math.tanh %275 : vector<2x128xf32>
    %282 = vector.extract_strided_slice %280 {offsets = [0, 0], sizes = [2, 32], strides = [1, 1]} : vector<2x128xf32> to vector<2x32xf32>
    %283 = vector.extract_strided_slice %280 {offsets = [0, 32], sizes = [2, 32], strides = [1, 1]} : vector<2x128xf32> to vector<2x32xf32>
    %284 = vector.extract_strided_slice %281 {offsets = [0, 64], sizes = [2, 32], strides = [1, 1]} : vector<2x128xf32> to vector<2x32xf32>
    %285 = vector.extract_strided_slice %280 {offsets = [0, 96], sizes = [2, 32], strides = [1, 1]} : vector<2x128xf32> to vector<2x32xf32>
    %286 = arith.mulf %283, %242 : vector<2x32xf32>
    %287 = arith.mulf %282, %284 : vector<2x32xf32>
    %288 = arith.addf %286, %287 : vector<2x32xf32>
    %289 = math.tanh %288 : vector<2x32xf32>
    %290 = arith.mulf %285, %289 : vector<2x32xf32>
    %291 = vector.extract_strided_slice %10 {offsets = [0, 6, 0], sizes = [2, 1, 128], strides = [1, 1, 1]} : vector<2x8x128xf32> to vector<2x1x128xf32>
    %292 = vector.shape_cast %291 : vector<2x1x128xf32> to vector<2x128xf32>
    %293 = vector.extract_strided_slice %2 {offsets = [0, 0, 0], sizes = [1, 32, 128], strides = [1, 1, 1]} : vector<2x32x128xf32> to vector<1x32x128xf32>
    %294 = vector.shape_cast %293 : vector<1x32x128xf32> to vector<32x128xf32>
    %cst_47 = arith.constant dense<0.000000e+00> : vector<2x128xf32>
    %295 = tpu.matmul %265, %294, %cst_47 {dimension_numbers = #tpu.dot_dimension_numbers<[1], [0], [0], [1], [0, 0, 1, 1], [], []>} : vector<2x32xf32>, vector<32x128xf32>, vector<2x128xf32> -> vector<2x128xf32>
    %296 = arith.addf %292, %295 : vector<2x128xf32>
    %297 = arith.negf %296 : vector<2x128xf32>
    %298 = math.exp %297 : vector<2x128xf32>
    %cst_48 = arith.constant 1.000000e+00 : f32
    %299 = vector.broadcast %cst_48 : f32 to vector<2x128xf32>
    %300 = arith.addf %299, %298 : vector<2x128xf32>
    %301 = arith.divf %299, %300 : vector<2x128xf32>
    %302 = math.tanh %296 : vector<2x128xf32>
    %303 = vector.extract_strided_slice %301 {offsets = [0, 0], sizes = [2, 32], strides = [1, 1]} : vector<2x128xf32> to vector<2x32xf32>
    %304 = vector.extract_strided_slice %301 {offsets = [0, 32], sizes = [2, 32], strides = [1, 1]} : vector<2x128xf32> to vector<2x32xf32>
    %305 = vector.extract_strided_slice %302 {offsets = [0, 64], sizes = [2, 32], strides = [1, 1]} : vector<2x128xf32> to vector<2x32xf32>
    %306 = vector.extract_strided_slice %301 {offsets = [0, 96], sizes = [2, 32], strides = [1, 1]} : vector<2x128xf32> to vector<2x32xf32>
    %307 = arith.mulf %304, %263 : vector<2x32xf32>
    %308 = arith.mulf %303, %305 : vector<2x32xf32>
    %309 = arith.addf %307, %308 : vector<2x32xf32>
    %310 = math.tanh %309 : vector<2x32xf32>
    %311 = arith.mulf %306, %310 : vector<2x32xf32>
    %312 = vector.shape_cast %3 : vector<1x32x128xf32> to vector<32x128xf32>
    %cst_49 = arith.constant dense<0.000000e+00> : vector<2x128xf32>
    %313 = tpu.matmul %311, %312, %cst_49 {dimension_numbers = #tpu.dot_dimension_numbers<[1], [0], [0], [1], [0, 0, 1, 1], [], []>} : vector<2x32xf32>, vector<32x128xf32>, vector<2x128xf32> -> vector<2x128xf32>
    %314 = vector.extract_strided_slice %2 {offsets = [1, 0, 0], sizes = [1, 32, 128], strides = [1, 1, 1]} : vector<2x32x128xf32> to vector<1x32x128xf32>
    %315 = vector.shape_cast %314 : vector<1x32x128xf32> to vector<32x128xf32>
    %cst_50 = arith.constant dense<0.000000e+00> : vector<2x128xf32>
    %316 = tpu.matmul %290, %315, %cst_50 {dimension_numbers = #tpu.dot_dimension_numbers<[1], [0], [0], [1], [0, 0, 1, 1], [], []>} : vector<2x32xf32>, vector<32x128xf32>, vector<2x128xf32> -> vector<2x128xf32>
    %317 = arith.addf %313, %316 : vector<2x128xf32>
    %318 = vector.extract_strided_slice %1 {offsets = [1, 0, 0], sizes = [1, 1, 128], strides = [1, 1, 1]} : vector<2x1x128xf32> to vector<1x1x128xf32>
    %319 = vector.shape_cast %318 : vector<1x1x128xf32> to vector<1x128xf32>
    %320 = vector.broadcast %319 : vector<1x128xf32> to vector<2x128xf32>
    %321 = arith.addf %317, %320 : vector<2x128xf32>
    %322 = arith.negf %321 : vector<2x128xf32>
    %323 = math.exp %322 : vector<2x128xf32>
    %cst_51 = arith.constant 1.000000e+00 : f32
    %324 = vector.broadcast %cst_51 : f32 to vector<2x128xf32>
    %325 = arith.addf %324, %323 : vector<2x128xf32>
    %326 = arith.divf %324, %325 : vector<2x128xf32>
    %327 = math.tanh %321 : vector<2x128xf32>
    %328 = vector.extract_strided_slice %326 {offsets = [0, 0], sizes = [2, 32], strides = [1, 1]} : vector<2x128xf32> to vector<2x32xf32>
    %329 = vector.extract_strided_slice %326 {offsets = [0, 32], sizes = [2, 32], strides = [1, 1]} : vector<2x128xf32> to vector<2x32xf32>
    %330 = vector.extract_strided_slice %327 {offsets = [0, 64], sizes = [2, 32], strides = [1, 1]} : vector<2x128xf32> to vector<2x32xf32>
    %331 = vector.extract_strided_slice %326 {offsets = [0, 96], sizes = [2, 32], strides = [1, 1]} : vector<2x128xf32> to vector<2x32xf32>
    %332 = arith.mulf %329, %288 : vector<2x32xf32>
    %333 = arith.mulf %328, %330 : vector<2x32xf32>
    %334 = arith.addf %332, %333 : vector<2x32xf32>
    %335 = math.tanh %334 : vector<2x32xf32>
    %336 = arith.mulf %331, %335 : vector<2x32xf32>
    %337 = vector.extract_strided_slice %10 {offsets = [0, 7, 0], sizes = [2, 1, 128], strides = [1, 1, 1]} : vector<2x8x128xf32> to vector<2x1x128xf32>
    %338 = vector.shape_cast %337 : vector<2x1x128xf32> to vector<2x128xf32>
    %339 = vector.extract_strided_slice %2 {offsets = [0, 0, 0], sizes = [1, 32, 128], strides = [1, 1, 1]} : vector<2x32x128xf32> to vector<1x32x128xf32>
    %340 = vector.shape_cast %339 : vector<1x32x128xf32> to vector<32x128xf32>
    %cst_52 = arith.constant dense<0.000000e+00> : vector<2x128xf32>
    %341 = tpu.matmul %311, %340, %cst_52 {dimension_numbers = #tpu.dot_dimension_numbers<[1], [0], [0], [1], [0, 0, 1, 1], [], []>} : vector<2x32xf32>, vector<32x128xf32>, vector<2x128xf32> -> vector<2x128xf32>
    %342 = arith.addf %338, %341 : vector<2x128xf32>
    %343 = arith.negf %342 : vector<2x128xf32>
    %344 = math.exp %343 : vector<2x128xf32>
    %cst_53 = arith.constant 1.000000e+00 : f32
    %345 = vector.broadcast %cst_53 : f32 to vector<2x128xf32>
    %346 = arith.addf %345, %344 : vector<2x128xf32>
    %347 = arith.divf %345, %346 : vector<2x128xf32>
    %348 = math.tanh %342 : vector<2x128xf32>
    %349 = vector.extract_strided_slice %347 {offsets = [0, 0], sizes = [2, 32], strides = [1, 1]} : vector<2x128xf32> to vector<2x32xf32>
    %350 = vector.extract_strided_slice %347 {offsets = [0, 32], sizes = [2, 32], strides = [1, 1]} : vector<2x128xf32> to vector<2x32xf32>
    %351 = vector.extract_strided_slice %348 {offsets = [0, 64], sizes = [2, 32], strides = [1, 1]} : vector<2x128xf32> to vector<2x32xf32>
    %352 = vector.extract_strided_slice %347 {offsets = [0, 96], sizes = [2, 32], strides = [1, 1]} : vector<2x128xf32> to vector<2x32xf32>
    %353 = arith.mulf %350, %309 : vector<2x32xf32>
    %354 = arith.mulf %349, %351 : vector<2x32xf32>
    %355 = arith.addf %353, %354 : vector<2x32xf32>
    %356 = math.tanh %355 : vector<2x32xf32>
    %357 = arith.mulf %352, %356 : vector<2x32xf32>
    %358 = vector.shape_cast %3 : vector<1x32x128xf32> to vector<32x128xf32>
    %cst_54 = arith.constant dense<0.000000e+00> : vector<2x128xf32>
    %359 = tpu.matmul %357, %358, %cst_54 {dimension_numbers = #tpu.dot_dimension_numbers<[1], [0], [0], [1], [0, 0, 1, 1], [], []>} : vector<2x32xf32>, vector<32x128xf32>, vector<2x128xf32> -> vector<2x128xf32>
    %360 = vector.extract_strided_slice %2 {offsets = [1, 0, 0], sizes = [1, 32, 128], strides = [1, 1, 1]} : vector<2x32x128xf32> to vector<1x32x128xf32>
    %361 = vector.shape_cast %360 : vector<1x32x128xf32> to vector<32x128xf32>
    %cst_55 = arith.constant dense<0.000000e+00> : vector<2x128xf32>
    %362 = tpu.matmul %336, %361, %cst_55 {dimension_numbers = #tpu.dot_dimension_numbers<[1], [0], [0], [1], [0, 0, 1, 1], [], []>} : vector<2x32xf32>, vector<32x128xf32>, vector<2x128xf32> -> vector<2x128xf32>
    %363 = arith.addf %359, %362 : vector<2x128xf32>
    %364 = vector.extract_strided_slice %1 {offsets = [1, 0, 0], sizes = [1, 1, 128], strides = [1, 1, 1]} : vector<2x1x128xf32> to vector<1x1x128xf32>
    %365 = vector.shape_cast %364 : vector<1x1x128xf32> to vector<1x128xf32>
    %366 = vector.broadcast %365 : vector<1x128xf32> to vector<2x128xf32>
    %367 = arith.addf %363, %366 : vector<2x128xf32>
    %368 = arith.negf %367 : vector<2x128xf32>
    %369 = math.exp %368 : vector<2x128xf32>
    %cst_56 = arith.constant 1.000000e+00 : f32
    %370 = vector.broadcast %cst_56 : f32 to vector<2x128xf32>
    %371 = arith.addf %370, %369 : vector<2x128xf32>
    %372 = arith.divf %370, %371 : vector<2x128xf32>
    %373 = math.tanh %367 : vector<2x128xf32>
    %374 = vector.extract_strided_slice %372 {offsets = [0, 0], sizes = [2, 32], strides = [1, 1]} : vector<2x128xf32> to vector<2x32xf32>
    %375 = vector.extract_strided_slice %372 {offsets = [0, 32], sizes = [2, 32], strides = [1, 1]} : vector<2x128xf32> to vector<2x32xf32>
    %376 = vector.extract_strided_slice %373 {offsets = [0, 64], sizes = [2, 32], strides = [1, 1]} : vector<2x128xf32> to vector<2x32xf32>
    %377 = vector.extract_strided_slice %372 {offsets = [0, 96], sizes = [2, 32], strides = [1, 1]} : vector<2x128xf32> to vector<2x32xf32>
    %378 = arith.mulf %375, %334 : vector<2x32xf32>
    %379 = arith.mulf %374, %376 : vector<2x32xf32>
    %380 = arith.addf %378, %379 : vector<2x32xf32>
    %381 = math.tanh %380 : vector<2x32xf32>
    %382 = arith.mulf %377, %381 : vector<2x32xf32>
    %c0_57 = arith.constant 0 : index
    %c0_58 = arith.constant 0 : index
    %383 = vector.load %arg8[%c0_57, %c0_58] : memref<32x10xf32, #tpu.memory_space<vmem>>, vector<32x10xf32>
    %cst_59 = arith.constant dense<0.000000e+00> : vector<2x10xf32>
    %384 = tpu.matmul %382, %383, %cst_59 {dimension_numbers = #tpu.dot_dimension_numbers<[1], [0], [0], [1], [0, 0, 1, 1], [], []>} : vector<2x32xf32>, vector<32x10xf32>, vector<2x10xf32> -> vector<2x10xf32>
    %c0_60 = arith.constant 0 : index
    %c0_61 = arith.constant 0 : index
    %385 = vector.load %arg9[%c0_60, %c0_61] : memref<1x10xf32, #tpu.memory_space<vmem>>, vector<1x10xf32>
    %386 = vector.broadcast %385 : vector<1x10xf32> to vector<2x10xf32>
    %387 = arith.addf %384, %386 : vector<2x10xf32>
    %cst_62 = arith.constant dense<0xFF800000> : vector<2xf32>
    %388 = vector.multi_reduction <maximumf>, %387, %cst_62 [1] : vector<2x10xf32> to vector<2xf32>
    %389 = vector.shape_cast %388 : vector<2xf32> to vector<2x1xf32>
    %390 = vector.broadcast %389 : vector<2x1xf32> to vector<2x10xf32>
    %391 = arith.subf %387, %390 : vector<2x10xf32>
    %392 = math.exp %391 : vector<2x10xf32>
    %cst_63 = arith.constant dense<0.000000e+00> : vector<2xf32>
    %393 = vector.multi_reduction <add>, %392, %cst_63 [1] : vector<2x10xf32> to vector<2xf32>
    %394 = vector.shape_cast %393 : vector<2xf32> to vector<2x1xf32>
    %395 = tpu.reciprocal %394 {approx = true} : vector<2x1xf32> -> vector<2x1xf32>
    %396 = vector.broadcast %395 : vector<2x1xf32> to vector<2x10xf32>
    %397 = arith.mulf %392, %396 : vector<2x10xf32>
    %c0_64 = arith.constant 0 : index
    %c0_65 = arith.constant 0 : index
    %398 = vector.load %arg13[%c0_64, %c0_65] : memref<2x10xf32, #tpu.memory_space<vmem>>, vector<2x10xf32>
    tpu.vector_store %arg13[%c0_64, %c0_65], %397 {strides = array<i32>} : memref<2x10xf32, #tpu.memory_space<vmem>>, vector<2x10xf32>,
    %c0_66 = arith.constant 0 : index
    %c0_67 = arith.constant 0 : index
    %c0_68 = arith.constant 0 : index
    %399 = vector.load %arg5[%c0_66, %c0_67, %c0_68] : memref<2x32x128xf32, #tpu.memory_space<vmem>>, vector<2x32x128xf32>
    %c0_69 = arith.constant 0 : index
    %c0_70 = arith.constant 0 : index
    %c0_71 = arith.constant 0 : index
    %400 = vector.load %arg6[%c0_69, %c0_70, %c0_71] : memref<2x32x128xf32, #tpu.memory_space<vmem>>, vector<2x32x128xf32>
    %c0_72 = arith.constant 0 : index
    %c0_73 = arith.constant 0 : index
    %c0_74 = arith.constant 0 : index
    %401 = vector.load %arg7[%c0_72, %c0_73, %c0_74] : memref<2x1x128xf32, #tpu.memory_space<vmem>>, vector<2x1x128xf32>
    %cst_75 = arith.constant 0.000000e+00 : f32
    %402 = vector.broadcast %cst_75 : f32 to vector<2x32xf32>
    %cst_76 = arith.constant 0.000000e+00 : f32
    %403 = vector.broadcast %cst_76 : f32 to vector<2x32xf32>
    %cst_77 = arith.constant 0.000000e+00 : f32
    %404 = vector.broadcast %cst_77 : f32 to vector<2x32xf32>
    %cst_78 = arith.constant 0.000000e+00 : f32
    %405 = vector.broadcast %cst_78 : f32 to vector<2x32xf32>
    %406 = vector.extract_strided_slice %399 {offsets = [0, 0, 0], sizes = [1, 32, 128], strides = [1, 1, 1]} : vector<2x32x128xf32> to vector<1x32x128xf32>
    %407 = vector.shape_cast %406 : vector<1x32x128xf32> to vector<32x128xf32>
    %cst_79 = arith.constant dense<0.000000e+00> : vector<2x128xf32>
    %408 = tpu.matmul %382, %407, %cst_79 {dimension_numbers = #tpu.dot_dimension_numbers<[1], [0], [0], [1], [0, 0, 1, 1], [], []>} : vector<2x32xf32>, vector<32x128xf32>, vector<2x128xf32> -> vector<2x128xf32>
    %409 = vector.extract_strided_slice %401 {offsets = [0, 0, 0], sizes = [1, 1, 128], strides = [1, 1, 1]} : vector<2x1x128xf32> to vector<1x1x128xf32>
    %410 = vector.shape_cast %409 : vector<1x1x128xf32> to vector<1x128xf32>
    %411 = vector.broadcast %410 : vector<1x128xf32> to vector<2x128xf32>
    %412 = arith.addf %408, %411 : vector<2x128xf32>
    %413 = vector.extract_strided_slice %400 {offsets = [0, 0, 0], sizes = [1, 32, 128], strides = [1, 1, 1]} : vector<2x32x128xf32> to vector<1x32x128xf32>
    %414 = vector.shape_cast %413 : vector<1x32x128xf32> to vector<32x128xf32>
    %cst_80 = arith.constant dense<0.000000e+00> : vector<2x128xf32>
    %415 = tpu.matmul %402, %414, %cst_80 {dimension_numbers = #tpu.dot_dimension_numbers<[1], [0], [0], [1], [0, 0, 1, 1], [], []>} : vector<2x32xf32>, vector<32x128xf32>, vector<2x128xf32> -> vector<2x128xf32>
    %416 = arith.addf %412, %415 : vector<2x128xf32>
    %417 = arith.negf %416 : vector<2x128xf32>
    %418 = math.exp %417 : vector<2x128xf32>
    %cst_81 = arith.constant 1.000000e+00 : f32
    %419 = vector.broadcast %cst_81 : f32 to vector<2x128xf32>
    %420 = arith.addf %419, %418 : vector<2x128xf32>
    %421 = arith.divf %419, %420 : vector<2x128xf32>
    %422 = math.tanh %416 : vector<2x128xf32>
    %423 = vector.extract_strided_slice %421 {offsets = [0, 0], sizes = [2, 32], strides = [1, 1]} : vector<2x128xf32> to vector<2x32xf32>
    %424 = vector.extract_strided_slice %421 {offsets = [0, 32], sizes = [2, 32], strides = [1, 1]} : vector<2x128xf32> to vector<2x32xf32>
    %425 = vector.extract_strided_slice %422 {offsets = [0, 64], sizes = [2, 32], strides = [1, 1]} : vector<2x128xf32> to vector<2x32xf32>
    %426 = vector.extract_strided_slice %421 {offsets = [0, 96], sizes = [2, 32], strides = [1, 1]} : vector<2x128xf32> to vector<2x32xf32>
    %427 = arith.mulf %424, %404 : vector<2x32xf32>
    %428 = arith.mulf %423, %425 : vector<2x32xf32>
    %429 = arith.addf %427, %428 : vector<2x32xf32>
    %430 = math.tanh %429 : vector<2x32xf32>
    %431 = arith.mulf %426, %430 : vector<2x32xf32>
    %432 = vector.extract_strided_slice %399 {offsets = [1, 0, 0], sizes = [1, 32, 128], strides = [1, 1, 1]} : vector<2x32x128xf32> to vector<1x32x128xf32>
    %433 = vector.shape_cast %432 : vector<1x32x128xf32> to vector<32x128xf32>
    %cst_82 = arith.constant dense<0.000000e+00> : vector<2x128xf32>
    %434 = tpu.matmul %431, %433, %cst_82 {dimension_numbers = #tpu.dot_dimension_numbers<[1], [0], [0], [1], [0, 0, 1, 1], [], []>} : vector<2x32xf32>, vector<32x128xf32>, vector<2x128xf32> -> vector<2x128xf32>
    %435 = vector.extract_strided_slice %400 {offsets = [1, 0, 0], sizes = [1, 32, 128], strides = [1, 1, 1]} : vector<2x32x128xf32> to vector<1x32x128xf32>
    %436 = vector.shape_cast %435 : vector<1x32x128xf32> to vector<32x128xf32>
    %cst_83 = arith.constant dense<0.000000e+00> : vector<2x128xf32>
    %437 = tpu.matmul %403, %436, %cst_83 {dimension_numbers = #tpu.dot_dimension_numbers<[1], [0], [0], [1], [0, 0, 1, 1], [], []>} : vector<2x32xf32>, vector<32x128xf32>, vector<2x128xf32> -> vector<2x128xf32>
    %438 = arith.addf %434, %437 : vector<2x128xf32>
    %439 = vector.extract_strided_slice %401 {offsets = [1, 0, 0], sizes = [1, 1, 128], strides = [1, 1, 1]} : vector<2x1x128xf32> to vector<1x1x128xf32>
    %440 = vector.shape_cast %439 : vector<1x1x128xf32> to vector<1x128xf32>
    %441 = vector.broadcast %440 : vector<1x128xf32> to vector<2x128xf32>
    %442 = arith.addf %438, %441 : vector<2x128xf32>
    %443 = arith.negf %442 : vector<2x128xf32>
    %444 = math.exp %443 : vector<2x128xf32>
    %cst_84 = arith.constant 1.000000e+00 : f32
    %445 = vector.broadcast %cst_84 : f32 to vector<2x128xf32>
    %446 = arith.addf %445, %444 : vector<2x128xf32>
    %447 = arith.divf %445, %446 : vector<2x128xf32>
    %448 = math.tanh %442 : vector<2x128xf32>
    %449 = vector.extract_strided_slice %447 {offsets = [0, 0], sizes = [2, 32], strides = [1, 1]} : vector<2x128xf32> to vector<2x32xf32>
    %450 = vector.extract_strided_slice %447 {offsets = [0, 32], sizes = [2, 32], strides = [1, 1]} : vector<2x128xf32> to vector<2x32xf32>
    %451 = vector.extract_strided_slice %448 {offsets = [0, 64], sizes = [2, 32], strides = [1, 1]} : vector<2x128xf32> to vector<2x32xf32>
    %452 = vector.extract_strided_slice %447 {offsets = [0, 96], sizes = [2, 32], strides = [1, 1]} : vector<2x128xf32> to vector<2x32xf32>
    %453 = arith.mulf %450, %405 : vector<2x32xf32>
    %454 = arith.mulf %449, %451 : vector<2x32xf32>
    %455 = arith.addf %453, %454 : vector<2x32xf32>
    %456 = math.tanh %455 : vector<2x32xf32>
    %457 = arith.mulf %452, %456 : vector<2x32xf32>
    %458 = vector.extract_strided_slice %400 {offsets = [0, 0, 0], sizes = [1, 32, 128], strides = [1, 1, 1]} : vector<2x32x128xf32> to vector<1x32x128xf32>
    %459 = vector.shape_cast %458 : vector<1x32x128xf32> to vector<32x128xf32>
    %cst_85 = arith.constant dense<0.000000e+00> : vector<2x128xf32>
    %460 = tpu.matmul %431, %459, %cst_85 {dimension_numbers = #tpu.dot_dimension_numbers<[1], [0], [0], [1], [0, 0, 1, 1], [], []>} : vector<2x32xf32>, vector<32x128xf32>, vector<2x128xf32> -> vector<2x128xf32>
    %461 = arith.addf %412, %460 : vector<2x128xf32>
    %462 = arith.negf %461 : vector<2x128xf32>
    %463 = math.exp %462 : vector<2x128xf32>
    %cst_86 = arith.constant 1.000000e+00 : f32
    %464 = vector.broadcast %cst_86 : f32 to vector<2x128xf32>
    %465 = arith.addf %464, %463 : vector<2x128xf32>
    %466 = arith.divf %464, %465 : vector<2x128xf32>
    %467 = math.tanh %461 : vector<2x128xf32>
    %468 = vector.extract_strided_slice %466 {offsets = [0, 0], sizes = [2, 32], strides = [1, 1]} : vector<2x128xf32> to vector<2x32xf32>
    %469 = vector.extract_strided_slice %466 {offsets = [0, 32], sizes = [2, 32], strides = [1, 1]} : vector<2x128xf32> to vector<2x32xf32>
    %470 = vector.extract_strided_slice %467 {offsets = [0, 64], sizes = [2, 32], strides = [1, 1]} : vector<2x128xf32> to vector<2x32xf32>
    %471 = vector.extract_strided_slice %466 {offsets = [0, 96], sizes = [2, 32], strides = [1, 1]} : vector<2x128xf32> to vector<2x32xf32>
    %472 = arith.mulf %469, %429 : vector<2x32xf32>
    %473 = arith.mulf %468, %470 : vector<2x32xf32>
    %474 = arith.addf %472, %473 : vector<2x32xf32>
    %475 = math.tanh %474 : vector<2x32xf32>
    %476 = arith.mulf %471, %475 : vector<2x32xf32>
    %477 = vector.extract_strided_slice %399 {offsets = [1, 0, 0], sizes = [1, 32, 128], strides = [1, 1, 1]} : vector<2x32x128xf32> to vector<1x32x128xf32>
    %478 = vector.shape_cast %477 : vector<1x32x128xf32> to vector<32x128xf32>
    %cst_87 = arith.constant dense<0.000000e+00> : vector<2x128xf32>
    %479 = tpu.matmul %476, %478, %cst_87 {dimension_numbers = #tpu.dot_dimension_numbers<[1], [0], [0], [1], [0, 0, 1, 1], [], []>} : vector<2x32xf32>, vector<32x128xf32>, vector<2x128xf32> -> vector<2x128xf32>
    %480 = vector.extract_strided_slice %400 {offsets = [1, 0, 0], sizes = [1, 32, 128], strides = [1, 1, 1]} : vector<2x32x128xf32> to vector<1x32x128xf32>
    %481 = vector.shape_cast %480 : vector<1x32x128xf32> to vector<32x128xf32>
    %cst_88 = arith.constant dense<0.000000e+00> : vector<2x128xf32>
    %482 = tpu.matmul %457, %481, %cst_88 {dimension_numbers = #tpu.dot_dimension_numbers<[1], [0], [0], [1], [0, 0, 1, 1], [], []>} : vector<2x32xf32>, vector<32x128xf32>, vector<2x128xf32> -> vector<2x128xf32>
    %483 = arith.addf %479, %482 : vector<2x128xf32>
    %484 = vector.extract_strided_slice %401 {offsets = [1, 0, 0], sizes = [1, 1, 128], strides = [1, 1, 1]} : vector<2x1x128xf32> to vector<1x1x128xf32>
    %485 = vector.shape_cast %484 : vector<1x1x128xf32> to vector<1x128xf32>
    %486 = vector.broadcast %485 : vector<1x128xf32> to vector<2x128xf32>
    %487 = arith.addf %483, %486 : vector<2x128xf32>
    %488 = arith.negf %487 : vector<2x128xf32>
    %489 = math.exp %488 : vector<2x128xf32>
    %cst_89 = arith.constant 1.000000e+00 : f32
    %490 = vector.broadcast %cst_89 : f32 to vector<2x128xf32>
    %491 = arith.addf %490, %489 : vector<2x128xf32>
    %492 = arith.divf %490, %491 : vector<2x128xf32>
    %493 = math.tanh %487 : vector<2x128xf32>
    %494 = vector.extract_strided_slice %492 {offsets = [0, 0], sizes = [2, 32], strides = [1, 1]} : vector<2x128xf32> to vector<2x32xf32>
    %495 = vector.extract_strided_slice %492 {offsets = [0, 32], sizes = [2, 32], strides = [1, 1]} : vector<2x128xf32> to vector<2x32xf32>
    %496 = vector.extract_strided_slice %493 {offsets = [0, 64], sizes = [2, 32], strides = [1, 1]} : vector<2x128xf32> to vector<2x32xf32>
    %497 = vector.extract_strided_slice %492 {offsets = [0, 96], sizes = [2, 32], strides = [1, 1]} : vector<2x128xf32> to vector<2x32xf32>
    %498 = arith.mulf %495, %455 : vector<2x32xf32>
    %499 = arith.mulf %494, %496 : vector<2x32xf32>
    %500 = arith.addf %498, %499 : vector<2x32xf32>
    %501 = math.tanh %500 : vector<2x32xf32>
    %502 = arith.mulf %497, %501 : vector<2x32xf32>
    %503 = vector.extract_strided_slice %400 {offsets = [0, 0, 0], sizes = [1, 32, 128], strides = [1, 1, 1]} : vector<2x32x128xf32> to vector<1x32x128xf32>
    %504 = vector.shape_cast %503 : vector<1x32x128xf32> to vector<32x128xf32>
    %cst_90 = arith.constant dense<0.000000e+00> : vector<2x128xf32>
    %505 = tpu.matmul %476, %504, %cst_90 {dimension_numbers = #tpu.dot_dimension_numbers<[1], [0], [0], [1], [0, 0, 1, 1], [], []>} : vector<2x32xf32>, vector<32x128xf32>, vector<2x128xf32> -> vector<2x128xf32>
    %506 = arith.addf %412, %505 : vector<2x128xf32>
    %507 = arith.negf %506 : vector<2x128xf32>
    %508 = math.exp %507 : vector<2x128xf32>
    %cst_91 = arith.constant 1.000000e+00 : f32
    %509 = vector.broadcast %cst_91 : f32 to vector<2x128xf32>
    %510 = arith.addf %509, %508 : vector<2x128xf32>
    %511 = arith.divf %509, %510 : vector<2x128xf32>
    %512 = math.tanh %506 : vector<2x128xf32>
    %513 = vector.extract_strided_slice %511 {offsets = [0, 0], sizes = [2, 32], strides = [1, 1]} : vector<2x128xf32> to vector<2x32xf32>
    %514 = vector.extract_strided_slice %511 {offsets = [0, 32], sizes = [2, 32], strides = [1, 1]} : vector<2x128xf32> to vector<2x32xf32>
    %515 = vector.extract_strided_slice %512 {offsets = [0, 64], sizes = [2, 32], strides = [1, 1]} : vector<2x128xf32> to vector<2x32xf32>
    %516 = vector.extract_strided_slice %511 {offsets = [0, 96], sizes = [2, 32], strides = [1, 1]} : vector<2x128xf32> to vector<2x32xf32>
    %517 = arith.mulf %514, %474 : vector<2x32xf32>
    %518 = arith.mulf %513, %515 : vector<2x32xf32>
    %519 = arith.addf %517, %518 : vector<2x32xf32>
    %520 = math.tanh %519 : vector<2x32xf32>
    %521 = arith.mulf %516, %520 : vector<2x32xf32>
    %522 = vector.extract_strided_slice %399 {offsets = [1, 0, 0], sizes = [1, 32, 128], strides = [1, 1, 1]} : vector<2x32x128xf32> to vector<1x32x128xf32>
    %523 = vector.shape_cast %522 : vector<1x32x128xf32> to vector<32x128xf32>
    %cst_92 = arith.constant dense<0.000000e+00> : vector<2x128xf32>
    %524 = tpu.matmul %521, %523, %cst_92 {dimension_numbers = #tpu.dot_dimension_numbers<[1], [0], [0], [1], [0, 0, 1, 1], [], []>} : vector<2x32xf32>, vector<32x128xf32>, vector<2x128xf32> -> vector<2x128xf32>
    %525 = vector.extract_strided_slice %400 {offsets = [1, 0, 0], sizes = [1, 32, 128], strides = [1, 1, 1]} : vector<2x32x128xf32> to vector<1x32x128xf32>
    %526 = vector.shape_cast %525 : vector<1x32x128xf32> to vector<32x128xf32>
    %cst_93 = arith.constant dense<0.000000e+00> : vector<2x128xf32>
    %527 = tpu.matmul %502, %526, %cst_93 {dimension_numbers = #tpu.dot_dimension_numbers<[1], [0], [0], [1], [0, 0, 1, 1], [], []>} : vector<2x32xf32>, vector<32x128xf32>, vector<2x128xf32> -> vector<2x128xf32>
    %528 = arith.addf %524, %527 : vector<2x128xf32>
    %529 = vector.extract_strided_slice %401 {offsets = [1, 0, 0], sizes = [1, 1, 128], strides = [1, 1, 1]} : vector<2x1x128xf32> to vector<1x1x128xf32>
    %530 = vector.shape_cast %529 : vector<1x1x128xf32> to vector<1x128xf32>
    %531 = vector.broadcast %530 : vector<1x128xf32> to vector<2x128xf32>
    %532 = arith.addf %528, %531 : vector<2x128xf32>
    %533 = arith.negf %532 : vector<2x128xf32>
    %534 = math.exp %533 : vector<2x128xf32>
    %cst_94 = arith.constant 1.000000e+00 : f32
    %535 = vector.broadcast %cst_94 : f32 to vector<2x128xf32>
    %536 = arith.addf %535, %534 : vector<2x128xf32>
    %537 = arith.divf %535, %536 : vector<2x128xf32>
    %538 = math.tanh %532 : vector<2x128xf32>
    %539 = vector.extract_strided_slice %537 {offsets = [0, 0], sizes = [2, 32], strides = [1, 1]} : vector<2x128xf32> to vector<2x32xf32>
    %540 = vector.extract_strided_slice %537 {offsets = [0, 32], sizes = [2, 32], strides = [1, 1]} : vector<2x128xf32> to vector<2x32xf32>
    %541 = vector.extract_strided_slice %538 {offsets = [0, 64], sizes = [2, 32], strides = [1, 1]} : vector<2x128xf32> to vector<2x32xf32>
    %542 = vector.extract_strided_slice %537 {offsets = [0, 96], sizes = [2, 32], strides = [1, 1]} : vector<2x128xf32> to vector<2x32xf32>
    %543 = arith.mulf %540, %500 : vector<2x32xf32>
    %544 = arith.mulf %539, %541 : vector<2x32xf32>
    %545 = arith.addf %543, %544 : vector<2x32xf32>
    %546 = math.tanh %545 : vector<2x32xf32>
    %547 = arith.mulf %542, %546 : vector<2x32xf32>
    %548 = vector.extract_strided_slice %400 {offsets = [0, 0, 0], sizes = [1, 32, 128], strides = [1, 1, 1]} : vector<2x32x128xf32> to vector<1x32x128xf32>
    %549 = vector.shape_cast %548 : vector<1x32x128xf32> to vector<32x128xf32>
    %cst_95 = arith.constant dense<0.000000e+00> : vector<2x128xf32>
    %550 = tpu.matmul %521, %549, %cst_95 {dimension_numbers = #tpu.dot_dimension_numbers<[1], [0], [0], [1], [0, 0, 1, 1], [], []>} : vector<2x32xf32>, vector<32x128xf32>, vector<2x128xf32> -> vector<2x128xf32>
    %551 = arith.addf %412, %550 : vector<2x128xf32>
    %552 = arith.negf %551 : vector<2x128xf32>
    %553 = math.exp %552 : vector<2x128xf32>
    %cst_96 = arith.constant 1.000000e+00 : f32
    %554 = vector.broadcast %cst_96 : f32 to vector<2x128xf32>
    %555 = arith.addf %554, %553 : vector<2x128xf32>
    %556 = arith.divf %554, %555 : vector<2x128xf32>
    %557 = math.tanh %551 : vector<2x128xf32>
    %558 = vector.extract_strided_slice %556 {offsets = [0, 0], sizes = [2, 32], strides = [1, 1]} : vector<2x128xf32> to vector<2x32xf32>
    %559 = vector.extract_strided_slice %556 {offsets = [0, 32], sizes = [2, 32], strides = [1, 1]} : vector<2x128xf32> to vector<2x32xf32>
    %560 = vector.extract_strided_slice %557 {offsets = [0, 64], sizes = [2, 32], strides = [1, 1]} : vector<2x128xf32> to vector<2x32xf32>
    %561 = vector.extract_strided_slice %556 {offsets = [0, 96], sizes = [2, 32], strides = [1, 1]} : vector<2x128xf32> to vector<2x32xf32>
    %562 = arith.mulf %559, %519 : vector<2x32xf32>
    %563 = arith.mulf %558, %560 : vector<2x32xf32>
    %564 = arith.addf %562, %563 : vector<2x32xf32>
    %565 = math.tanh %564 : vector<2x32xf32>
    %566 = arith.mulf %561, %565 : vector<2x32xf32>
    %567 = vector.extract_strided_slice %399 {offsets = [1, 0, 0], sizes = [1, 32, 128], strides = [1, 1, 1]} : vector<2x32x128xf32> to vector<1x32x128xf32>
    %568 = vector.shape_cast %567 : vector<1x32x128xf32> to vector<32x128xf32>
    %cst_97 = arith.constant dense<0.000000e+00> : vector<2x128xf32>
    %569 = tpu.matmul %566, %568, %cst_97 {dimension_numbers = #tpu.dot_dimension_numbers<[1], [0], [0], [1], [0, 0, 1, 1], [], []>} : vector<2x32xf32>, vector<32x128xf32>, vector<2x128xf32> -> vector<2x128xf32>
    %570 = vector.extract_strided_slice %400 {offsets = [1, 0, 0], sizes = [1, 32, 128], strides = [1, 1, 1]} : vector<2x32x128xf32> to vector<1x32x128xf32>
    %571 = vector.shape_cast %570 : vector<1x32x128xf32> to vector<32x128xf32>
    %cst_98 = arith.constant dense<0.000000e+00> : vector<2x128xf32>
    %572 = tpu.matmul %547, %571, %cst_98 {dimension_numbers = #tpu.dot_dimension_numbers<[1], [0], [0], [1], [0, 0, 1, 1], [], []>} : vector<2x32xf32>, vector<32x128xf32>, vector<2x128xf32> -> vector<2x128xf32>
    %573 = arith.addf %569, %572 : vector<2x128xf32>
    %574 = vector.extract_strided_slice %401 {offsets = [1, 0, 0], sizes = [1, 1, 128], strides = [1, 1, 1]} : vector<2x1x128xf32> to vector<1x1x128xf32>
    %575 = vector.shape_cast %574 : vector<1x1x128xf32> to vector<1x128xf32>
    %576 = vector.broadcast %575 : vector<1x128xf32> to vector<2x128xf32>
    %577 = arith.addf %573, %576 : vector<2x128xf32>
    %578 = arith.negf %577 : vector<2x128xf32>
    %579 = math.exp %578 : vector<2x128xf32>
    %cst_99 = arith.constant 1.000000e+00 : f32
    %580 = vector.broadcast %cst_99 : f32 to vector<2x128xf32>
    %581 = arith.addf %580, %579 : vector<2x128xf32>
    %582 = arith.divf %580, %581 : vector<2x128xf32>
    %583 = math.tanh %577 : vector<2x128xf32>
    %584 = vector.extract_strided_slice %582 {offsets = [0, 0], sizes = [2, 32], strides = [1, 1]} : vector<2x128xf32> to vector<2x32xf32>
    %585 = vector.extract_strided_slice %582 {offsets = [0, 32], sizes = [2, 32], strides = [1, 1]} : vector<2x128xf32> to vector<2x32xf32>
    %586 = vector.extract_strided_slice %583 {offsets = [0, 64], sizes = [2, 32], strides = [1, 1]} : vector<2x128xf32> to vector<2x32xf32>
    %587 = vector.extract_strided_slice %582 {offsets = [0, 96], sizes = [2, 32], strides = [1, 1]} : vector<2x128xf32> to vector<2x32xf32>
    %588 = arith.mulf %585, %545 : vector<2x32xf32>
    %589 = arith.mulf %584, %586 : vector<2x32xf32>
    %590 = arith.addf %588, %589 : vector<2x32xf32>
    %591 = math.tanh %590 : vector<2x32xf32>
    %592 = arith.mulf %587, %591 : vector<2x32xf32>
    %593 = vector.extract_strided_slice %400 {offsets = [0, 0, 0], sizes = [1, 32, 128], strides = [1, 1, 1]} : vector<2x32x128xf32> to vector<1x32x128xf32>
    %594 = vector.shape_cast %593 : vector<1x32x128xf32> to vector<32x128xf32>
    %cst_100 = arith.constant dense<0.000000e+00> : vector<2x128xf32>
    %595 = tpu.matmul %566, %594, %cst_100 {dimension_numbers = #tpu.dot_dimension_numbers<[1], [0], [0], [1], [0, 0, 1, 1], [], []>} : vector<2x32xf32>, vector<32x128xf32>, vector<2x128xf32> -> vector<2x128xf32>
    %596 = arith.addf %412, %595 : vector<2x128xf32>
    %597 = arith.negf %596 : vector<2x128xf32>
    %598 = math.exp %597 : vector<2x128xf32>
    %cst_101 = arith.constant 1.000000e+00 : f32
    %599 = vector.broadcast %cst_101 : f32 to vector<2x128xf32>
    %600 = arith.addf %599, %598 : vector<2x128xf32>
    %601 = arith.divf %599, %600 : vector<2x128xf32>
    %602 = math.tanh %596 : vector<2x128xf32>
    %603 = vector.extract_strided_slice %601 {offsets = [0, 0], sizes = [2, 32], strides = [1, 1]} : vector<2x128xf32> to vector<2x32xf32>
    %604 = vector.extract_strided_slice %601 {offsets = [0, 32], sizes = [2, 32], strides = [1, 1]} : vector<2x128xf32> to vector<2x32xf32>
    %605 = vector.extract_strided_slice %602 {offsets = [0, 64], sizes = [2, 32], strides = [1, 1]} : vector<2x128xf32> to vector<2x32xf32>
    %606 = vector.extract_strided_slice %601 {offsets = [0, 96], sizes = [2, 32], strides = [1, 1]} : vector<2x128xf32> to vector<2x32xf32>
    %607 = arith.mulf %604, %564 : vector<2x32xf32>
    %608 = arith.mulf %603, %605 : vector<2x32xf32>
    %609 = arith.addf %607, %608 : vector<2x32xf32>
    %610 = math.tanh %609 : vector<2x32xf32>
    %611 = arith.mulf %606, %610 : vector<2x32xf32>
    %612 = vector.extract_strided_slice %399 {offsets = [1, 0, 0], sizes = [1, 32, 128], strides = [1, 1, 1]} : vector<2x32x128xf32> to vector<1x32x128xf32>
    %613 = vector.shape_cast %612 : vector<1x32x128xf32> to vector<32x128xf32>
    %cst_102 = arith.constant dense<0.000000e+00> : vector<2x128xf32>
    %614 = tpu.matmul %611, %613, %cst_102 {dimension_numbers = #tpu.dot_dimension_numbers<[1], [0], [0], [1], [0, 0, 1, 1], [], []>} : vector<2x32xf32>, vector<32x128xf32>, vector<2x128xf32> -> vector<2x128xf32>
    %615 = vector.extract_strided_slice %400 {offsets = [1, 0, 0], sizes = [1, 32, 128], strides = [1, 1, 1]} : vector<2x32x128xf32> to vector<1x32x128xf32>
    %616 = vector.shape_cast %615 : vector<1x32x128xf32> to vector<32x128xf32>
    %cst_103 = arith.constant dense<0.000000e+00> : vector<2x128xf32>
    %617 = tpu.matmul %592, %616, %cst_103 {dimension_numbers = #tpu.dot_dimension_numbers<[1], [0], [0], [1], [0, 0, 1, 1], [], []>} : vector<2x32xf32>, vector<32x128xf32>, vector<2x128xf32> -> vector<2x128xf32>
    %618 = arith.addf %614, %617 : vector<2x128xf32>
    %619 = vector.extract_strided_slice %401 {offsets = [1, 0, 0], sizes = [1, 1, 128], strides = [1, 1, 1]} : vector<2x1x128xf32> to vector<1x1x128xf32>
    %620 = vector.shape_cast %619 : vector<1x1x128xf32> to vector<1x128xf32>
    %621 = vector.broadcast %620 : vector<1x128xf32> to vector<2x128xf32>
    %622 = arith.addf %618, %621 : vector<2x128xf32>
    %623 = arith.negf %622 : vector<2x128xf32>
    %624 = math.exp %623 : vector<2x128xf32>
    %cst_104 = arith.constant 1.000000e+00 : f32
    %625 = vector.broadcast %cst_104 : f32 to vector<2x128xf32>
    %626 = arith.addf %625, %624 : vector<2x128xf32>
    %627 = arith.divf %625, %626 : vector<2x128xf32>
    %628 = math.tanh %622 : vector<2x128xf32>
    %629 = vector.extract_strided_slice %627 {offsets = [0, 0], sizes = [2, 32], strides = [1, 1]} : vector<2x128xf32> to vector<2x32xf32>
    %630 = vector.extract_strided_slice %627 {offsets = [0, 32], sizes = [2, 32], strides = [1, 1]} : vector<2x128xf32> to vector<2x32xf32>
    %631 = vector.extract_strided_slice %628 {offsets = [0, 64], sizes = [2, 32], strides = [1, 1]} : vector<2x128xf32> to vector<2x32xf32>
    %632 = vector.extract_strided_slice %627 {offsets = [0, 96], sizes = [2, 32], strides = [1, 1]} : vector<2x128xf32> to vector<2x32xf32>
    %633 = arith.mulf %630, %590 : vector<2x32xf32>
    %634 = arith.mulf %629, %631 : vector<2x32xf32>
    %635 = arith.addf %633, %634 : vector<2x32xf32>
    %636 = math.tanh %635 : vector<2x32xf32>
    %637 = arith.mulf %632, %636 : vector<2x32xf32>
    %638 = vector.extract_strided_slice %400 {offsets = [0, 0, 0], sizes = [1, 32, 128], strides = [1, 1, 1]} : vector<2x32x128xf32> to vector<1x32x128xf32>
    %639 = vector.shape_cast %638 : vector<1x32x128xf32> to vector<32x128xf32>
    %cst_105 = arith.constant dense<0.000000e+00> : vector<2x128xf32>
    %640 = tpu.matmul %611, %639, %cst_105 {dimension_numbers = #tpu.dot_dimension_numbers<[1], [0], [0], [1], [0, 0, 1, 1], [], []>} : vector<2x32xf32>, vector<32x128xf32>, vector<2x128xf32> -> vector<2x128xf32>
    %641 = arith.addf %412, %640 : vector<2x128xf32>
    %642 = arith.negf %641 : vector<2x128xf32>
    %643 = math.exp %642 : vector<2x128xf32>
    %cst_106 = arith.constant 1.000000e+00 : f32
    %644 = vector.broadcast %cst_106 : f32 to vector<2x128xf32>
    %645 = arith.addf %644, %643 : vector<2x128xf32>
    %646 = arith.divf %644, %645 : vector<2x128xf32>
    %647 = math.tanh %641 : vector<2x128xf32>
    %648 = vector.extract_strided_slice %646 {offsets = [0, 0], sizes = [2, 32], strides = [1, 1]} : vector<2x128xf32> to vector<2x32xf32>
    %649 = vector.extract_strided_slice %646 {offsets = [0, 32], sizes = [2, 32], strides = [1, 1]} : vector<2x128xf32> to vector<2x32xf32>
    %650 = vector.extract_strided_slice %647 {offsets = [0, 64], sizes = [2, 32], strides = [1, 1]} : vector<2x128xf32> to vector<2x32xf32>
    %651 = vector.extract_strided_slice %646 {offsets = [0, 96], sizes = [2, 32], strides = [1, 1]} : vector<2x128xf32> to vector<2x32xf32>
    %652 = arith.mulf %649, %609 : vector<2x32xf32>
    %653 = arith.mulf %648, %650 : vector<2x32xf32>
    %654 = arith.addf %652, %653 : vector<2x32xf32>
    %655 = math.tanh %654 : vector<2x32xf32>
    %656 = arith.mulf %651, %655 : vector<2x32xf32>
    %657 = vector.extract_strided_slice %399 {offsets = [1, 0, 0], sizes = [1, 32, 128], strides = [1, 1, 1]} : vector<2x32x128xf32> to vector<1x32x128xf32>
    %658 = vector.shape_cast %657 : vector<1x32x128xf32> to vector<32x128xf32>
    %cst_107 = arith.constant dense<0.000000e+00> : vector<2x128xf32>
    %659 = tpu.matmul %656, %658, %cst_107 {dimension_numbers = #tpu.dot_dimension_numbers<[1], [0], [0], [1], [0, 0, 1, 1], [], []>} : vector<2x32xf32>, vector<32x128xf32>, vector<2x128xf32> -> vector<2x128xf32>
    %660 = vector.extract_strided_slice %400 {offsets = [1, 0, 0], sizes = [1, 32, 128], strides = [1, 1, 1]} : vector<2x32x128xf32> to vector<1x32x128xf32>
    %661 = vector.shape_cast %660 : vector<1x32x128xf32> to vector<32x128xf32>
    %cst_108 = arith.constant dense<0.000000e+00> : vector<2x128xf32>
    %662 = tpu.matmul %637, %661, %cst_108 {dimension_numbers = #tpu.dot_dimension_numbers<[1], [0], [0], [1], [0, 0, 1, 1], [], []>} : vector<2x32xf32>, vector<32x128xf32>, vector<2x128xf32> -> vector<2x128xf32>
    %663 = arith.addf %659, %662 : vector<2x128xf32>
    %664 = vector.extract_strided_slice %401 {offsets = [1, 0, 0], sizes = [1, 1, 128], strides = [1, 1, 1]} : vector<2x1x128xf32> to vector<1x1x128xf32>
    %665 = vector.shape_cast %664 : vector<1x1x128xf32> to vector<1x128xf32>
    %666 = vector.broadcast %665 : vector<1x128xf32> to vector<2x128xf32>
    %667 = arith.addf %663, %666 : vector<2x128xf32>
    %668 = arith.negf %667 : vector<2x128xf32>
    %669 = math.exp %668 : vector<2x128xf32>
    %cst_109 = arith.constant 1.000000e+00 : f32
    %670 = vector.broadcast %cst_109 : f32 to vector<2x128xf32>
    %671 = arith.addf %670, %669 : vector<2x128xf32>
    %672 = arith.divf %670, %671 : vector<2x128xf32>
    %673 = math.tanh %667 : vector<2x128xf32>
    %674 = vector.extract_strided_slice %672 {offsets = [0, 0], sizes = [2, 32], strides = [1, 1]} : vector<2x128xf32> to vector<2x32xf32>
    %675 = vector.extract_strided_slice %672 {offsets = [0, 32], sizes = [2, 32], strides = [1, 1]} : vector<2x128xf32> to vector<2x32xf32>
    %676 = vector.extract_strided_slice %673 {offsets = [0, 64], sizes = [2, 32], strides = [1, 1]} : vector<2x128xf32> to vector<2x32xf32>
    %677 = vector.extract_strided_slice %672 {offsets = [0, 96], sizes = [2, 32], strides = [1, 1]} : vector<2x128xf32> to vector<2x32xf32>
    %678 = arith.mulf %675, %635 : vector<2x32xf32>
    %679 = arith.mulf %674, %676 : vector<2x32xf32>
    %680 = arith.addf %678, %679 : vector<2x32xf32>
    %681 = math.tanh %680 : vector<2x32xf32>
    %682 = arith.mulf %677, %681 : vector<2x32xf32>
    %683 = vector.extract_strided_slice %400 {offsets = [0, 0, 0], sizes = [1, 32, 128], strides = [1, 1, 1]} : vector<2x32x128xf32> to vector<1x32x128xf32>
    %684 = vector.shape_cast %683 : vector<1x32x128xf32> to vector<32x128xf32>
    %cst_110 = arith.constant dense<0.000000e+00> : vector<2x128xf32>
    %685 = tpu.matmul %656, %684, %cst_110 {dimension_numbers = #tpu.dot_dimension_numbers<[1], [0], [0], [1], [0, 0, 1, 1], [], []>} : vector<2x32xf32>, vector<32x128xf32>, vector<2x128xf32> -> vector<2x128xf32>
    %686 = arith.addf %412, %685 : vector<2x128xf32>
    %687 = arith.negf %686 : vector<2x128xf32>
    %688 = math.exp %687 : vector<2x128xf32>
    %cst_111 = arith.constant 1.000000e+00 : f32
    %689 = vector.broadcast %cst_111 : f32 to vector<2x128xf32>
    %690 = arith.addf %689, %688 : vector<2x128xf32>
    %691 = arith.divf %689, %690 : vector<2x128xf32>
    %692 = math.tanh %686 : vector<2x128xf32>
    %693 = vector.extract_strided_slice %691 {offsets = [0, 0], sizes = [2, 32], strides = [1, 1]} : vector<2x128xf32> to vector<2x32xf32>
    %694 = vector.extract_strided_slice %691 {offsets = [0, 32], sizes = [2, 32], strides = [1, 1]} : vector<2x128xf32> to vector<2x32xf32>
    %695 = vector.extract_strided_slice %692 {offsets = [0, 64], sizes = [2, 32], strides = [1, 1]} : vector<2x128xf32> to vector<2x32xf32>
    %696 = vector.extract_strided_slice %691 {offsets = [0, 96], sizes = [2, 32], strides = [1, 1]} : vector<2x128xf32> to vector<2x32xf32>
    %697 = arith.mulf %694, %654 : vector<2x32xf32>
    %698 = arith.mulf %693, %695 : vector<2x32xf32>
    %699 = arith.addf %697, %698 : vector<2x32xf32>
    %700 = math.tanh %699 : vector<2x32xf32>
    %701 = arith.mulf %696, %700 : vector<2x32xf32>
    %702 = vector.extract_strided_slice %399 {offsets = [1, 0, 0], sizes = [1, 32, 128], strides = [1, 1, 1]} : vector<2x32x128xf32> to vector<1x32x128xf32>
    %703 = vector.shape_cast %702 : vector<1x32x128xf32> to vector<32x128xf32>
    %cst_112 = arith.constant dense<0.000000e+00> : vector<2x128xf32>
    %704 = tpu.matmul %701, %703, %cst_112 {dimension_numbers = #tpu.dot_dimension_numbers<[1], [0], [0], [1], [0, 0, 1, 1], [], []>} : vector<2x32xf32>, vector<32x128xf32>, vector<2x128xf32> -> vector<2x128xf32>
    %705 = vector.extract_strided_slice %400 {offsets = [1, 0, 0], sizes = [1, 32, 128], strides = [1, 1, 1]} : vector<2x32x128xf32> to vector<1x32x128xf32>
    %706 = vector.shape_cast %705 : vector<1x32x128xf32> to vector<32x128xf32>
    %cst_113 = arith.constant dense<0.000000e+00> : vector<2x128xf32>
    %707 = tpu.matmul %682, %706, %cst_113 {dimension_numbers = #tpu.dot_dimension_numbers<[1], [0], [0], [1], [0, 0, 1, 1], [], []>} : vector<2x32xf32>, vector<32x128xf32>, vector<2x128xf32> -> vector<2x128xf32>
    %708 = arith.addf %704, %707 : vector<2x128xf32>
    %709 = vector.extract_strided_slice %401 {offsets = [1, 0, 0], sizes = [1, 1, 128], strides = [1, 1, 1]} : vector<2x1x128xf32> to vector<1x1x128xf32>
    %710 = vector.shape_cast %709 : vector<1x1x128xf32> to vector<1x128xf32>
    %711 = vector.broadcast %710 : vector<1x128xf32> to vector<2x128xf32>
    %712 = arith.addf %708, %711 : vector<2x128xf32>
    %713 = arith.negf %712 : vector<2x128xf32>
    %714 = math.exp %713 : vector<2x128xf32>
    %cst_114 = arith.constant 1.000000e+00 : f32
    %715 = vector.broadcast %cst_114 : f32 to vector<2x128xf32>
    %716 = arith.addf %715, %714 : vector<2x128xf32>
    %717 = arith.divf %715, %716 : vector<2x128xf32>
    %718 = math.tanh %712 : vector<2x128xf32>
    %719 = vector.extract_strided_slice %717 {offsets = [0, 0], sizes = [2, 32], strides = [1, 1]} : vector<2x128xf32> to vector<2x32xf32>
    %720 = vector.extract_strided_slice %717 {offsets = [0, 32], sizes = [2, 32], strides = [1, 1]} : vector<2x128xf32> to vector<2x32xf32>
    %721 = vector.extract_strided_slice %718 {offsets = [0, 64], sizes = [2, 32], strides = [1, 1]} : vector<2x128xf32> to vector<2x32xf32>
    %722 = vector.extract_strided_slice %717 {offsets = [0, 96], sizes = [2, 32], strides = [1, 1]} : vector<2x128xf32> to vector<2x32xf32>
    %723 = arith.mulf %720, %680 : vector<2x32xf32>
    %724 = arith.mulf %719, %721 : vector<2x32xf32>
    %725 = arith.addf %723, %724 : vector<2x32xf32>
    %726 = math.tanh %725 : vector<2x32xf32>
    %727 = arith.mulf %722, %726 : vector<2x32xf32>
    %728 = vector.extract_strided_slice %400 {offsets = [0, 0, 0], sizes = [1, 32, 128], strides = [1, 1, 1]} : vector<2x32x128xf32> to vector<1x32x128xf32>
    %729 = vector.shape_cast %728 : vector<1x32x128xf32> to vector<32x128xf32>
    %cst_115 = arith.constant dense<0.000000e+00> : vector<2x128xf32>
    %730 = tpu.matmul %701, %729, %cst_115 {dimension_numbers = #tpu.dot_dimension_numbers<[1], [0], [0], [1], [0, 0, 1, 1], [], []>} : vector<2x32xf32>, vector<32x128xf32>, vector<2x128xf32> -> vector<2x128xf32>
    %731 = arith.addf %412, %730 : vector<2x128xf32>
    %732 = arith.negf %731 : vector<2x128xf32>
    %733 = math.exp %732 : vector<2x128xf32>
    %cst_116 = arith.constant 1.000000e+00 : f32
    %734 = vector.broadcast %cst_116 : f32 to vector<2x128xf32>
    %735 = arith.addf %734, %733 : vector<2x128xf32>
    %736 = arith.divf %734, %735 : vector<2x128xf32>
    %737 = math.tanh %731 : vector<2x128xf32>
    %738 = vector.extract_strided_slice %736 {offsets = [0, 0], sizes = [2, 32], strides = [1, 1]} : vector<2x128xf32> to vector<2x32xf32>
    %739 = vector.extract_strided_slice %736 {offsets = [0, 32], sizes = [2, 32], strides = [1, 1]} : vector<2x128xf32> to vector<2x32xf32>
    %740 = vector.extract_strided_slice %737 {offsets = [0, 64], sizes = [2, 32], strides = [1, 1]} : vector<2x128xf32> to vector<2x32xf32>
    %741 = vector.extract_strided_slice %736 {offsets = [0, 96], sizes = [2, 32], strides = [1, 1]} : vector<2x128xf32> to vector<2x32xf32>
    %742 = arith.mulf %739, %699 : vector<2x32xf32>
    %743 = arith.mulf %738, %740 : vector<2x32xf32>
    %744 = arith.addf %742, %743 : vector<2x32xf32>
    %745 = math.tanh %744 : vector<2x32xf32>
    %746 = arith.mulf %741, %745 : vector<2x32xf32>
    %747 = vector.extract_strided_slice %399 {offsets = [1, 0, 0], sizes = [1, 32, 128], strides = [1, 1, 1]} : vector<2x32x128xf32> to vector<1x32x128xf32>
    %748 = vector.shape_cast %747 : vector<1x32x128xf32> to vector<32x128xf32>
    %cst_117 = arith.constant dense<0.000000e+00> : vector<2x128xf32>
    %749 = tpu.matmul %746, %748, %cst_117 {dimension_numbers = #tpu.dot_dimension_numbers<[1], [0], [0], [1], [0, 0, 1, 1], [], []>} : vector<2x32xf32>, vector<32x128xf32>, vector<2x128xf32> -> vector<2x128xf32>
    %750 = vector.extract_strided_slice %400 {offsets = [1, 0, 0], sizes = [1, 32, 128], strides = [1, 1, 1]} : vector<2x32x128xf32> to vector<1x32x128xf32>
    %751 = vector.shape_cast %750 : vector<1x32x128xf32> to vector<32x128xf32>
    %cst_118 = arith.constant dense<0.000000e+00> : vector<2x128xf32>
    %752 = tpu.matmul %727, %751, %cst_118 {dimension_numbers = #tpu.dot_dimension_numbers<[1], [0], [0], [1], [0, 0, 1, 1], [], []>} : vector<2x32xf32>, vector<32x128xf32>, vector<2x128xf32> -> vector<2x128xf32>
    %753 = arith.addf %749, %752 : vector<2x128xf32>
    %754 = vector.extract_strided_slice %401 {offsets = [1, 0, 0], sizes = [1, 1, 128], strides = [1, 1, 1]} : vector<2x1x128xf32> to vector<1x1x128xf32>
    %755 = vector.shape_cast %754 : vector<1x1x128xf32> to vector<1x128xf32>
    %756 = vector.broadcast %755 : vector<1x128xf32> to vector<2x128xf32>
    %757 = arith.addf %753, %756 : vector<2x128xf32>
    %758 = arith.negf %757 : vector<2x128xf32>
    %759 = math.exp %758 : vector<2x128xf32>
    %cst_119 = arith.constant 1.000000e+00 : f32
    %760 = vector.broadcast %cst_119 : f32 to vector<2x128xf32>
    %761 = arith.addf %760, %759 : vector<2x128xf32>
    %762 = arith.divf %760, %761 : vector<2x128xf32>
    %763 = math.tanh %757 : vector<2x128xf32>
    %764 = vector.extract_strided_slice %762 {offsets = [0, 0], sizes = [2, 32], strides = [1, 1]} : vector<2x128xf32> to vector<2x32xf32>
    %765 = vector.extract_strided_slice %762 {offsets = [0, 32], sizes = [2, 32], strides = [1, 1]} : vector<2x128xf32> to vector<2x32xf32>
    %766 = vector.extract_strided_slice %763 {offsets = [0, 64], sizes = [2, 32], strides = [1, 1]} : vector<2x128xf32> to vector<2x32xf32>
    %767 = vector.extract_strided_slice %762 {offsets = [0, 96], sizes = [2, 32], strides = [1, 1]} : vector<2x128xf32> to vector<2x32xf32>
    %768 = arith.mulf %765, %725 : vector<2x32xf32>
    %769 = arith.mulf %764, %766 : vector<2x32xf32>
    %770 = arith.addf %768, %769 : vector<2x32xf32>
    %771 = math.tanh %770 : vector<2x32xf32>
    %772 = arith.mulf %767, %771 : vector<2x32xf32>
    %773 = vector.shape_cast %457 : vector<2x32xf32> to vector<2x1x32xf32>
    %774 = vector.shape_cast %502 : vector<2x32xf32> to vector<2x1x32xf32>
    %775 = vector.shape_cast %547 : vector<2x32xf32> to vector<2x1x32xf32>
    %776 = vector.shape_cast %592 : vector<2x32xf32> to vector<2x1x32xf32>
    %777 = vector.shape_cast %637 : vector<2x32xf32> to vector<2x1x32xf32>
    %778 = vector.shape_cast %682 : vector<2x32xf32> to vector<2x1x32xf32>
    %779 = vector.shape_cast %727 : vector<2x32xf32> to vector<2x1x32xf32>
    %780 = vector.shape_cast %772 : vector<2x32xf32> to vector<2x1x32xf32>
    %781 = tpu.concatenate %773, %774, %775, %776, %777, %778, %779, %780 in 1 : vector<2x1x32xf32>, vector<2x1x32xf32>, vector<2x1x32xf32>, vector<2x1x32xf32>, vector<2x1x32xf32>, vector<2x1x32xf32>, vector<2x1x32xf32>, vector<2x1x32xf32> -> vector<2x8x32xf32>
    %c0_120 = arith.constant 0 : index
    %c0_121 = arith.constant 0 : index
    %782 = vector.load %arg10[%c0_120, %c0_121] : memref<32x16xf32, #tpu.memory_space<vmem>>, vector<32x16xf32>
    %cst_122 = arith.constant dense<0.000000e+00> : vector<2x8x16xf32>
    %783 = tpu.matmul %781, %782, %cst_122 {dimension_numbers = #tpu.dot_dimension_numbers<[2], [0], [0, 1], [1], [0, 0, 0, 1, 1, 1], [], []>} : vector<2x8x32xf32>, vector<32x16xf32>, vector<2x8x16xf32> -> vector<2x8x16xf32>
    %c0_123 = arith.constant 0 : index
    %c0_124 = arith.constant 0 : index
    %784 = vector.load %arg11[%c0_123, %c0_124] : memref<1x16xf32, #tpu.memory_space<vmem>>, vector<1x16xf32>
    %785 = vector.shape_cast %784 : vector<1x16xf32> to vector<1x1x16xf32>
    %786 = vector.broadcast %785 : vector<1x1x16xf32> to vector<2x8x16xf32>
    %787 = arith.addf %783, %786 : vector<2x8x16xf32>
    %788 = vector.shape_cast %787 : vector<2x8x16xf32> to vector<2x128xf32>
    %c0_125 = arith.constant 0 : index
    %c0_126 = arith.constant 0 : index
    %789 = vector.load %arg12[%c0_125, %c0_126] : memref<2x128xf32, #tpu.memory_space<vmem>>, vector<2x128xf32>
    tpu.vector_store %arg12[%c0_125, %c0_126], %788 {strides = array<i32>} : memref<2x128xf32, #tpu.memory_space<vmem>>, vector<2x128xf32>,
    return
  }
}

</mosaic_0001>

<bundles_post_ra>
// kernel: lstm_autoencoder_forward.1
= control target key start
LH: loop header
LB: loop body
LE: loop exit
PB: predicated region body
PF: predicated region fallthrough
CT: control target
= control target key end

     0   :  { %19 = vsyncpa [#allocation3], 0  ;;  %s8339_s0 = inlined_call_operand.hbm [shape: f32[2,8,16], index: 0, kind: input, shape index: {}]   ;;  %s8340_s1 = inlined_call_operand.hbm [shape: f32[16,128], index: 1, kind: input, shape index: {}]   ;;  %s8341_s2 = inlined_call_operand.vmem [shape: f32[1,32,128], index: 2, kind: input, shape index: {}]   ;;  %s8342_s3 = inlined_call_operand.vmem [shape: f32[2,32,128], index: 3, kind: input, shape index: {}]   ;;  %s8343_s4 = inlined_call_operand.vmem [shape: f32[2,1,128], index: 4, kind: input, shape index: {}]   ;;  %s8344_s5 = inlined_call_operand.hbm [shape: f32[2,32,128], index: 5, kind: input, shape index: {}]   ;;  %s8345_s6 = inlined_call_operand.hbm [shape: f32[2,32,128], index: 6, kind: input, shape index: {}]   ;;  %s8346_s7 = inlined_call_operand.hbm [shape: f32[2,1,128], index: 7, kind: input, shape index: {}]   ;;  %s8347_s8 = inlined_call_operand.vmem [shape: f32[32,10], index: 8, kind: input, shape index: {}]   ;;  %s8348_s9 = inlined_call_operand.hbm [shape: f32[1,10], index: 9, kind: input, shape index: {}]   ;;  %s8349_s10 = inlined_call_operand.vmem [shape: f32[32,16], index: 10, kind: input, shape index: {}]   ;;  %s8350_s11 = inlined_call_operand.hbm [shape: f32[1,16], index: 11, kind: input, shape index: {}]   ;;  %s8351_s12 = inlined_call_operand.vmem [shape: f32[2,128], index: 12, kind: output, shape index: {0}]   ;;  %s8352_s13 = inlined_call_operand.hbm [shape: f32[2,10], index: 13, kind: output, shape index: {1}]  }
   0x1   :  { %20 = vsyncpa [#allocation6], 0 }
   0x2   :  { %21 = vsyncpa [#allocation9], 0 }
   0x3   :  { %22 = vsyncpa [#allocation12], 0 }
   0x4   :  { %23 = vsyncpa [#allocation4], 0  ;;  %s7033_s25 = smov [#allocation5]   ;;  %s7034_s27 = smov [#allocation8]  }
   0x5   :  { %s41_s26 = sshll.u32 %s7033_s25, 4  ;;  %s71_s28 = sshll.u32 %s7034_s27, 4  ;;  %s42_s26 = int_to_ptr.vmem [resolvable:$true] %s41_s26  ;;  %s72_s28 = int_to_ptr.vmem [resolvable:$true] %s71_s28 }
   0x6   :  { %s6871_s29 = scalar_lea.vmem %s42_s26, 256  ;;  %p6876_p1 = scmp.lt.s32.totalorder %s42_s26, %s42_s26 }
   0x7   :  { %p6872_p0 = scmp.ne.s32.totalorder %s42_s26, %s6871_s29  ;;  %p6877_p2 = scmp.lt.s32.totalorder %s6871_s29, %s6871_s29 }
   0x9   :  { %p6878_p3 = por %p6877_p2, %p6876_p1 }
   0xb   :  { %p6879_p4 = pnand %p6878_p3, %p6872_p0 }
   0xd   :  { %6882 = shalt.err (!%p6879_p4)
}
   0xe   :  { %s7035_s30 = smov 128   ;;  %s7036_s14 = smov 8  }
   0xf   :  { %47 = dma.hbm_to_vmem [thread:$0]  %s8340_s1, 256, %s42_s26, [#allocation6], %s7035_s30, %s7035_s30, %s7036_s14  }
  0x10   :  { %s6891_s17 = scalar_lea.vmem %s72_s28, 1024  ;;  %p6896_p6 = scmp.lt.s32.totalorder %s72_s28, %s72_s28 }
  0x11   :  { %p6892_p5 = scmp.ne.s32.totalorder %s72_s28, %s6891_s17  ;;  %p6897_p7 = scmp.lt.s32.totalorder %s6891_s17, %s6891_s17 }
  0x13   :  { %p6898_p8 = por %p6897_p7, %p6896_p6 }
  0x15   :  { %p6899_p9 = pnand %p6898_p8, %p6892_p5 }
  0x17   :  { %6902 = shalt.err (!%p6899_p9)
}
  0x18   :  { %77 = dma.hbm_to_vmem [thread:$0]  %s8345_s6, 1024, %s72_s28, [#allocation9], %s7035_s30, %s7035_s30, %s7036_s14  }
  0x19   :  { %s7037_s20 = smov [#allocation11]   ;;  %s7038_s22 = smov [#allocation2]  }
  0x1a   :  { %s98_s21 = sshll.u32 %s7037_s20, 4  ;;  %s29_s23 = sshll.u32 %s7038_s22, 4  ;;  %s99_s21 = int_to_ptr.vmem [resolvable:$true] %s98_s21  ;;  %s30_s23 = int_to_ptr.vmem [resolvable:$true] %s29_s23 }
  0x1b   :  { %s6911_s1 = scalar_lea.vmem %s99_s21, 16  ;;  %s6915_s24 = scalar_lea.vmem %s99_s21, 32 }
  0x1c   :  { %p6912_p10 = scmp.ne.s32.totalorder %s99_s21, %s6911_s1  ;;  %p6916_p11 = scmp.lt.s32.totalorder %s99_s21, %s99_s21 }
  0x1d   :  { %p6917_p12 = scmp.lt.s32.totalorder %s6915_s24, %s6911_s1 }
  0x1f   :  { %p6918_p13 = por %p6917_p12, %p6916_p11 }
  0x21   :  { %p6919_p0 = pnand %p6918_p13, %p6912_p10 }
  0x23   :  { %6922 = shalt.err (!%p6919_p0)
}
  0x24   :  { %101 = dma.hbm_to_vmem [thread:$0]  %s8348_s9, 16, %s99_s21, [#allocation12]  }
  0x25   :  { %s6931_s27 = scalar_lea.vmem %s30_s23, 256  ;;  %p6936_p2 = scmp.lt.s32.totalorder %s30_s23, %s30_s23 }
  0x26   :  { %p6932_p1 = scmp.ne.s32.totalorder %s30_s23, %s6931_s27  ;;  %p6937_p3 = scmp.lt.s32.totalorder %s6931_s27, %s6931_s27 }
  0x28   :  { %p6938_p4 = por %p6937_p3, %p6936_p2 }
  0x2a   :  { %p6939_p5 = pnand %p6938_p4, %p6932_p1 }
  0x2c   :  { %6942 = shalt.err (!%p6939_p5)
}
  0x2d   :  { %35 = dma.hbm_to_vmem [thread:$0]  %s8339_s0, 256, %s30_s23, [#allocation3], %s7035_s30, %s7035_s30, %s7036_s14  }
  0x2e   :  { %s7039_s29 = smov [#allocation7]   ;;  %s7040_s16 = smov [#allocation10]  }
  0x2f   :  { %s59_s15 = sshll.u32 %s7039_s29, 4  ;;  %s83_s17 = sshll.u32 %s7040_s16, 4  ;;  %s60_s15 = int_to_ptr.vmem [resolvable:$true] %s59_s15  ;;  %s84_s17 = int_to_ptr.vmem [resolvable:$true] %s83_s17 }
  0x30   :  { %s6951_s9 = scalar_lea.vmem %s60_s15, 1024  ;;  %p6956_p7 = scmp.lt.s32.totalorder %s60_s15, %s60_s15 }
  0x31   :  { %p6952_p6 = scmp.ne.s32.totalorder %s60_s15, %s6951_s9  ;;  %p6957_p8 = scmp.lt.s32.totalorder %s6951_s9, %s6951_s9 }
  0x33   :  { %p6958_p9 = por %p6957_p8, %p6956_p7 }
  0x35   :  { %p6959_p10 = pnand %p6958_p9, %p6952_p6 }
  0x37   :  { %6962 = shalt.err (!%p6959_p10)
}
  0x38   :  { %65 = dma.hbm_to_vmem [thread:$0]  %s8344_s5, 1024, %s60_s15, [#allocation6], %s7035_s30, %s7035_s30, %s7036_s14  }
  0x39   :  { %s6971_s0 = scalar_lea.vmem %s84_s17, 32  ;;  %p6976_p12 = scmp.lt.s32.totalorder %s84_s17, %s84_s17 }
  0x3a   :  { %p6972_p11 = scmp.ne.s32.totalorder %s84_s17, %s6971_s0  ;;  %p6977_p13 = scmp.lt.s32.totalorder %s6971_s0, %s6971_s0 }
  0x3c   :  { %p6978_p0 = por %p6977_p13, %p6976_p12 }
  0x3e   :  { %p6979_p1 = pnand %p6978_p0, %p6972_p11 }
  0x40   :  { %6982 = shalt.err (!%p6979_p1)
}
  0x41   :  { %s7041_s20 = smov 16   ;;  %s7042_s21 = smov 1  }
  0x42   :  { %89 = dma.hbm_to_vmem [thread:$0]  %s8346_s7, 32, %s84_s17, [#allocation9], %s7041_s20, %s7041_s20, %s7042_s21  }
  0x43   :  { %s7043_s1 = smov [#allocation13]  }
  0x44   :  { %s110_s24 = sshll.u32 %s7043_s1, 4  ;;  %s111_s24 = int_to_ptr.vmem [resolvable:$true] %s110_s24 }
  0x45   :  { %s6991_s25 = scalar_lea.vmem %s111_s24, 16  ;;  %s6995_s5 = scalar_lea.vmem %s111_s24, 32 }
  0x46   :  { %p6992_p2 = scmp.ne.s32.totalorder %s111_s24, %s6991_s25  ;;  %p6996_p3 = scmp.lt.s32.totalorder %s111_s24, %s111_s24 }
  0x47   :  { %p6997_p4 = scmp.lt.s32.totalorder %s6995_s5, %s6991_s25 }
  0x49   :  { %p6998_p5 = por %p6997_p4, %p6996_p3 }
  0x4b   :  { %p6999_p6 = pnand %p6998_p5, %p6992_p2 }
  0x4d   :  { %7002 = shalt.err (!%p6999_p6)
}
  0x4e   :  { %113 = dma.hbm_to_vmem [thread:$0]  %s8350_s11, 16, %s111_s24, [#allocation12]  }
  0x4f   :  { %7023 = dma.done.wait [#allocation3], 256  }
  0x50   :  { %7024 = vsyncadd [#allocation3], 4294967040 }
  0x51   :  { %7025 = dma.done.wait [#allocation6], 1280  }
  0x52   :  { %7026 = vsyncadd [#allocation6], 4294966016 }
  0x53   :  { %7027 = dma.done.wait [#allocation9], 1056  }
  0x54   :  { %7028 = vsyncadd [#allocation9], 4294966240 }
  0x55   :  { %7029 = dma.done.wait [#allocation12], 32  }
  0x56   :  { %7030 = vsyncadd [#allocation12], 4294967264  ;;  %v7044_v0 = vmov 0.0   ;;  %vm7045_vm0 = vmmov 0   ;;  %v152_v1 = vld [vmem:[#allocation5 + $0x8] sm:$0xff]  ;;  %v151_v3 = vld [vmem:[#allocation5] sm:$0xff] }
  0x57   :  { %5929 = vmatprep.subr.mxu1 %v7044_v0  ;;  %5937 = vmatprep.mubr.msk.f32.mxu1 %vm7045_vm0, %v7044_v0  ;;  %v7167_v2 = vld [vmem:[%s8342_s3 + $0x18] sm:$0xff]  ;;  %v7173_v4 = vld [vmem:[%s8342_s3 + $0x10] sm:$0xff]  ;;  %v135_v5 = vld [vmem:[#allocation2] sm:$0xff]  ;;  %vm159_vm1 = vcmask 130048   ;;  %s7046_s9 = smov 64   ;;  %s7047_s18 = smov 32  }
  0x58   :  { %5922 = vmatprep.subr.mxu0 %v152_v1  ;;  %5930 = vmatpush3.msra.mxu1 %v7167_v2  ;;  %v136_v6 = vld [vmem:[#allocation2 + $0x8] sm:$0xff]  ;;  %v7188_v8 = vld [vmem:[%s8342_s3] sm:$0xff]  ;;  %v7222_v39 = vld [vmem:[%s8342_s3 + $0x38] sm:$0xff]  ;;  %vm442_vm2 = vcmask 1041409   ;;  %vm241_vm3 = vcmask 261120   ;;  %vm5320_vm4 = vcmask 1040384  }
  0x59   :  { %5923 = vmatpush3.msra.mxu0 %v152_v1  ;;  %5931 = vmatprep.subr.mxu1 %v7044_v0  ;;  %v7180_v7 = vld [vmem:[%s8342_s3 + $0x8] sm:$0xff]  ;;  %v5566_v10 = vld [vmem:[%s8343_s4] ss:$0 sm:$0xff]  ;;  %v7227_v40 = vld [vmem:[%s8342_s3 + $0x30] sm:$0xff]  ;;  %vm5323_vm5 = vcmask 1041408   ;;  %vm5326_vm6 = vcmask 1042432  }
  0x5a   :  { %5924 = vmatprep.subr.mxu0 %v151_v3  ;;  %5932 = vmatpush3.msra.mxu1 %v7173_v4  ;;  %v7233_v41 = vld [vmem:[%s8341_s2 + $0x18] sm:$0xff]  ;;  %v7238_v42 = vld [vmem:[%s8341_s2 + $0x10] sm:$0xff]  ;;  %v7244_v43 = vld [vmem:[%s8342_s3 + $0x28] sm:$0xff]  ;;  %vm5329_vm7 = vcmask 1043456   ;;  %vm5332_vm8 = vcmask 1044480   ;;  %vm5335_vm9 = vcmask 1045504  }
  0x5b   :  { %5925 = vmatpush3.msra.mxu0 %v151_v3  ;;  %5926 = vmatprep.mubr.msk.f32.mxu0 %vm159_vm1, %v135_v5  ;;  %v7253_v44 = vld [vmem:[%s8342_s3 + $0x20] sm:$0xff]  ;;  %v7259_v45 = vld [vmem:[%s8341_s2 + $0x8] sm:$0xff]  ;;  %vm5338_vm10 = vcmask 1046528   ;;  %vm2803_vm11 = vcmask 74752   ;;  %s7052_s27 = smov 80   ;;  %s7053_s6 = smov 96  }
  0x5c   :  { %5933 = vmatprep.subr.mxu1 %v7044_v0  ;;  %5927 = vmatmul.mubr.msk.f32.vlgmr.msra.gmra.mxu0 %vm159_vm1, %v136_v6  ;;  %v7272_v47 = vld [vmem:[%s8341_s2] sm:$0xff] }
  0x5d   :  { %5934 = vmatpush3.msra.mxu1 %v7180_v7  ;;  %5940 = vmatprep.subr.mxu0 %v7044_v0  ;;  %v7315_v58 = vld [vmem:[%s8343_s4 + $0x1] ss:$0 sm:$0xff] }
  0x5e   :  { %5935 = vmatprep.subr.mxu1 %v7044_v0  ;;  %5948 = vmatprep.mubr.msk.f32.mxu0 %vm7045_vm0, %v7044_v0 }
  0x5f   :  { %5936 = vmatpush3.msra.mxu1 %v7188_v8  ;;  %5941 = vmatpush3.msra.mxu0 %v7222_v39 }
  0x60   :  { %5938 = vmatmul.mubr.f32.vlgmr.msra.gmra.mxu1 %v7044_v0  ;;  %5951 = vmatprep.subr.mxu1 %v7044_v0 }
  0x61   :  { %5959 = vmatprep.mubr.msk.f32.mxu1 %vm7045_vm0, %v7044_v0  ;;  %5942 = vmatprep.subr.mxu0 %v7044_v0 }
  0x62   :  { %5952 = vmatpush3.msra.mxu1 %v7233_v41  ;;  %5943 = vmatpush3.msra.mxu0 %v7227_v40 }
  0x63   :  { %5953 = vmatprep.subr.mxu1 %v7044_v0  ;;  %5944 = vmatprep.subr.mxu0 %v7044_v0 }
  0x64   :  { %5954 = vmatpush3.msra.mxu1 %v7238_v42  ;;  %5945 = vmatpush3.msra.mxu0 %v7244_v43 }
  0x65   :  { %5955 = vmatprep.subr.mxu1 %v7044_v0  ;;  %5946 = vmatprep.subr.mxu0 %v7044_v0 }
  0x66   :  { %5947 = vmatpush3.msra.mxu0 %v7253_v44  ;;  %5956 = vmatpush3.msra.mxu1 %v7259_v45 }
  0x67   :  { %5962 = vmatprep.subr.mxu0 %v7044_v0  ;;  %5949 = vmatmul.mubr.f32.vlgmr.msra.gmra.mxu0 %v7044_v0 }
  0x68   :  { %5963 = vmatpush3.msra.mxu0 %v7167_v2  ;;  %5957 = vmatprep.subr.mxu1 %v7044_v0 }
  0x69   :  { %5964 = vmatprep.subr.mxu0 %v7044_v0  ;;  %5958 = vmatpush3.msra.mxu1 %v7272_v47 }
  0x6a   :  { %5965 = vmatpush3.msra.mxu0 %v7173_v4  ;;  %5970 = vmatprep.mubr.msk.f32.mxu0 %vm7045_vm0, %v7044_v0 }
  0x6b   :  { %5966 = vmatprep.subr.mxu0 %v7044_v0  ;;  %5973 = vmatprep.subr.mxu1 %v7044_v0 }
  0x6c   :  { %5967 = vmatpush3.msra.mxu0 %v7180_v7 }
  0x6d   :  { %5968 = vmatprep.subr.mxu0 %v7044_v0 }
  0x6e   :  { %5969 = vmatpush3.msra.mxu0 %v7188_v8 }
  0x6f   :  { %5984 = vmatprep.subr.mxu0 %v7044_v0 }
 0x11c   :  { %v5928_v9 = vpop.f32.mrf.mxu0 }
 0x11d   :  { %v7203_v11 = vadd.f32 %v5928_v9, %v5566_v10 }
 0x11e   :  { %v232_v12 = vpop.f32.mrf.mxu0 }
 0x11f   :  { %v7205_v15 = vadd.f32 %v5566_v10, %v232_v12 }
 0x120   :  { %v311_v13 = vpop.f32.mrf.mxu1 }
 0x121   :  { %v316_v14 = vrot.slane %v311_v13, 1  ;;  %v319_v18 = vadd.f32 %v311_v13, %v7205_v15 }
 0x122   :  { %v5939_v16 = vpop.f32.mrf.mxu1 }
 0x123   :  { %v320_v17 = vadd.f32 %v316_v14, %v7203_v11  ;;  %v5569_v22 = vmul.f32 -1.442695, %v319_v18 }
 0x125   :  { %6513 = vtanh.f32 %v320_v17  ;;  %v5570_v21 = vmul.f32 -1.442695, %v320_v17 }
 0x126   :  { %6515 = vtanh.f32 %v319_v18 }
 0x127   :  { %6517 = vpow2.f32 %v5570_v21  ;;  %v435_v55 = vpop.f32.mrf.mxu0 }
 0x128   :  { %6519 = vpow2.f32 %v5569_v22 }
 0x129   :  { %v5950_v56 = vpop.f32.mrf.mxu0 }
 0x132   :  { %v6514_v19 = vpop.eup %6513 }
 0x133   :  { %341 = vrot.lane.b32.xlu0 %v6514_v19, %s7046_s9  ;;  %v6516_v20 = vpop.eup %6515 }
 0x134   :  { %v6518_v23 = vpop.eup %6517 }
 0x135   :  { %v328_v24 = vadd.f32 1.0, %v6518_v23  ;;  %v6520_v25 = vpop.eup %6519 }
 0x136   :  { %v327_v26 = vadd.f32 1.0, %v6520_v25 }
 0x137   :  { %339 = vrot.lane.b32.xlu0 %v6516_v20, %s7046_s9  ;;  %6521 = vrcp.f32 %v328_v24 }
 0x138   :  { %6523 = vrcp.f32 %v327_v26 }
 0x144   :  { %v6522_v27 = vpop.eup %6521 }
 0x145   :  { %v6524_v30 = vpop.eup %6523  ;;  %v336_v33 = vmul.f32 0.0, %v6522_v27 }
 0x146   :  { %v335_v36 = vmul.f32 0.0, %v6524_v30 }
 0x1a5   :  { %v342_v28 = vpop.permute.xlu0 %341 }
 0x1a6   :  { %v346_v29 = vmul.f32 %v6522_v27, %v342_v28 }
 0x1a8   :  { %351 = vrot.lane.b32.xlu1 %v346_v29, %s7047_s18 }
 0x1a9   :  { %v340_v31 = vpop.permute.xlu0 %339 }
 0x1aa   :  { %v345_v32 = vmul.f32 %v6524_v30, %v340_v31 }
 0x1ac   :  { %349 = vrot.lane.b32.xlu1 %v345_v32, %s7047_s18 }
 0x21a   :  { %v352_v34 = vpop.permute.xlu1 %351 }
 0x21b   :  { %v7213_v35 = vadd.f32 %v352_v34, %v336_v33 }
 0x21d   :  { %6525 = vtanh.f32 %v7213_v35  ;;  %v642_v34 = vrot.slane %v7213_v35, 7 }
 0x21e   :  { %v350_v37 = vpop.permute.xlu1 %349 }
 0x21f   :  { %v7216_v38 = vadd.f32 %v350_v37, %v335_v36 }
 0x221   :  { %6527 = vtanh.f32 %v7216_v38  ;;  %v641_v36 = vrot.slane %v7216_v38, 7 }
 0x22a   :  { %v6526_v46 = vpop.eup %6525 }
 0x22b   :  { %363 = vrot.lane.b32.xlu0 %v6526_v46, %s7046_s9 }
 0x22e   :  { %v6528_v48 = vpop.eup %6527 }
 0x22f   :  { %361 = vrot.lane.b32.xlu1 %v6528_v48, %s7046_s9 }
 0x29d   :  { %v364_v49 = vpop.permute.xlu0 %363 }
 0x29e   :  { %v368_v50 = vmul.f32 %v6522_v27, %v364_v49 }
 0x2a0   :  { %v441_v52 = vrot.slane %v368_v50, 7 }
 0x2a1   :  { %v362_v51 = vpop.permute.xlu1 %361 }
 0x2a2   :  { %v367_v53 = vmul.f32 %v6524_v30, %v362_v51 }
 0x2a4   :  { %v443_v54 = vsel %vm442_vm2, %v441_v52, %v367_v53 }
 0x2a5   :  { %444 = vrot.lane.b32.xlu0 %v443_v54, %s7047_s18 }
 0x317   :  { %v445_v57 = vpop.permute.xlu0 %444 }
 0x318   :  { %5960 = vmatmul.mubr.msk.f32.vlgmr.msra.gmra.mxu1 %vm241_vm3, %v445_v57  ;;  %5971 = vmatmul.mubr.msk.f32.vlgmr.msra.gmra.mxu0 %vm241_vm3, %v445_v57 }
 0x319   :  { %5974 = vmatpush3.msra.mxu1 %v7222_v39  ;;  %5985 = vmatpush3.msra.mxu0 %v7233_v41 }
 0x31a   :  { %5975 = vmatprep.subr.mxu1 %v7044_v0  ;;  %5981 = vmatprep.mubr.msk.f32.mxu1 %vm7045_vm0, %v7044_v0 }
 0x31b   :  { %5976 = vmatpush3.msra.mxu1 %v7227_v40  ;;  %5986 = vmatprep.subr.mxu0 %v7044_v0 }
 0x31c   :  { %5977 = vmatprep.subr.mxu1 %v7044_v0  ;;  %5987 = vmatpush3.msra.mxu0 %v7238_v42 }
 0x31d   :  { %5978 = vmatpush3.msra.mxu1 %v7244_v43  ;;  %5988 = vmatprep.subr.mxu0 %v7044_v0 }
 0x31e   :  { %5979 = vmatprep.subr.mxu1 %v7044_v0  ;;  %5989 = vmatpush3.msra.mxu0 %v7259_v45 }
 0x31f   :  { %5980 = vmatpush3.msra.mxu1 %v7253_v44  ;;  %5990 = vmatprep.subr.mxu0 %v7044_v0 }
 0x320   :  { %5995 = vmatprep.subr.mxu1 %v7044_v0  ;;  %5991 = vmatpush3.msra.mxu0 %v7272_v47 }
 0x321   :  { %5992 = vmatprep.mubr.msk.f32.mxu0 %vm7045_vm0, %v7044_v0  ;;  %6006 = vmatprep.subr.mxu0 %v7044_v0 }
 0x3d8   :  { %v514_v59 = vpop.f32.mrf.mxu1  ;;  %v615_v60 = vpop.f32.mrf.mxu0 }
 0x3d9   :  { %v515_v61 = vadd.f32 %v514_v59, %v435_v55  ;;  %v620_v62 = vrot.slane %v615_v60, 7  ;;  %v624_v5 = vadd.f32 %v615_v60, %v7203_v11 }
 0x3da   :  { %v5961_v63 = vpop.f32.mrf.mxu1  ;;  %v5972_v1 = vpop.f32.mrf.mxu0 }
 0x3db   :  { %v524_v3 = vadd.f32 %v7315_v58, %v515_v61  ;;  %v623_v6 = vadd.f32 %v620_v62, %v7205_v15  ;;  %v5576_v14 = vmul.f32 -1.442695, %v624_v5 }
 0x3dd   :  { %6529 = vtanh.f32 %v524_v3  ;;  %v5573_v13 = vmul.f32 -1.442695, %v524_v3  ;;  %v5575_v16 = vmul.f32 -1.442695, %v623_v6 }
 0x3de   :  { %6531 = vtanh.f32 %v624_v5 }
 0x3df   :  { %6533 = vtanh.f32 %v623_v6 }
 0x3e0   :  { %6535 = vpow2.f32 %v5573_v13 }
 0x3e1   :  { %6537 = vpow2.f32 %v5576_v14 }
 0x3e2   :  { %6539 = vpow2.f32 %v5575_v16 }
 0x3ea   :  { %v6530_v9 = vpop.eup %6529 }
 0x3eb   :  { %534 = vrot.lane.b32.xlu1 %v6530_v9, %s7046_s9  ;;  %v6532_v10 = vpop.eup %6531 }
 0x3ec   :  { %v6534_v12 = vpop.eup %6533 }
 0x3ed   :  { %649 = vrot.lane.b32.xlu0 %v6534_v12, %s7046_s9  ;;  %v6536_v17 = vpop.eup %6535 }
 0x3ee   :  { %v6538_v18 = vpop.eup %6537  ;;  %v528_v19 = vadd.f32 1.0, %v6536_v17 }
 0x3ef   :  { %651 = vrot.lane.b32.xlu1 %v6532_v10, %s7046_s9  ;;  %v6540_v20 = vpop.eup %6539  ;;  %v632_v21 = vadd.f32 1.0, %v6538_v18 }
 0x3f0   :  { %6541 = vrcp.f32 %v528_v19  ;;  %v631_v22 = vadd.f32 1.0, %v6540_v20 }
 0x3f1   :  { %6543 = vrcp.f32 %v632_v21 }
 0x3f2   :  { %6545 = vrcp.f32 %v631_v22 }
 0x3fd   :  { %v6542_v23 = vpop.eup %6541 }
 0x3fe   :  { %v6544_v26 = vpop.eup %6543  ;;  %v532_v32 = vmul.f32 0.0, %v6542_v23 }
 0x3ff   :  { %v6546_v27 = vpop.eup %6545  ;;  %v646_v48 = vmul.f32 %v6544_v26, %v642_v34 }
 0x400   :  { %v645_v46 = vmul.f32 %v6546_v27, %v641_v36 }
 0x45d   :  { %v535_v24 = vpop.permute.xlu1 %534 }
 0x45e   :  { %v537_v25 = vmul.f32 %v6542_v23, %v535_v24 }
 0x45f   :  { %v650_v28 = vpop.permute.xlu0 %649 }
 0x460   :  { %539 = vrot.lane.b32.xlu0 %v537_v25, %s7047_s18  ;;  %v655_v30 = vmul.f32 %v6546_v27, %v650_v28 }
 0x461   :  { %v652_v29 = vpop.permute.xlu1 %651 }
 0x462   :  { %v656_v31 = vmul.f32 %v6544_v26, %v652_v29  ;;  %659 = vrot.lane.b32.xlu1 %v655_v30, %s7047_s18 }
 0x464   :  { %661 = vrot.lane.b32.xlu0 %v656_v31, %s7047_s18 }
 0x4d2   :  { %v540_v33 = vpop.permute.xlu0 %539 }
 0x4d3   :  { %v7328_v37 = vadd.f32 %v540_v33, %v532_v32 }
 0x4d4   :  { %v660_v49 = vpop.permute.xlu1 %659 }
 0x4d5   :  { %6547 = vtanh.f32 %v7328_v37  ;;  %v7331_v51 = vadd.f32 %v660_v49, %v645_v46 }
 0x4d6   :  { %v662_v50 = vpop.permute.xlu0 %661 }
 0x4d7   :  { %v7333_v52 = vadd.f32 %v662_v50, %v646_v48  ;;  %6549 = vtanh.f32 %v7331_v51 }
 0x4d9   :  { %6551 = vtanh.f32 %v7333_v52 }
 0x4e2   :  { %v6548_v53 = vpop.eup %6547 }
 0x4e3   :  { %545 = vrot.lane.b32.xlu1 %v6548_v53, %s7046_s9 }
 0x4e4   :  { %v6550_v35 = vpop.eup %6549 }
 0x4e5   :  { %671 = vrot.lane.b32.xlu0 %v6550_v35, %s7046_s9  ;;  %v950_v35 = vrot.slane %v7331_v51, 7 }
 0x4e6   :  { %v6552_v38 = vpop.eup %6551 }
 0x4e7   :  { %673 = vrot.lane.b32.xlu1 %v6552_v38, %s7046_s9 }
 0x555   :  { %v546_v54 = vpop.permute.xlu1 %545 }
 0x556   :  { %v548_v55 = vmul.f32 %v6542_v23, %v546_v54 }
 0x557   :  { %v672_v56 = vpop.permute.xlu0 %671 }
 0x558   :  { %680 = vrot.lane.b32.xlu0 %v548_v55, %s7047_s18  ;;  %v677_v57 = vmul.f32 %v6546_v27, %v672_v56 }
 0x559   :  { %v674_v59 = vpop.permute.xlu1 %673 }
 0x55a   :  { %v678_v60 = vmul.f32 %v6544_v26, %v674_v59  ;;  %v756_v61 = vrot.slane %v677_v57, 1  ;;  %v951_v59 = vrot.slane %v7333_v52, 7 }
 0x55c   :  { %v757_v62 = vsel %vm442_vm2, %v678_v60, %v756_v61 }
 0x55d   :  { %758 = vrot.lane.b32.xlu1 %v757_v62, %s7047_s18 }
 0x5ca   :  { %v681_v63 = vpop.permute.xlu0 %680 }
 0x5cb   :  { %5982 = vmatmul.mubr.msk.f32.vlgmr.msra.gmra.mxu1 %vm241_vm3, %v681_v63 }
 0x5cc   :  { %5996 = vmatpush3.msra.mxu1 %v7167_v2  ;;  %6003 = vmatprep.mubr.msk.f32.mxu1 %vm7045_vm0, %v7044_v0 }
 0x5cd   :  { %5997 = vmatprep.subr.mxu1 %v7044_v0 }
 0x5ce   :  { %5998 = vmatpush3.msra.mxu1 %v7173_v4 }
 0x5cf   :  { %5999 = vmatprep.subr.mxu1 %v7044_v0  ;;  %v759_v1 = vpop.permute.xlu1 %758 }
 0x5d0   :  { %6000 = vmatpush3.msra.mxu1 %v7180_v7  ;;  %5993 = vmatmul.mubr.msk.f32.vlgmr.msra.gmra.mxu0 %vm241_vm3, %v759_v1 }
 0x5d1   :  { %6001 = vmatprep.subr.mxu1 %v7044_v0  ;;  %6007 = vmatpush3.msra.mxu0 %v7222_v39 }
 0x5d2   :  { %6002 = vmatpush3.msra.mxu1 %v7188_v8  ;;  %6008 = vmatprep.subr.mxu0 %v7044_v0 }
 0x5d3   :  { %6004 = vmatmul.mubr.msk.f32.vlgmr.msra.gmra.mxu1 %vm241_vm3, %v759_v1  ;;  %6014 = vmatprep.mubr.msk.f32.mxu0 %vm7045_vm0, %v7044_v0 }
 0x5d4   :  { %6009 = vmatpush3.msra.mxu0 %v7227_v40  ;;  %6017 = vmatprep.subr.mxu1 %v7044_v0 }
 0x5d5   :  { %6010 = vmatprep.subr.mxu0 %v7044_v0  ;;  %6018 = vmatpush3.msra.mxu1 %v7233_v41 }
 0x5d6   :  { %6011 = vmatpush3.msra.mxu0 %v7244_v43  ;;  %6019 = vmatprep.subr.mxu1 %v7044_v0 }
 0x5d7   :  { %6012 = vmatprep.subr.mxu0 %v7044_v0  ;;  %6020 = vmatpush3.msra.mxu1 %v7238_v42 }
 0x5d8   :  { %6013 = vmatpush3.msra.mxu0 %v7253_v44  ;;  %6021 = vmatprep.subr.mxu1 %v7044_v0 }
 0x5d9   :  { %6028 = vmatprep.subr.mxu0 %v7044_v0  ;;  %6022 = vmatpush3.msra.mxu1 %v7259_v45 }
 0x5da   :  { %6023 = vmatprep.subr.mxu1 %v7044_v0  ;;  %6025 = vmatprep.mubr.msk.f32.mxu1 %vm7045_vm0, %v7044_v0 }
 0x5db   :  { %6024 = vmatpush3.msra.mxu1 %v7272_v47 }
 0x5dc   :  { %6039 = vmatprep.subr.mxu1 %v7044_v0 }
 0x68b   :  { %v750_v3 = vpop.f32.mrf.mxu1 }
 0x68d   :  { %v5983_v5 = vpop.f32.mrf.mxu1 }
 0x690   :  { %v828_v6 = vpop.f32.mrf.mxu0 }
 0x691   :  { %v829_v9 = vadd.f32 %v828_v6, %v750_v3 }
 0x692   :  { %v5994_v12 = vpop.f32.mrf.mxu0 }
 0x693   :  { %v923_v10 = vpop.f32.mrf.mxu1  ;;  %v832_v16 = vadd.f32 %v7315_v58, %v829_v9 }
 0x694   :  { %v928_v13 = vrot.slane %v923_v10, 6  ;;  %v929_v14 = vrot.slane %v923_v10, 7 }
 0x695   :  { %v6005_v17 = vpop.f32.mrf.mxu1  ;;  %6553 = vtanh.f32 %v832_v16  ;;  %v5579_v23 = vmul.f32 -1.442695, %v832_v16 }
 0x696   :  { %v932_v18 = vadd.f32 %v928_v13, %v7205_v15  ;;  %v933_v19 = vadd.f32 %v929_v14, %v7203_v11 }
 0x698   :  { %6555 = vtanh.f32 %v932_v18  ;;  %v5581_v24 = vmul.f32 -1.442695, %v932_v18  ;;  %v5582_v25 = vmul.f32 -1.442695, %v933_v19 }
 0x699   :  { %6557 = vtanh.f32 %v933_v19 }
 0x69a   :  { %6559 = vpow2.f32 %v5579_v23 }
 0x69b   :  { %6561 = vpow2.f32 %v5581_v24 }
 0x69c   :  { %6563 = vpow2.f32 %v5582_v25 }
 0x6a2   :  { %v6554_v20 = vpop.eup %6553 }
 0x6a3   :  { %842 = vrot.lane.b32.xlu0 %v6554_v20, %s7046_s9 }
 0x6a5   :  { %v6556_v21 = vpop.eup %6555 }
 0x6a6   :  { %958 = vrot.lane.b32.xlu1 %v6556_v21, %s7046_s9  ;;  %v6558_v22 = vpop.eup %6557 }
 0x6a7   :  { %960 = vrot.lane.b32.xlu0 %v6558_v22, %s7046_s9  ;;  %v6560_v26 = vpop.eup %6559 }
 0x6a8   :  { %v6562_v27 = vpop.eup %6561  ;;  %v836_v28 = vadd.f32 1.0, %v6560_v26 }
 0x6a9   :  { %v940_v29 = vadd.f32 1.0, %v6562_v27  ;;  %v6564_v30 = vpop.eup %6563 }
 0x6aa   :  { %6565 = vrcp.f32 %v836_v28  ;;  %v941_v31 = vadd.f32 1.0, %v6564_v30 }
 0x6ab   :  { %6567 = vrcp.f32 %v940_v29 }
 0x6ac   :  { %6569 = vrcp.f32 %v941_v31 }
 0x6b7   :  { %v6566_v32 = vpop.eup %6565 }
 0x6b8   :  { %v6568_v34 = vpop.eup %6567  ;;  %v840_v38 = vmul.f32 %v6566_v32, %v7328_v37 }
 0x6b9   :  { %v6570_v49 = vpop.eup %6569  ;;  %v954_v55 = vmul.f32 %v6568_v34, %v950_v35 }
 0x6ba   :  { %v955_v61 = vmul.f32 %v6570_v49, %v951_v59 }
 0x715   :  { %v843_v33 = vpop.permute.xlu0 %842 }
 0x716   :  { %v845_v36 = vmul.f32 %v6566_v32, %v843_v33 }
 0x718   :  { %v959_v46 = vpop.permute.xlu1 %958  ;;  %847 = vrot.lane.b32.xlu1 %v845_v36, %s7047_s18 }
 0x719   :  { %v964_v48 = vmul.f32 %v6568_v34, %v959_v46  ;;  %v961_v50 = vpop.permute.xlu0 %960 }
 0x71a   :  { %v965_v53 = vmul.f32 %v6570_v49, %v961_v50 }
 0x71b   :  { %968 = vrot.lane.b32.xlu0 %v964_v48, %s7047_s18 }
 0x71c   :  { %970 = vrot.lane.b32.xlu1 %v965_v53, %s7047_s18 }
 0x78a   :  { %v848_v54 = vpop.permute.xlu1 %847 }
 0x78b   :  { %v7387_v56 = vadd.f32 %v848_v54, %v840_v38 }
 0x78d   :  { %v969_v57 = vpop.permute.xlu0 %968  ;;  %6571 = vtanh.f32 %v7387_v56 }
 0x78e   :  { %v7390_v60 = vadd.f32 %v969_v57, %v954_v55  ;;  %v971_v62 = vpop.permute.xlu1 %970 }
 0x78f   :  { %v7394_v63 = vadd.f32 %v971_v62, %v955_v61 }
 0x790   :  { %6573 = vtanh.f32 %v7390_v60 }
 0x791   :  { %6575 = vtanh.f32 %v7394_v63 }
 0x79a   :  { %v6572_v37 = vpop.eup %6571 }
 0x79b   :  { %853 = vrot.lane.b32.xlu0 %v6572_v37, %s7046_s9 }
 0x79d   :  { %v6574_v51 = vpop.eup %6573 }
 0x79e   :  { %980 = vrot.lane.b32.xlu1 %v6574_v51, %s7046_s9  ;;  %v6576_v1 = vpop.eup %6575 }
 0x79f   :  { %982 = vrot.lane.b32.xlu0 %v6576_v1, %s7046_s9  ;;  %v1260_v1 = vrot.slane %v7390_v60, 7 }
 0x80d   :  { %v854_v52 = vpop.permute.xlu0 %853 }
 0x80e   :  { %v856_v3 = vmul.f32 %v6566_v32, %v854_v52 }
 0x810   :  { %v981_v5 = vpop.permute.xlu1 %980  ;;  %989 = vrot.lane.b32.xlu1 %v856_v3, %s7047_s18 }
 0x811   :  { %v986_v6 = vmul.f32 %v6568_v34, %v981_v5  ;;  %v983_v9 = vpop.permute.xlu0 %982 }
 0x812   :  { %v987_v10 = vmul.f32 %v6570_v49, %v983_v9 }
 0x813   :  { %v1065_v12 = vrot.slane %v986_v6, 2 }
 0x814   :  { %v1066_v13 = vrot.slane %v987_v10, 1  ;;  %v1261_v10 = vrot.slane %v7394_v63, 7 }
 0x816   :  { %v1067_v14 = vsel %vm442_vm2, %v1066_v13, %v1065_v12 }
 0x817   :  { %1068 = vrot.lane.b32.xlu0 %v1067_v14, %s7047_s18 }
 0x882   :  { %v990_v16 = vpop.permute.xlu1 %989 }
 0x883   :  { %6015 = vmatmul.mubr.msk.f32.vlgmr.msra.gmra.mxu0 %vm241_vm3, %v990_v16 }
 0x884   :  { %6029 = vmatpush3.msra.mxu0 %v7167_v2  ;;  %6036 = vmatprep.mubr.msk.f32.mxu0 %vm7045_vm0, %v7044_v0 }
 0x885   :  { %6030 = vmatprep.subr.mxu0 %v7044_v0 }
 0x886   :  { %6031 = vmatpush3.msra.mxu0 %v7173_v4 }
 0x887   :  { %6032 = vmatprep.subr.mxu0 %v7044_v0 }
 0x888   :  { %6033 = vmatpush3.msra.mxu0 %v7180_v7 }
 0x889   :  { %6034 = vmatprep.subr.mxu0 %v7044_v0  ;;  %v1069_v17 = vpop.permute.xlu0 %1068 }
 0x88a   :  { %6035 = vmatpush3.msra.mxu0 %v7188_v8  ;;  %6026 = vmatmul.mubr.msk.f32.vlgmr.msra.gmra.mxu1 %vm241_vm3, %v1069_v17 }
 0x88b   :  { %6037 = vmatmul.mubr.msk.f32.vlgmr.msra.gmra.mxu0 %vm241_vm3, %v1069_v17  ;;  %6040 = vmatpush3.msra.mxu1 %v7222_v39 }
 0x88c   :  { %6047 = vmatprep.mubr.msk.f32.mxu1 %vm7045_vm0, %v7044_v0  ;;  %6041 = vmatprep.subr.mxu1 %v7044_v0 }
 0x88d   :  { %6050 = vmatprep.subr.mxu0 %v7044_v0  ;;  %6042 = vmatpush3.msra.mxu1 %v7227_v40 }
 0x88e   :  { %6051 = vmatpush3.msra.mxu0 %v7233_v41  ;;  %6043 = vmatprep.subr.mxu1 %v7044_v0 }
 0x88f   :  { %6052 = vmatprep.subr.mxu0 %v7044_v0  ;;  %6044 = vmatpush3.msra.mxu1 %v7244_v43 }
 0x890   :  { %6053 = vmatpush3.msra.mxu0 %v7238_v42  ;;  %6045 = vmatprep.subr.mxu1 %v7044_v0 }
 0x891   :  { %6054 = vmatprep.subr.mxu0 %v7044_v0  ;;  %6046 = vmatpush3.msra.mxu1 %v7253_v44 }
 0x892   :  { %6055 = vmatpush3.msra.mxu0 %v7259_v45  ;;  %6061 = vmatprep.subr.mxu1 %v7044_v0 }
 0x893   :  { %6056 = vmatprep.subr.mxu0 %v7044_v0  ;;  %6058 = vmatprep.mubr.msk.f32.mxu0 %vm7045_vm0, %v7044_v0 }
 0x894   :  { %6057 = vmatpush3.msra.mxu0 %v7272_v47 }
 0x895   :  { %6072 = vmatprep.subr.mxu0 %v7044_v0 }
 0x943   :  { %v1059_v18 = vpop.f32.mrf.mxu0 }
 0x945   :  { %v6016_v19 = vpop.f32.mrf.mxu0 }
 0x94a   :  { %v1138_v20 = vpop.f32.mrf.mxu1 }
 0x94b   :  { %v1233_v21 = vpop.f32.mrf.mxu0  ;;  %v1139_v22 = vadd.f32 %v1138_v20, %v1059_v18 }
 0x94c   :  { %v1238_v23 = vrot.slane %v1233_v21, 5  ;;  %v1239_v24 = vrot.slane %v1233_v21, 6  ;;  %v6027_v25 = vpop.f32.mrf.mxu1 }
 0x94d   :  { %v6038_v26 = vpop.f32.mrf.mxu0  ;;  %v1142_v27 = vadd.f32 %v7315_v58, %v1139_v22 }
 0x94e   :  { %v1242_v28 = vadd.f32 %v1238_v23, %v7205_v15  ;;  %v1243_v29 = vadd.f32 %v1239_v24, %v7203_v11 }
 0x94f   :  { %6577 = vtanh.f32 %v1142_v27  ;;  %v5585_v33 = vmul.f32 -1.442695, %v1142_v27 }
 0x950   :  { %6579 = vtanh.f32 %v1242_v28  ;;  %v5587_v34 = vmul.f32 -1.442695, %v1242_v28  ;;  %v5588_v36 = vmul.f32 -1.442695, %v1243_v29 }
 0x951   :  { %6581 = vtanh.f32 %v1243_v29 }
 0x952   :  { %6583 = vpow2.f32 %v5585_v33 }
 0x953   :  { %6585 = vpow2.f32 %v5587_v34 }
 0x954   :  { %6587 = vpow2.f32 %v5588_v36 }
 0x95c   :  { %v6578_v30 = vpop.eup %6577 }
 0x95d   :  { %v6580_v31 = vpop.eup %6579  ;;  %1152 = vrot.lane.b32.xlu1 %v6578_v30, %s7046_s9 }
 0x95e   :  { %1268 = vrot.lane.b32.xlu0 %v6580_v31, %s7046_s9  ;;  %v6582_v32 = vpop.eup %6581 }
 0x95f   :  { %v6584_v46 = vpop.eup %6583 }
 0x960   :  { %v6586_v48 = vpop.eup %6585  ;;  %v1146_v49 = vadd.f32 1.0, %v6584_v46 }
 0x961   :  { %1270 = vrot.lane.b32.xlu1 %v6582_v32, %s7046_s9  ;;  %v1250_v50 = vadd.f32 1.0, %v6586_v48  ;;  %v6588_v53 = vpop.eup %6587 }
 0x962   :  { %6589 = vrcp.f32 %v1146_v49  ;;  %v1251_v35 = vadd.f32 1.0, %v6588_v53 }
 0x963   :  { %6591 = vrcp.f32 %v1250_v50 }
 0x964   :  { %6593 = vrcp.f32 %v1251_v35 }
 0x96f   :  { %v6590_v38 = vpop.eup %6589 }
 0x970   :  { %v6592_v55 = vpop.eup %6591  ;;  %v1150_v52 = vmul.f32 %v6590_v38, %v7387_v56 }
 0x971   :  { %v6594_v62 = vpop.eup %6593  ;;  %v1264_v3 = vmul.f32 %v6592_v55, %v1260_v1 }
 0x972   :  { %v1265_v13 = vmul.f32 %v6594_v62, %v1261_v10 }
 0x9cf   :  { %v1153_v54 = vpop.permute.xlu1 %1152 }
 0x9d0   :  { %v1269_v57 = vpop.permute.xlu0 %1268  ;;  %v1155_v59 = vmul.f32 %v6590_v38, %v1153_v54 }
 0x9d1   :  { %v1274_v61 = vmul.f32 %v6592_v55, %v1269_v57 }
 0x9d2   :  { %1157 = vrot.lane.b32.xlu0 %v1155_v59, %s7047_s18 }
 0x9d3   :  { %1278 = vrot.lane.b32.xlu1 %v1274_v61, %s7047_s18  ;;  %v1271_v37 = vpop.permute.xlu1 %1270 }
 0x9d4   :  { %v1275_v51 = vmul.f32 %v6594_v62, %v1271_v37 }
 0x9d6   :  { %1280 = vrot.lane.b32.xlu0 %v1275_v51, %s7047_s18 }
 0xa44   :  { %v1158_v5 = vpop.permute.xlu0 %1157 }
 0xa45   :  { %v1279_v6 = vpop.permute.xlu1 %1278  ;;  %v7447_v9 = vadd.f32 %v1158_v5, %v1150_v52 }
 0xa46   :  { %v7450_v12 = vadd.f32 %v1279_v6, %v1264_v3 }
 0xa47   :  { %6595 = vtanh.f32 %v7447_v9 }
 0xa48   :  { %6597 = vtanh.f32 %v7450_v12  ;;  %v1281_v14 = vpop.permute.xlu0 %1280 }
 0xa49   :  { %v7454_v16 = vadd.f32 %v1281_v14, %v1265_v13  ;;  %v1570_v13 = vrot.slane %v7450_v12, 7 }
 0xa4b   :  { %6599 = vtanh.f32 %v7454_v16 }
 0xa54   :  { %v6596_v56 = vpop.eup %6595 }
 0xa55   :  { %v6598_v60 = vpop.eup %6597  ;;  %1163 = vrot.lane.b32.xlu1 %v6596_v56, %s7046_s9 }
 0xa56   :  { %1290 = vrot.lane.b32.xlu0 %v6598_v60, %s7046_s9 }
 0xa58   :  { %v6600_v17 = vpop.eup %6599 }
 0xa59   :  { %1292 = vrot.lane.b32.xlu1 %v6600_v17, %s7046_s9 }
 0xac7   :  { %v1164_v63 = vpop.permute.xlu1 %1163 }
 0xac8   :  { %v1291_v18 = vpop.permute.xlu0 %1290  ;;  %v1166_v19 = vmul.f32 %v6590_v38, %v1164_v63 }
 0xac9   :  { %v1296_v20 = vmul.f32 %v6592_v55, %v1291_v18  ;;  %v1571_v18 = vrot.slane %v7454_v16, 7 }
 0xaca   :  { %1299 = vrot.lane.b32.xlu0 %v1166_v19, %s7047_s18 }
 0xacb   :  { %v1293_v21 = vpop.permute.xlu1 %1292  ;;  %v1375_v23 = vrot.slane %v1296_v20, 3 }
 0xacc   :  { %v1297_v22 = vmul.f32 %v6594_v62, %v1293_v21 }
 0xace   :  { %v1376_v24 = vrot.slane %v1297_v22, 2 }
 0xad0   :  { %v1377_v25 = vsel %vm442_vm2, %v1376_v24, %v1375_v23 }
 0xad1   :  { %1378 = vrot.lane.b32.xlu1 %v1377_v25, %s7047_s18 }
 0xb3c   :  { %v1300_v26 = vpop.permute.xlu0 %1299 }
 0xb3d   :  { %6048 = vmatmul.mubr.msk.f32.vlgmr.msra.gmra.mxu1 %vm241_vm3, %v1300_v26 }
 0xb3e   :  { %6062 = vmatpush3.msra.mxu1 %v7167_v2  ;;  %6069 = vmatprep.mubr.msk.f32.mxu1 %vm7045_vm0, %v7044_v0 }
 0xb3f   :  { %6063 = vmatprep.subr.mxu1 %v7044_v0 }
 0xb40   :  { %6064 = vmatpush3.msra.mxu1 %v7173_v4 }
 0xb41   :  { %6065 = vmatprep.subr.mxu1 %v7044_v0 }
 0xb42   :  { %6066 = vmatpush3.msra.mxu1 %v7180_v7 }
 0xb43   :  { %6067 = vmatprep.subr.mxu1 %v7044_v0  ;;  %v1379_v27 = vpop.permute.xlu1 %1378 }
 0xb44   :  { %6068 = vmatpush3.msra.mxu1 %v7188_v8  ;;  %6059 = vmatmul.mubr.msk.f32.vlgmr.msra.gmra.mxu0 %vm241_vm3, %v1379_v27 }
 0xb45   :  { %6070 = vmatmul.mubr.msk.f32.vlgmr.msra.gmra.mxu1 %vm241_vm3, %v1379_v27  ;;  %6073 = vmatpush3.msra.mxu0 %v7222_v39 }
 0xb46   :  { %6080 = vmatprep.mubr.msk.f32.mxu0 %vm7045_vm0, %v7044_v0  ;;  %6074 = vmatprep.subr.mxu0 %v7044_v0 }
 0xb47   :  { %6083 = vmatprep.subr.mxu1 %v7044_v0  ;;  %6075 = vmatpush3.msra.mxu0 %v7227_v40 }
 0xb48   :  { %6084 = vmatpush3.msra.mxu1 %v7233_v41  ;;  %6076 = vmatprep.subr.mxu0 %v7044_v0 }
 0xb49   :  { %6085 = vmatprep.subr.mxu1 %v7044_v0  ;;  %6077 = vmatpush3.msra.mxu0 %v7244_v43 }
 0xb4a   :  { %6086 = vmatpush3.msra.mxu1 %v7238_v42  ;;  %6078 = vmatprep.subr.mxu0 %v7044_v0 }
 0xb4b   :  { %6087 = vmatprep.subr.mxu1 %v7044_v0  ;;  %6079 = vmatpush3.msra.mxu0 %v7253_v44 }
 0xb4c   :  { %6088 = vmatpush3.msra.mxu1 %v7259_v45  ;;  %6094 = vmatprep.subr.mxu0 %v7044_v0 }
 0xb4d   :  { %6089 = vmatprep.subr.mxu1 %v7044_v0  ;;  %6091 = vmatprep.mubr.msk.f32.mxu1 %vm7045_vm0, %v7044_v0 }
 0xb4e   :  { %6090 = vmatpush3.msra.mxu1 %v7272_v47 }
 0xb4f   :  { %6105 = vmatprep.subr.mxu1 %v7044_v0 }
 0xbfd   :  { %v1369_v2 = vpop.f32.mrf.mxu1 }
 0xbff   :  { %v6049_v4 = vpop.f32.mrf.mxu1 }
 0xc04   :  { %v1448_v7 = vpop.f32.mrf.mxu0 }
 0xc05   :  { %v1543_v8 = vpop.f32.mrf.mxu1  ;;  %v1449_v28 = vadd.f32 %v1448_v7, %v1369_v2 }
 0xc06   :  { %v1548_v29 = vrot.slane %v1543_v8, 4  ;;  %v1549_v30 = vrot.slane %v1543_v8, 5  ;;  %v6060_v31 = vpop.f32.mrf.mxu0 }
 0xc07   :  { %v6071_v32 = vpop.f32.mrf.mxu1  ;;  %v1452_v33 = vadd.f32 %v7315_v58, %v1449_v28  ;;  %v7543_v31 = vld [vmem:[%s8342_s3 + $0x8] sm:$0xff] }
 0xc08   :  { %v1552_v34 = vadd.f32 %v1548_v29, %v7205_v15  ;;  %v1553_v36 = vadd.f32 %v1549_v30, %v7203_v11  ;;  %v7527_v29 = vld [vmem:[%s8342_s3 + $0x18] sm:$0xff]  ;;  %v7536_v30 = vld [vmem:[%s8342_s3 + $0x10] sm:$0xff] }
 0xc09   :  { %6601 = vtanh.f32 %v1452_v33  ;;  %v5591_v50 = vmul.f32 -1.442695, %v1452_v33  ;;  %v7550_v33 = vld [vmem:[%s8342_s3] sm:$0xff] }
 0xc0a   :  { %6603 = vtanh.f32 %v1552_v34  ;;  %v5593_v53 = vmul.f32 -1.442695, %v1552_v34  ;;  %v5594_v35 = vmul.f32 -1.442695, %v1553_v36 }
 0xc0b   :  { %6605 = vtanh.f32 %v1553_v36 }
 0xc0c   :  { %6607 = vpow2.f32 %v5591_v50 }
 0xc0d   :  { %6609 = vpow2.f32 %v5593_v53 }
 0xc0e   :  { %6611 = vpow2.f32 %v5594_v35 }
 0xc16   :  { %v6602_v46 = vpop.eup %6601 }
 0xc17   :  { %v6604_v48 = vpop.eup %6603  ;;  %1462 = vrot.lane.b32.xlu0 %v6602_v46, %s7046_s9 }
 0xc18   :  { %1578 = vrot.lane.b32.xlu1 %v6604_v48, %s7046_s9  ;;  %v6606_v49 = vpop.eup %6605 }
 0xc19   :  { %v6608_v38 = vpop.eup %6607 }
 0xc1a   :  { %v6610_v54 = vpop.eup %6609  ;;  %v1456_v55 = vadd.f32 1.0, %v6608_v38 }
 0xc1b   :  { %1580 = vrot.lane.b32.xlu0 %v6606_v49, %s7046_s9  ;;  %v1560_v57 = vadd.f32 1.0, %v6610_v54  ;;  %v6612_v59 = vpop.eup %6611 }
 0xc1c   :  { %6613 = vrcp.f32 %v1456_v55  ;;  %v1561_v61 = vadd.f32 1.0, %v6612_v59 }
 0xc1d   :  { %6615 = vrcp.f32 %v1560_v57 }
 0xc1e   :  { %6617 = vrcp.f32 %v1561_v61 }
 0xc29   :  { %v6614_v62 = vpop.eup %6613 }
 0xc2a   :  { %v6616_v51 = vpop.eup %6615  ;;  %v1460_v14 = vmul.f32 %v6614_v62, %v7447_v9 }
 0xc2b   :  { %v6618_v5 = vpop.eup %6617  ;;  %v1574_v60 = vmul.f32 %v6616_v51, %v1570_v13 }
 0xc2c   :  { %v1575_v20 = vmul.f32 %v6618_v5, %v1571_v18 }
 0xc89   :  { %v1463_v37 = vpop.permute.xlu0 %1462 }
 0xc8a   :  { %v1465_v1 = vmul.f32 %v6614_v62, %v1463_v37  ;;  %v1579_v52 = vpop.permute.xlu1 %1578 }
 0xc8b   :  { %v1584_v3 = vmul.f32 %v6616_v51, %v1579_v52 }
 0xc8c   :  { %1467 = vrot.lane.b32.xlu1 %v1465_v1, %s7047_s18 }
 0xc8d   :  { %1588 = vrot.lane.b32.xlu0 %v1584_v3, %s7047_s18  ;;  %v1581_v6 = vpop.permute.xlu0 %1580 }
 0xc8e   :  { %v1585_v10 = vmul.f32 %v6618_v5, %v1581_v6 }
 0xc90   :  { %1590 = vrot.lane.b32.xlu1 %v1585_v10, %s7047_s18 }
 0xcfe   :  { %v1468_v56 = vpop.permute.xlu1 %1467 }
 0xcff   :  { %v7507_v17 = vadd.f32 %v1468_v56, %v1460_v14  ;;  %v1589_v63 = vpop.permute.xlu0 %1588 }
 0xd00   :  { %v7510_v19 = vadd.f32 %v1589_v63, %v1574_v60 }
 0xd01   :  { %6619 = vtanh.f32 %v7507_v17 }
 0xd02   :  { %6621 = vtanh.f32 %v7510_v19  ;;  %v1591_v21 = vpop.permute.xlu1 %1590  ;;  %v1880_v14 = vrot.slane %v7510_v19, 7 }
 0xd03   :  { %v7514_v22 = vadd.f32 %v1591_v21, %v1575_v20 }
 0xd05   :  { %6623 = vtanh.f32 %v7514_v22  ;;  %v1881_v21 = vrot.slane %v7514_v22, 7 }
 0xd0e   :  { %v6620_v9 = vpop.eup %6619 }
 0xd0f   :  { %v6622_v12 = vpop.eup %6621  ;;  %1473 = vrot.lane.b32.xlu0 %v6620_v9, %s7046_s9 }
 0xd10   :  { %1600 = vrot.lane.b32.xlu1 %v6622_v12, %s7046_s9 }
 0xd12   :  { %v6624_v23 = vpop.eup %6623 }
 0xd13   :  { %1602 = vrot.lane.b32.xlu0 %v6624_v23, %s7046_s9 }
 0xd81   :  { %v1474_v16 = vpop.permute.xlu0 %1473 }
 0xd82   :  { %v1476_v24 = vmul.f32 %v6614_v62, %v1474_v16  ;;  %v1601_v25 = vpop.permute.xlu1 %1600 }
 0xd83   :  { %v1606_v26 = vmul.f32 %v6616_v51, %v1601_v25 }
 0xd84   :  { %1609 = vrot.lane.b32.xlu1 %v1476_v24, %s7047_s18 }
 0xd85   :  { %v1603_v27 = vpop.permute.xlu0 %1602  ;;  %v1685_v4 = vrot.slane %v1606_v26, 4 }
 0xd86   :  { %v1607_v2 = vmul.f32 %v6618_v5, %v1603_v27 }
 0xd88   :  { %v1686_v7 = vrot.slane %v1607_v2, 3 }
 0xd8a   :  { %v1687_v8 = vsel %vm442_vm2, %v1686_v7, %v1685_v4 }
 0xd8b   :  { %1688 = vrot.lane.b32.xlu0 %v1687_v8, %s7047_s18 }
 0xdf6   :  { %v1610_v28 = vpop.permute.xlu1 %1609 }
 0xdf7   :  { %6081 = vmatmul.mubr.msk.f32.vlgmr.msra.gmra.mxu0 %vm241_vm3, %v1610_v28 }
 0xdf8   :  { %6095 = vmatpush3.msra.mxu0 %v7527_v29  ;;  %6102 = vmatprep.mubr.msk.f32.mxu0 %vm7045_vm0, %v7044_v0 }
 0xdf9   :  { %6096 = vmatprep.subr.mxu0 %v7044_v0 }
 0xdfa   :  { %6097 = vmatpush3.msra.mxu0 %v7536_v30 }
 0xdfb   :  { %6098 = vmatprep.subr.mxu0 %v7044_v0 }
 0xdfc   :  { %6099 = vmatpush3.msra.mxu0 %v7543_v31 }
 0xdfd   :  { %6100 = vmatprep.subr.mxu0 %v7044_v0  ;;  %v1689_v32 = vpop.permute.xlu0 %1688 }
 0xdfe   :  { %6101 = vmatpush3.msra.mxu0 %v7550_v33  ;;  %6092 = vmatmul.mubr.msk.f32.vlgmr.msra.gmra.mxu1 %vm241_vm3, %v1689_v32 }
 0xdff   :  { %6103 = vmatmul.mubr.msk.f32.vlgmr.msra.gmra.mxu0 %vm241_vm3, %v1689_v32  ;;  %6106 = vmatpush3.msra.mxu1 %v7222_v39 }
 0xe00   :  { %6113 = vmatprep.mubr.msk.f32.mxu1 %vm7045_vm0, %v7044_v0  ;;  %6107 = vmatprep.subr.mxu1 %v7044_v0 }
 0xe01   :  { %6116 = vmatprep.subr.mxu0 %v7044_v0  ;;  %6108 = vmatpush3.msra.mxu1 %v7227_v40 }
 0xe02   :  { %6117 = vmatpush3.msra.mxu0 %v7233_v41  ;;  %6109 = vmatprep.subr.mxu1 %v7044_v0 }
 0xe03   :  { %6118 = vmatprep.subr.mxu0 %v7044_v0  ;;  %6110 = vmatpush3.msra.mxu1 %v7244_v43 }
 0xe04   :  { %6119 = vmatpush3.msra.mxu0 %v7238_v42  ;;  %6111 = vmatprep.subr.mxu1 %v7044_v0 }
 0xe05   :  { %6120 = vmatprep.subr.mxu0 %v7044_v0  ;;  %6112 = vmatpush3.msra.mxu1 %v7253_v44 }
 0xe06   :  { %6121 = vmatpush3.msra.mxu0 %v7259_v45  ;;  %6127 = vmatprep.subr.mxu1 %v7044_v0 }
 0xe07   :  { %6122 = vmatprep.subr.mxu0 %v7044_v0  ;;  %6124 = vmatprep.mubr.msk.f32.mxu0 %vm7045_vm0, %v7044_v0 }
 0xe08   :  { %6123 = vmatpush3.msra.mxu0 %v7272_v47 }
 0xe09   :  { %6138 = vmatprep.subr.mxu0 %v7044_v0 }
 0xeb7   :  { %v1679_v39 = vpop.f32.mrf.mxu0 }
 0xeb9   :  { %v6082_v40 = vpop.f32.mrf.mxu0 }
 0xeba   :  { %v7618_v40 = vld [vmem:[%s8342_s3 + $0x38] sm:$0xff] }
 0xebe   :  { %v1758_v41 = vpop.f32.mrf.mxu1 }
 0xebf   :  { %v1853_v42 = vpop.f32.mrf.mxu0  ;;  %v1759_v43 = vadd.f32 %v1758_v41, %v1679_v39  ;;  %v7628_v41 = vld [vmem:[%s8342_s3 + $0x30] sm:$0xff] }
 0xec0   :  { %v1858_v34 = vrot.slane %v1853_v42, 3  ;;  %v1859_v44 = vrot.slane %v1853_v42, 4  ;;  %v6093_v36 = vpop.f32.mrf.mxu1  ;;  %v7634_v42 = vld [vmem:[%s8341_s2 + $0x18] sm:$0xff] }
 0xec1   :  { %v6104_v45 = vpop.f32.mrf.mxu0  ;;  %v1762_v46 = vadd.f32 %v7315_v58, %v1759_v43  ;;  %v7642_v43 = vld [vmem:[%s8342_s3 + $0x28] sm:$0xff] }
 0xec2   :  { %v1862_v48 = vadd.f32 %v1858_v34, %v7205_v15  ;;  %v1863_v47 = vadd.f32 %v1859_v44, %v7203_v11  ;;  %v7648_v34 = vld [vmem:[%s8341_s2 + $0x10] sm:$0xff]  ;;  %v7656_v44 = vld [vmem:[%s8342_s3 + $0x20] sm:$0xff]  ;;  %v7662_v36 = vld [vmem:[%s8341_s2 + $0x8] sm:$0xff] }
 0xec3   :  { %6625 = vtanh.f32 %v1762_v46  ;;  %v5597_v35 = vmul.f32 -1.442695, %v1762_v46  ;;  %v7670_v45 = vld [vmem:[%s8341_s2] sm:$0xff] }
 0xec4   :  { %6627 = vtanh.f32 %v1862_v48  ;;  %v5599_v38 = vmul.f32 -1.442695, %v1862_v48  ;;  %v5600_v58 = vmul.f32 -1.442695, %v1863_v47 }
 0xec5   :  { %6629 = vtanh.f32 %v1863_v47 }
 0xec6   :  { %6631 = vpow2.f32 %v5597_v35 }
 0xec7   :  { %6633 = vpow2.f32 %v5599_v38 }
 0xec8   :  { %6635 = vpow2.f32 %v5600_v58 }
 0xed0   :  { %v6626_v49 = vpop.eup %6625 }
 0xed1   :  { %v6628_v50 = vpop.eup %6627  ;;  %1772 = vrot.lane.b32.xlu1 %v6626_v49, %s7046_s9 }
 0xed2   :  { %1888 = vrot.lane.b32.xlu0 %v6628_v50, %s7046_s9  ;;  %v6630_v53 = vpop.eup %6629 }
 0xed3   :  { %v6632_v54 = vpop.eup %6631 }
 0xed4   :  { %v6634_v55 = vpop.eup %6633  ;;  %v1766_v57 = vadd.f32 1.0, %v6632_v54  ;;  %v7679_v54 = vld [vmem:[%s8343_s4 + $0x1] ss:$0 sm:$0xff] }
 0xed5   :  { %1890 = vrot.lane.b32.xlu1 %v6630_v53, %s7046_s9  ;;  %v1870_v59 = vadd.f32 1.0, %v6634_v55  ;;  %v6636_v61 = vpop.eup %6635 }
 0xed6   :  { %6637 = vrcp.f32 %v1766_v57  ;;  %v1871_v62 = vadd.f32 1.0, %v6636_v61 }
 0xed7   :  { %6639 = vrcp.f32 %v1870_v59 }
 0xed8   :  { %6641 = vrcp.f32 %v1871_v62 }
 0xee3   :  { %v6638_v37 = vpop.eup %6637 }
 0xee4   :  { %v6640_v1 = vpop.eup %6639  ;;  %v1770_v56 = vmul.f32 %v6638_v37, %v7507_v17 }
 0xee5   :  { %v6642_v6 = vpop.eup %6641  ;;  %v1884_v60 = vmul.f32 %v6640_v1, %v1880_v14 }
 0xee6   :  { %v1885_v12 = vmul.f32 %v6642_v6, %v1881_v21 }
 0xf43   :  { %v1773_v51 = vpop.permute.xlu1 %1772 }
 0xf44   :  { %v1889_v52 = vpop.permute.xlu0 %1888  ;;  %v1775_v3 = vmul.f32 %v6638_v37, %v1773_v51 }
 0xf45   :  { %v1894_v5 = vmul.f32 %v6640_v1, %v1889_v52 }
 0xf46   :  { %1777 = vrot.lane.b32.xlu0 %v1775_v3, %s7047_s18 }
 0xf47   :  { %1898 = vrot.lane.b32.xlu1 %v1894_v5, %s7047_s18  ;;  %v1891_v10 = vpop.permute.xlu1 %1890 }
 0xf48   :  { %v1895_v13 = vmul.f32 %v6642_v6, %v1891_v10 }
 0xf4a   :  { %1900 = vrot.lane.b32.xlu0 %v1895_v13, %s7047_s18 }
 0xfb8   :  { %v1778_v63 = vpop.permute.xlu0 %1777 }
 0xfb9   :  { %v1899_v18 = vpop.permute.xlu1 %1898  ;;  %v7587_v20 = vadd.f32 %v1778_v63, %v1770_v56 }
 0xfba   :  { %v7590_v9 = vadd.f32 %v1899_v18, %v1884_v60 }
 0xfbb   :  { %6643 = vtanh.f32 %v7587_v20 }
 0xfbc   :  { %6645 = vtanh.f32 %v7590_v9  ;;  %v1901_v23 = vpop.permute.xlu0 %1900 }
 0xfbd   :  { %v7594_v16 = vadd.f32 %v1901_v23, %v1885_v12 }
 0xfbf   :  { %6647 = vtanh.f32 %v7594_v16 }
 0xfc8   :  { %v6644_v17 = vpop.eup %6643 }
 0xfc9   :  { %v6646_v19 = vpop.eup %6645  ;;  %1783 = vrot.lane.b32.xlu1 %v6644_v17, %s7046_s9 }
 0xfca   :  { %1910 = vrot.lane.b32.xlu0 %v6646_v19, %s7046_s9 }
 0xfcc   :  { %v6648_v24 = vpop.eup %6647 }
 0xfcd   :  { %1912 = vrot.lane.b32.xlu1 %v6648_v24, %s7046_s9  ;;  %v2190_v24 = vrot.slane %v7590_v9, 7 }
0x103b   :  { %v1784_v22 = vpop.permute.xlu1 %1783 }
0x103c   :  { %v1911_v25 = vpop.permute.xlu0 %1910  ;;  %v1786_v26 = vmul.f32 %v6638_v37, %v1784_v22 }
0x103d   :  { %v1916_v27 = vmul.f32 %v6640_v1, %v1911_v25 }
0x103e   :  { %1919 = vrot.lane.b32.xlu0 %v1786_v26, %s7047_s18 }
0x103f   :  { %v1913_v2 = vpop.permute.xlu1 %1912  ;;  %v1995_v7 = vrot.slane %v1916_v27, 5 }
0x1040   :  { %v1917_v4 = vmul.f32 %v6642_v6, %v1913_v2 }
0x1042   :  { %v1996_v8 = vrot.slane %v1917_v4, 4  ;;  %v2191_v4 = vrot.slane %v7594_v16, 7 }
0x1044   :  { %v1997_v28 = vsel %vm442_vm2, %v1996_v8, %v1995_v7 }
0x1045   :  { %1998 = vrot.lane.b32.xlu1 %v1997_v28, %s7047_s18 }
0x10b0   :  { %v1920_v32 = vpop.permute.xlu0 %1919 }
0x10b1   :  { %6114 = vmatmul.mubr.msk.f32.vlgmr.msra.gmra.mxu1 %vm241_vm3, %v1920_v32 }
0x10b2   :  { %6128 = vmatpush3.msra.mxu1 %v7527_v29  ;;  %6135 = vmatprep.mubr.msk.f32.mxu1 %vm7045_vm0, %v7044_v0 }
0x10b3   :  { %6129 = vmatprep.subr.mxu1 %v7044_v0 }
0x10b4   :  { %6130 = vmatpush3.msra.mxu1 %v7536_v30 }
0x10b5   :  { %6131 = vmatprep.subr.mxu1 %v7044_v0 }
0x10b6   :  { %6132 = vmatpush3.msra.mxu1 %v7543_v31 }
0x10b7   :  { %6133 = vmatprep.subr.mxu1 %v7044_v0  ;;  %v1999_v39 = vpop.permute.xlu1 %1998 }
0x10b8   :  { %6134 = vmatpush3.msra.mxu1 %v7550_v33  ;;  %6125 = vmatmul.mubr.msk.f32.vlgmr.msra.gmra.mxu0 %vm241_vm3, %v1999_v39 }
0x10b9   :  { %6136 = vmatmul.mubr.msk.f32.vlgmr.msra.gmra.mxu1 %vm241_vm3, %v1999_v39  ;;  %6139 = vmatpush3.msra.mxu0 %v7618_v40 }
0x10ba   :  { %6146 = vmatprep.mubr.msk.f32.mxu0 %vm7045_vm0, %v7044_v0  ;;  %6140 = vmatprep.subr.mxu0 %v7044_v0 }
0x10bb   :  { %6149 = vmatprep.subr.mxu1 %v7044_v0  ;;  %6141 = vmatpush3.msra.mxu0 %v7628_v41 }
0x10bc   :  { %6150 = vmatpush3.msra.mxu1 %v7634_v42  ;;  %6142 = vmatprep.subr.mxu0 %v7044_v0 }
0x10bd   :  { %6151 = vmatprep.subr.mxu1 %v7044_v0  ;;  %6143 = vmatpush3.msra.mxu0 %v7642_v43 }
0x10be   :  { %6152 = vmatpush3.msra.mxu1 %v7648_v34  ;;  %6144 = vmatprep.subr.mxu0 %v7044_v0 }
0x10bf   :  { %6153 = vmatprep.subr.mxu1 %v7044_v0  ;;  %6145 = vmatpush3.msra.mxu0 %v7656_v44 }
0x10c0   :  { %6154 = vmatpush3.msra.mxu1 %v7662_v36  ;;  %6160 = vmatprep.subr.mxu0 %v7044_v0 }
0x10c1   :  { %6155 = vmatprep.subr.mxu1 %v7044_v0  ;;  %6157 = vmatprep.mubr.msk.f32.mxu1 %vm7045_vm0, %v7044_v0 }
0x10c2   :  { %6156 = vmatpush3.msra.mxu1 %v7670_v45 }
0x10c3   :  { %6171 = vmatprep.subr.mxu1 %v7044_v0 }
0x1171   :  { %v1989_v46 = vpop.f32.mrf.mxu1 }
0x1173   :  { %v6115_v48 = vpop.f32.mrf.mxu1 }
0x1178   :  { %v2068_v47 = vpop.f32.mrf.mxu0 }
0x1179   :  { %v2163_v49 = vpop.f32.mrf.mxu1  ;;  %v2069_v50 = vadd.f32 %v2068_v47, %v1989_v46 }
0x117a   :  { %v2168_v53 = vrot.slane %v2163_v49, 2  ;;  %v2169_v35 = vrot.slane %v2163_v49, 3  ;;  %v6126_v38 = vpop.f32.mrf.mxu0 }
0x117b   :  { %v6137_v58 = vpop.f32.mrf.mxu1  ;;  %v2072_v55 = vadd.f32 %v7679_v54, %v2069_v50 }
0x117c   :  { %v2172_v57 = vadd.f32 %v2168_v53, %v7205_v15  ;;  %v2173_v59 = vadd.f32 %v2169_v35, %v7203_v11 }
0x117d   :  { %6649 = vtanh.f32 %v2072_v55  ;;  %v5603_v51 = vmul.f32 -1.442695, %v2072_v55 }
0x117e   :  { %6651 = vtanh.f32 %v2172_v57  ;;  %v5605_v1 = vmul.f32 -1.442695, %v2172_v57  ;;  %v5606_v52 = vmul.f32 -1.442695, %v2173_v59 }
0x117f   :  { %6653 = vtanh.f32 %v2173_v59 }
0x1180   :  { %6655 = vpow2.f32 %v5603_v51 }
0x1181   :  { %6657 = vpow2.f32 %v5605_v1 }
0x1182   :  { %6659 = vpow2.f32 %v5606_v52 }
0x118a   :  { %v6650_v61 = vpop.eup %6649 }
0x118b   :  { %v6652_v62 = vpop.eup %6651  ;;  %2082 = vrot.lane.b32.xlu0 %v6650_v61, %s7046_s9 }
0x118c   :  { %2198 = vrot.lane.b32.xlu1 %v6652_v62, %s7046_s9  ;;  %v6654_v37 = vpop.eup %6653 }
0x118d   :  { %v6656_v3 = vpop.eup %6655 }
0x118e   :  { %v6658_v5 = vpop.eup %6657  ;;  %v2076_v6 = vadd.f32 1.0, %v6656_v3 }
0x118f   :  { %2200 = vrot.lane.b32.xlu0 %v6654_v37, %s7046_s9  ;;  %v2180_v10 = vadd.f32 1.0, %v6658_v5  ;;  %v6660_v13 = vpop.eup %6659 }
0x1190   :  { %6661 = vrcp.f32 %v2076_v6  ;;  %v2181_v14 = vadd.f32 1.0, %v6660_v13 }
0x1191   :  { %6663 = vrcp.f32 %v2180_v10 }
0x1192   :  { %6665 = vrcp.f32 %v2181_v14 }
0x119d   :  { %v6662_v56 = vpop.eup %6661 }
0x119e   :  { %v6664_v63 = vpop.eup %6663  ;;  %v2080_v22 = vmul.f32 %v6662_v56, %v7587_v20 }
0x119f   :  { %v6666_v23 = vpop.eup %6665  ;;  %v2194_v26 = vmul.f32 %v6664_v63, %v2190_v24 }
0x11a0   :  { %v2195_v8 = vmul.f32 %v6666_v23, %v2191_v4 }
0x11fd   :  { %v2083_v60 = vpop.permute.xlu0 %2082 }
0x11fe   :  { %v2085_v18 = vmul.f32 %v6662_v56, %v2083_v60  ;;  %v2199_v21 = vpop.permute.xlu1 %2198 }
0x11ff   :  { %v2204_v12 = vmul.f32 %v6664_v63, %v2199_v21 }
0x1200   :  { %2087 = vrot.lane.b32.xlu1 %v2085_v18, %s7047_s18 }
0x1201   :  { %2208 = vrot.lane.b32.xlu0 %v2204_v12, %s7047_s18  ;;  %v2201_v17 = vpop.permute.xlu0 %2200 }
0x1202   :  { %v2205_v19 = vmul.f32 %v6666_v23, %v2201_v17 }
0x1204   :  { %2210 = vrot.lane.b32.xlu1 %v2205_v19, %s7047_s18 }
0x1272   :  { %v2088_v25 = vpop.permute.xlu1 %2087 }
0x1273   :  { %v7692_v27 = vadd.f32 %v2088_v25, %v2080_v22  ;;  %v2209_v2 = vpop.permute.xlu0 %2208 }
0x1274   :  { %v7695_v7 = vadd.f32 %v2209_v2, %v2194_v26 }
0x1275   :  { %6667 = vtanh.f32 %v7692_v27 }
0x1276   :  { %6669 = vtanh.f32 %v7695_v7  ;;  %v2211_v28 = vpop.permute.xlu1 %2210  ;;  %v2500_v12 = vrot.slane %v7695_v7, 7 }
0x1277   :  { %v7699_v32 = vadd.f32 %v2211_v28, %v2195_v8 }
0x1279   :  { %6671 = vtanh.f32 %v7699_v32  ;;  %v2501_v19 = vrot.slane %v7699_v32, 7 }
0x1282   :  { %v6668_v20 = vpop.eup %6667 }
0x1283   :  { %v6670_v9 = vpop.eup %6669  ;;  %2093 = vrot.lane.b32.xlu0 %v6668_v20, %s7046_s9 }
0x1284   :  { %2220 = vrot.lane.b32.xlu1 %v6670_v9, %s7046_s9 }
0x1286   :  { %v6672_v39 = vpop.eup %6671 }
0x1287   :  { %2222 = vrot.lane.b32.xlu0 %v6672_v39, %s7046_s9 }
0x12f5   :  { %v2094_v16 = vpop.permute.xlu0 %2093 }
0x12f6   :  { %v2096_v46 = vmul.f32 %v6662_v56, %v2094_v16  ;;  %v2221_v48 = vpop.permute.xlu1 %2220 }
0x12f7   :  { %v2226_v47 = vmul.f32 %v6664_v63, %v2221_v48 }
0x12f8   :  { %2229 = vrot.lane.b32.xlu1 %v2096_v46, %s7047_s18 }
0x12f9   :  { %v2223_v49 = vpop.permute.xlu0 %2222  ;;  %v2305_v53 = vrot.slane %v2226_v47, 6 }
0x12fa   :  { %v2227_v50 = vmul.f32 %v6666_v23, %v2223_v49 }
0x12fc   :  { %v2306_v35 = vrot.slane %v2227_v50, 5 }
0x12fe   :  { %v2307_v38 = vsel %vm442_vm2, %v2306_v35, %v2305_v53 }
0x12ff   :  { %2308 = vrot.lane.b32.xlu0 %v2307_v38, %s7047_s18 }
0x136a   :  { %v2230_v58 = vpop.permute.xlu1 %2229 }
0x136b   :  { %6147 = vmatmul.mubr.msk.f32.vlgmr.msra.gmra.mxu0 %vm241_vm3, %v2230_v58 }
0x136c   :  { %6161 = vmatpush3.msra.mxu0 %v7527_v29  ;;  %6168 = vmatprep.mubr.msk.f32.mxu0 %vm7045_vm0, %v7044_v0 }
0x136d   :  { %6162 = vmatprep.subr.mxu0 %v7044_v0 }
0x136e   :  { %6163 = vmatpush3.msra.mxu0 %v7536_v30 }
0x136f   :  { %6164 = vmatprep.subr.mxu0 %v7044_v0 }
0x1370   :  { %6165 = vmatpush3.msra.mxu0 %v7543_v31 }
0x1371   :  { %6166 = vmatprep.subr.mxu0 %v7044_v0  ;;  %v2309_v55 = vpop.permute.xlu0 %2308 }
0x1372   :  { %6167 = vmatpush3.msra.mxu0 %v7550_v33  ;;  %6158 = vmatmul.mubr.msk.f32.vlgmr.msra.gmra.mxu1 %vm241_vm3, %v2309_v55 }
0x1373   :  { %6169 = vmatmul.mubr.msk.f32.vlgmr.msra.gmra.mxu0 %vm241_vm3, %v2309_v55  ;;  %6182 = vmatprep.subr.mxu0 %v7044_v0 }
0x1374   :  { %6172 = vmatpush3.msra.mxu1 %v7618_v40  ;;  %6183 = vmatpush3.msra.mxu0 %v7634_v42 }
0x1375   :  { %6173 = vmatprep.subr.mxu1 %v7044_v0  ;;  %6184 = vmatprep.subr.mxu0 %v7044_v0 }
0x1376   :  { %6174 = vmatpush3.msra.mxu1 %v7628_v41  ;;  %6185 = vmatpush3.msra.mxu0 %v7648_v34 }
0x1377   :  { %6175 = vmatprep.subr.mxu1 %v7044_v0  ;;  %6186 = vmatprep.subr.mxu0 %v7044_v0 }
0x1378   :  { %6176 = vmatpush3.msra.mxu1 %v7642_v43  ;;  %6187 = vmatpush3.msra.mxu0 %v7662_v36 }
0x1379   :  { %6177 = vmatprep.subr.mxu1 %v7044_v0  ;;  %6188 = vmatprep.subr.mxu0 %v7044_v0 }
0x137a   :  { %6190 = vmatprep.mubr.msk.f32.mxu0 %vm7045_vm0, %v7044_v0  ;;  %6189 = vmatpush3.msra.mxu0 %v7670_v45 }
0x137b   :  { %6178 = vmatpush3.msra.mxu1 %v7656_v44  ;;  %6179 = vmatprep.mubr.msk.f32.mxu1 %vm7045_vm0, %v7044_v0 }
0x137c   :  { %6193 = vmatprep.subr.mxu1 %v7044_v0  ;;  %6204 = vmatprep.subr.mxu0 %v7044_v0 }
0x142b   :  { %v2299_v29 = vpop.f32.mrf.mxu0 }
0x142d   :  { %v6148_v30 = vpop.f32.mrf.mxu0 }
0x1432   :  { %v2378_v31 = vpop.f32.mrf.mxu1 }
0x1433   :  { %v2473_v33 = vpop.f32.mrf.mxu0  ;;  %v2379_v40 = vadd.f32 %v2378_v31, %v2299_v29 }
0x1434   :  { %v2478_v41 = vrot.slane %v2473_v33, 1  ;;  %v2479_v42 = vrot.slane %v2473_v33, 2  ;;  %v6159_v43 = vpop.f32.mrf.mxu1 }
0x1435   :  { %v6170_v34 = vpop.f32.mrf.mxu0  ;;  %v2382_v44 = vadd.f32 %v7679_v54, %v2379_v40 }
0x1436   :  { %v2482_v36 = vadd.f32 %v2478_v41, %v7205_v15  ;;  %v2483_v45 = vadd.f32 %v2479_v42, %v7203_v11 }
0x1437   :  { %v5609_v37 = vmul.f32 -1.442695, %v2382_v44 }
0x1438   :  { %6673 = vtanh.f32 %v2482_v36  ;;  %v5611_v62 = vmul.f32 -1.442695, %v2482_v36  ;;  %v5612_v15 = vmul.f32 -1.442695, %v2483_v45 }
0x1439   :  { %6675 = vtanh.f32 %v2382_v44 }
0x143a   :  { %6677 = vtanh.f32 %v2483_v45 }
0x143b   :  { %6679 = vpow2.f32 %v5611_v62  ;;  %v2718_v62 = vld [vmem:[%s8347_s8 + $0x8] sm:$0xff] }
0x143c   :  { %6681 = vpow2.f32 %v5609_v37  ;;  %v2817_v37 = vld [vmem:[#allocation7 + $0x8] sm:$0xff] }
0x143d   :  { %6683 = vpow2.f32 %v5612_v15  ;;  %v2717_v15 = vld [vmem:[%s8347_s8] sm:$0xff] }
0x1445   :  { %v6674_v57 = vpop.eup %6673 }
0x1446   :  { %2508 = vrot.lane.b32.xlu1 %v6674_v57, %s7046_s9  ;;  %v6676_v59 = vpop.eup %6675  ;;  %v2819_v57 = vld [vmem:[#allocation7 + $0x18] sm:$0xff] }
0x1447   :  { %v6678_v61 = vpop.eup %6677 }
0x1448   :  { %2510 = vrot.lane.b32.xlu0 %v6678_v61, %s7046_s9  ;;  %v6680_v51 = vpop.eup %6679  ;;  %v2818_v61 = vld [vmem:[#allocation7 + $0x10] sm:$0xff] }
0x1449   :  { %v6682_v11 = vpop.eup %6681  ;;  %v2490_v1 = vadd.f32 1.0, %v6680_v51  ;;  %v2816_v51 = vld [vmem:[#allocation7] sm:$0xff] }
0x144a   :  { %2392 = vrot.lane.b32.xlu1 %v6676_v59, %s7046_s9  ;;  %v6684_v52 = vpop.eup %6683  ;;  %v2386_v3 = vadd.f32 1.0, %v6682_v11  ;;  %v2719_v59 = vld [vmem:[%s8347_s8 + $0x10] sm:$0xff] }
0x144b   :  { %v2491_v5 = vadd.f32 1.0, %v6684_v52  ;;  %6685 = vrcp.f32 %v2490_v1 }
0x144c   :  { %6687 = vrcp.f32 %v2386_v3  ;;  %v7790_v3 = vld [vmem:[#allocation8 + $0x18] sm:$0xff] }
0x144d   :  { %6689 = vrcp.f32 %v2491_v5 }
0x1458   :  { %v6686_v6 = vpop.eup %6685 }
0x1459   :  { %v6688_v14 = vpop.eup %6687  ;;  %v2504_v23 = vmul.f32 %v6686_v6, %v2500_v12 }
0x145a   :  { %v6690_v56 = vpop.eup %6689  ;;  %v2390_v25 = vmul.f32 %v6688_v14, %v7692_v27 }
0x145b   :  { %v2505_v22 = vmul.f32 %v6690_v56, %v2501_v19 }
0x14b8   :  { %v2509_v10 = vpop.permute.xlu1 %2508 }
0x14b9   :  { %v2514_v13 = vmul.f32 %v6686_v6, %v2509_v10  ;;  %v7800_v10 = vld [vmem:[#allocation8 + $0x8] sm:$0xff] }
0x14ba   :  { %v2511_v60 = vpop.permute.xlu0 %2510 }
0x14bb   :  { %2518 = vrot.lane.b32.xlu0 %v2514_v13, %s7047_s18  ;;  %v2515_v18 = vmul.f32 %v6690_v56, %v2511_v60  ;;  %v7806_v13 = vld [vmem:[#allocation8] sm:$0xff] }
0x14bc   :  { %v2393_v63 = vpop.permute.xlu1 %2392 }
0x14bd   :  { %v2395_v21 = vmul.f32 %v6688_v14, %v2393_v63  ;;  %2520 = vrot.lane.b32.xlu1 %v2515_v18, %s7047_s18  ;;  %v5618_v18 = vld [vmem:[#allocation10] ss:$0 sm:$0xff] }
0x14bf   :  { %2397 = vrot.lane.b32.xlu0 %v2395_v21, %s7047_s18 }
0x152d   :  { %v2519_v17 = vpop.permute.xlu0 %2518 }
0x152e   :  { %v2524_v24 = vadd.f32 %v2519_v17, %v2504_v23 }
0x152f   :  { %v2521_v26 = vpop.permute.xlu1 %2520 }
0x1530   :  { %6691 = vtanh.f32 %v2524_v24  ;;  %v2525_v4 = vadd.f32 %v2521_v26, %v2505_v22 }
0x1531   :  { %v2398_v2 = vpop.permute.xlu0 %2397 }
0x1532   :  { %v2400_v8 = vadd.f32 %v2398_v2, %v2390_v25  ;;  %6693 = vtanh.f32 %v2525_v4 }
0x1534   :  { %6695 = vtanh.f32 %v2400_v8 }
0x153d   :  { %v6692_v28 = vpop.eup %6691 }
0x153e   :  { %2530 = vrot.lane.b32.xlu1 %v6692_v28, %s7046_s9 }
0x153f   :  { %v6694_v20 = vpop.eup %6693 }
0x1540   :  { %2532 = vrot.lane.b32.xlu0 %v6694_v20, %s7046_s9 }
0x1541   :  { %v6696_v7 = vpop.eup %6695 }
0x1542   :  { %2403 = vrot.lane.b32.xlu1 %v6696_v7, %s7046_s9  ;;  %v7825_v7 = vld [vmem:[#allocation8 + $0x38] sm:$0xff] }
0x15b0   :  { %v2531_v32 = vpop.permute.xlu1 %2530 }
0x15b1   :  { %v2536_v9 = vmul.f32 %v6686_v6, %v2531_v32  ;;  %v7794_v6 = vld [vmem:[#allocation8 + $0x10] sm:$0xff] }
0x15b2   :  { %v2533_v39 = vpop.permute.xlu0 %2532  ;;  %v7827_v32 = vld [vmem:[#allocation8 + $0x30] sm:$0xff] }
0x15b3   :  { %v2615_v16 = vrot.slane %v2536_v9, 7  ;;  %v2537_v27 = vmul.f32 %v6690_v56, %v2533_v39  ;;  %v7830_v9 = vld [vmem:[#allocation7 + $0x38] sm:$0xff]  ;;  %v7832_v39 = vld [vmem:[#allocation7 + $0x30] sm:$0xff] }
0x15b4   :  { %v2404_v46 = vpop.permute.xlu1 %2403 }
0x15b5   :  { %v2406_v48 = vmul.f32 %v6688_v14, %v2404_v46  ;;  %v2616_v47 = vrot.slane %v2537_v27, 6  ;;  %v7840_v27 = vld [vmem:[#allocation7 + $0x28] sm:$0xff]  ;;  %v7843_v46 = vld [vmem:[#allocation8 + $0x20] sm:$0xff] }
0x15b7   :  { %2539 = vrot.lane.b32.xlu0 %v2406_v48, %s7047_s18  ;;  %v2617_v49 = vsel %vm442_vm2, %v2616_v47, %v2615_v16  ;;  %v7835_v16 = vld [vmem:[#allocation8 + $0x28] sm:$0xff]  ;;  %v7850_v48 = vld [vmem:[#allocation7 + $0x20] sm:$0xff] }
0x15b8   :  { %2618 = vrot.lane.b32.xlu1 %v2617_v49, %s7047_s18 }
0x1629   :  { %v2540_v50 = vpop.permute.xlu0 %2539 }
0x162a   :  { %6180 = vmatmul.mubr.msk.f32.vlgmr.msra.gmra.mxu1 %vm241_vm3, %v2540_v50  ;;  %v2619_v53 = vpop.permute.xlu1 %2618 }
0x162b   :  { %6201 = vmatprep.mubr.msk.f32.mxu1 %vm7045_vm0, %v7044_v0  ;;  %6191 = vmatmul.mubr.msk.f32.vlgmr.msra.gmra.mxu0 %vm241_vm3, %v2619_v53 }
0x162c   :  { %6212 = vmatprep.mubr.msk.f32.mxu0 %vm7045_vm0, %v7044_v0  ;;  %6205 = vmatpush3.msra.mxu0 %v2819_v57 }
0x162d   :  { %6206 = vmatprep.subr.mxu0 %v7044_v0 }
0x162e   :  { %6207 = vmatpush3.msra.mxu0 %v2818_v61 }
0x162f   :  { %6208 = vmatprep.subr.mxu0 %v7044_v0 }
0x1630   :  { %6209 = vmatpush3.msra.mxu0 %v2817_v37 }
0x1631   :  { %6210 = vmatprep.subr.mxu0 %v7044_v0 }
0x1632   :  { %6211 = vmatpush3.msra.mxu0 %v2816_v51 }
0x1633   :  { %6226 = vmatprep.subr.mxu0 %v7044_v0 }
0x16ea   :  { %v2609_v35 = vpop.f32.mrf.mxu1 }
0x16eb   :  { %v2688_v38 = vpop.f32.mrf.mxu0 }
0x16ec   :  { %v6181_v58 = vpop.f32.mrf.mxu1  ;;  %v2689_v55 = vadd.f32 %v2688_v38, %v2609_v35 }
0x16ed   :  { %v6192_v29 = vpop.f32.mrf.mxu0  ;;  %v7892_v58 = vld [vmem:[#allocation10 + $0x1] ss:$0 sm:$0xff] }
0x16ee   :  { %v2692_v30 = vadd.f32 %v7679_v54, %v2689_v55  ;;  %v2720_v54 = vld [vmem:[%s8347_s8 + $0x18] sm:$0xff] }
0x16ef   :  { %6194 = vmatpush3.msra.mxu1 %v2720_v54 }
0x16f0   :  { %6697 = vtanh.f32 %v2692_v30  ;;  %v5615_v33 = vmul.f32 -1.442695, %v2692_v30  ;;  %6195 = vmatprep.subr.mxu1 %v7044_v0 }
0x16f1   :  { %6196 = vmatpush3.msra.mxu1 %v2719_v59 }
0x16f2   :  { %6699 = vpow2.f32 %v5615_v33  ;;  %6197 = vmatprep.subr.mxu1 %v7044_v0 }
0x16f3   :  { %6198 = vmatpush3.msra.mxu1 %v2718_v62 }
0x16f4   :  { %6199 = vmatprep.subr.mxu1 %v7044_v0 }
0x16f5   :  { %6200 = vmatpush3.msra.mxu1 %v2717_v15 }
0x16f6   :  { %6215 = vmatprep.subr.mxu1 %v7044_v0 }
0x16fd   :  { %v6698_v31 = vpop.eup %6697 }
0x16fe   :  { %2702 = vrot.lane.b32.xlu0 %v6698_v31, %s7046_s9 }
0x16ff   :  { %v6700_v40 = vpop.eup %6699 }
0x1700   :  { %v2696_v41 = vadd.f32 1.0, %v6700_v40 }
0x1702   :  { %6701 = vrcp.f32 %v2696_v41 }
0x170f   :  { %v6702_v42 = vpop.eup %6701 }
0x1710   :  { %v2700_v36 = vmul.f32 %v6702_v42, %v2400_v8 }
0x1770   :  { %v2703_v43 = vpop.permute.xlu0 %2702 }
0x1771   :  { %v2705_v34 = vmul.f32 %v6702_v42, %v2703_v43 }
0x1773   :  { %2707 = vrot.lane.b32.xlu1 %v2705_v34, %s7047_s18 }
0x17e5   :  { %v2708_v44 = vpop.permute.xlu1 %2707 }
0x17e6   :  { %v2710_v45 = vadd.f32 %v2708_v44, %v2700_v36 }
0x17e8   :  { %6703 = vtanh.f32 %v2710_v45 }
0x17f5   :  { %v6704_v11 = vpop.eup %6703 }
0x17f6   :  { %2713 = vrot.lane.b32.xlu0 %v6704_v11, %s7046_s9 }
0x1868   :  { %v2714_v1 = vpop.permute.xlu0 %2713 }
0x1869   :  { %v2716_v52 = vmul.f32 %v6702_v42, %v2714_v1 }
0x186b   :  { %2729 = vrot.lane.b32.xlu1 %v2716_v52, %s7047_s18 }
0x18dd   :  { %v2730_v5 = vpop.permute.xlu1 %2729 }
0x18de   :  { %6202 = vmatmul.mubr.msk.f32.vlgmr.msra.gmra.mxu1 %vm241_vm3, %v2730_v5  ;;  %6213 = vmatmul.mubr.msk.f32.vlgmr.msra.gmra.mxu0 %vm241_vm3, %v2730_v5 }
0x18df   :  { %6216 = vmatpush3.msra.mxu1 %v7790_v3  ;;  %6223 = vmatprep.mubr.msk.f32.mxu1 %vm7045_vm0, %v7044_v0 }
0x18e0   :  { %6217 = vmatprep.subr.mxu1 %v7044_v0  ;;  %6234 = vmatprep.mubr.msk.f32.mxu0 %vm7045_vm0, %v7044_v0 }
0x18e1   :  { %6218 = vmatpush3.msra.mxu1 %v7794_v6  ;;  %6227 = vmatpush3.msra.mxu0 %v7825_v7 }
0x18e2   :  { %6219 = vmatprep.subr.mxu1 %v7044_v0  ;;  %6228 = vmatprep.subr.mxu0 %v7044_v0 }
0x18e3   :  { %6220 = vmatpush3.msra.mxu1 %v7800_v10  ;;  %6229 = vmatpush3.msra.mxu0 %v7827_v32 }
0x18e4   :  { %6221 = vmatprep.subr.mxu1 %v7044_v0  ;;  %6230 = vmatprep.subr.mxu0 %v7044_v0 }
0x18e5   :  { %6222 = vmatpush3.msra.mxu1 %v7806_v13  ;;  %6231 = vmatpush3.msra.mxu0 %v7835_v16 }
0x18e6   :  { %6224 = vmatmul.mubr.f32.vlgmr.msra.gmra.mxu1 %v7044_v0  ;;  %6237 = vmatprep.subr.mxu1 %v7044_v0 }
0x18e7   :  { %6245 = vmatprep.mubr.msk.f32.mxu1 %vm7045_vm0, %v7044_v0  ;;  %6238 = vmatpush3.msra.mxu1 %v7830_v9 }
0x18e8   :  { %6239 = vmatprep.subr.mxu1 %v7044_v0  ;;  %6232 = vmatprep.subr.mxu0 %v7044_v0 }
0x18e9   :  { %6240 = vmatpush3.msra.mxu1 %v7832_v39  ;;  %6233 = vmatpush3.msra.mxu0 %v7843_v46 }
0x18ea   :  { %6241 = vmatprep.subr.mxu1 %v7044_v0  ;;  %6248 = vmatprep.subr.mxu0 %v7044_v0 }
0x18eb   :  { %6242 = vmatpush3.msra.mxu1 %v7840_v27  ;;  %6235 = vmatmul.mubr.f32.vlgmr.msra.gmra.mxu0 %v7044_v0 }
0x18ec   :  { %6243 = vmatprep.subr.mxu1 %v7044_v0  ;;  %6249 = vmatpush3.msra.mxu0 %v7790_v3 }
0x18ed   :  { %6244 = vmatpush3.msra.mxu1 %v7850_v48  ;;  %6250 = vmatprep.subr.mxu0 %v7044_v0 }
0x18ee   :  { %6256 = vmatprep.mubr.msk.f32.mxu0 %vm7045_vm0, %v7044_v0  ;;  %6251 = vmatpush3.msra.mxu0 %v7794_v6 }
0x18ef   :  { %6252 = vmatprep.subr.mxu0 %v7044_v0  ;;  %6259 = vmatprep.subr.mxu1 %v7044_v0 }
0x18f0   :  { %6253 = vmatpush3.msra.mxu0 %v7800_v10 }
0x18f1   :  { %6254 = vmatprep.subr.mxu0 %v7044_v0 }
0x18f2   :  { %6255 = vmatpush3.msra.mxu0 %v7806_v13 }
0x18f3   :  { %6270 = vmatprep.subr.mxu0 %v7044_v0 }
0x199e   :  { %v7815_v14 = vpop.f32.mrf.mxu1  ;;  %v2906_v56 = vpop.f32.mrf.mxu0 }
0x199f   :  { %v7817_v21 = vadd.f32 %v5618_v18, %v2906_v56 }
0x19a0   :  { %v6203_v60 = vpop.f32.mrf.mxu1  ;;  %v6214_v63 = vpop.f32.mrf.mxu0 }
0x19a6   :  { %v2976_v12 = vpop.f32.mrf.mxu1 }
0x19a7   :  { %v2980_v23 = vadd.f32 %v2976_v12, %v7817_v21 }
0x19a8   :  { %v6225_v17 = vpop.f32.mrf.mxu1 }
0x19a9   :  { %6705 = vtanh.f32 %v2980_v23  ;;  %v5620_v24 = vmul.f32 -1.442695, %v2980_v23 }
0x19ab   :  { %6707 = vpow2.f32 %v5620_v24  ;;  %v3071_v53 = vpop.f32.mrf.mxu0 }
0x19ad   :  { %v6236_v35 = vpop.f32.mrf.mxu0 }
0x19b6   :  { %v6706_v19 = vpop.eup %6705 }
0x19b7   :  { %2990 = vrot.lane.b32.xlu0 %v6706_v19, %s7046_s9 }
0x19b8   :  { %v6708_v22 = vpop.eup %6707 }
0x19b9   :  { %v2984_v25 = vadd.f32 1.0, %v6708_v22 }
0x19bb   :  { %6709 = vrcp.f32 %v2984_v25 }
0x19c8   :  { %v6710_v26 = vpop.eup %6709 }
0x19c9   :  { %v2988_v8 = vmul.f32 0.0, %v6710_v26 }
0x1a29   :  { %v2991_v2 = vpop.permute.xlu0 %2990 }
0x1a2a   :  { %v2993_v4 = vmul.f32 %v6710_v26, %v2991_v2 }
0x1a2c   :  { %2995 = vrot.lane.b32.xlu1 %v2993_v4, %s7047_s18 }
0x1a9e   :  { %v2996_v28 = vpop.permute.xlu1 %2995 }
0x1a9f   :  { %v7822_v20 = vadd.f32 %v2996_v28, %v2988_v8 }
0x1aa1   :  { %6711 = vtanh.f32 %v7822_v20 }
0x1aae   :  { %v6712_v47 = vpop.eup %6711 }
0x1aaf   :  { %3001 = vrot.lane.b32.xlu0 %v6712_v47, %s7046_s9 }
0x1b21   :  { %v3002_v49 = vpop.permute.xlu0 %3001 }
0x1b22   :  { %v3004_v50 = vmul.f32 %v6710_v26, %v3002_v49 }
0x1b24   :  { %3076 = vrot.lane.b32.xlu1 %v3004_v50, %s7047_s18 }
0x1b96   :  { %v3077_v38 = vpop.permute.xlu1 %3076 }
0x1b97   :  { %6246 = vmatmul.mubr.msk.f32.vlgmr.msra.gmra.mxu1 %vm241_vm3, %v3077_v38  ;;  %6257 = vmatmul.mubr.msk.f32.vlgmr.msra.gmra.mxu0 %vm241_vm3, %v3077_v38 }
0x1b98   :  { %6271 = vmatpush3.msra.mxu0 %v7830_v9  ;;  %6260 = vmatpush3.msra.mxu1 %v7825_v7 }
0x1b99   :  { %6272 = vmatprep.subr.mxu0 %v7044_v0  ;;  %6261 = vmatprep.subr.mxu1 %v7044_v0 }
0x1b9a   :  { %6273 = vmatpush3.msra.mxu0 %v7832_v39  ;;  %6262 = vmatpush3.msra.mxu1 %v7827_v32 }
0x1b9b   :  { %6274 = vmatprep.subr.mxu0 %v7044_v0  ;;  %6263 = vmatprep.subr.mxu1 %v7044_v0 }
0x1b9c   :  { %6275 = vmatpush3.msra.mxu0 %v7840_v27  ;;  %6264 = vmatpush3.msra.mxu1 %v7835_v16 }
0x1b9d   :  { %6276 = vmatprep.subr.mxu0 %v7044_v0  ;;  %6278 = vmatprep.mubr.msk.f32.mxu0 %vm7045_vm0, %v7044_v0 }
0x1b9e   :  { %6277 = vmatpush3.msra.mxu0 %v7850_v48  ;;  %6265 = vmatprep.subr.mxu1 %v7044_v0 }
0x1b9f   :  { %6266 = vmatpush3.msra.mxu1 %v7843_v46  ;;  %6267 = vmatprep.mubr.msk.f32.mxu1 %vm7045_vm0, %v7044_v0 }
0x1ba0   :  { %6281 = vmatprep.subr.mxu1 %v7044_v0  ;;  %6292 = vmatprep.subr.mxu0 %v7044_v0 }
0x1c57   :  { %v3146_v55 = vpop.f32.mrf.mxu1  ;;  %v3247_v29 = vpop.f32.mrf.mxu0 }
0x1c58   :  { %v3147_v30 = vadd.f32 %v3146_v55, %v3071_v53  ;;  %v3251_v31 = vadd.f32 %v3247_v29, %v7817_v21 }
0x1c59   :  { %v6247_v33 = vpop.f32.mrf.mxu1  ;;  %v6258_v40 = vpop.f32.mrf.mxu0 }
0x1c5a   :  { %v3156_v41 = vadd.f32 %v7892_v58, %v3147_v30  ;;  %6713 = vtanh.f32 %v3251_v31  ;;  %v5625_v34 = vmul.f32 -1.442695, %v3251_v31 }
0x1c5c   :  { %6715 = vtanh.f32 %v3156_v41  ;;  %v5623_v36 = vmul.f32 -1.442695, %v3156_v41 }
0x1c5d   :  { %6717 = vpow2.f32 %v5625_v34 }
0x1c5e   :  { %6719 = vpow2.f32 %v5623_v36 }
0x1c67   :  { %v6714_v42 = vpop.eup %6713 }
0x1c68   :  { %3261 = vrot.lane.b32.xlu1 %v6714_v42, %s7046_s9 }
0x1c69   :  { %v6716_v43 = vpop.eup %6715 }
0x1c6a   :  { %3166 = vrot.lane.b32.xlu0 %v6716_v43, %s7046_s9  ;;  %v6718_v44 = vpop.eup %6717 }
0x1c6b   :  { %v6720_v45 = vpop.eup %6719  ;;  %v3255_v54 = vadd.f32 1.0, %v6718_v44 }
0x1c6c   :  { %v3160_v57 = vadd.f32 1.0, %v6720_v45 }
0x1c6d   :  { %6721 = vrcp.f32 %v3255_v54 }
0x1c6e   :  { %6723 = vrcp.f32 %v3160_v57 }
0x1c7a   :  { %v6722_v59 = vpop.eup %6721 }
0x1c7b   :  { %v6724_v37 = vpop.eup %6723  ;;  %v3259_v11 = vmul.f32 %v6722_v59, %v7822_v20 }
0x1c7c   :  { %v3164_v5 = vmul.f32 0.0, %v6724_v37 }
0x1cda   :  { %v3262_v61 = vpop.permute.xlu1 %3261 }
0x1cdb   :  { %v3264_v62 = vmul.f32 %v6722_v59, %v3262_v61 }
0x1cdc   :  { %v3167_v15 = vpop.permute.xlu0 %3166 }
0x1cdd   :  { %v3169_v51 = vmul.f32 %v6724_v37, %v3167_v15  ;;  %3266 = vrot.lane.b32.xlu1 %v3264_v62, %s7047_s18 }
0x1cdf   :  { %3171 = vrot.lane.b32.xlu0 %v3169_v51, %s7047_s18  ;;  %v5074_v51 = vlaneseq }
0x1d4f   :  { %v3267_v1 = vpop.permute.xlu1 %3266 }
0x1d50   :  { %v7901_v52 = vadd.f32 %v3267_v1, %v3259_v11  ;;  %v7963_v1 = vshrl.u32 %v5074_v51, 7 }
0x1d51   :  { %v3172_v56 = vpop.permute.xlu0 %3171 }
0x1d52   :  { %6725 = vtanh.f32 %v7901_v52  ;;  %v7904_v60 = vadd.f32 %v3172_v56, %v3164_v5 }
0x1d54   :  { %6727 = vtanh.f32 %v7904_v60 }
0x1d5f   :  { %v6726_v63 = vpop.eup %6725 }
0x1d60   :  { %3272 = vrot.lane.b32.xlu1 %v6726_v63, %s7046_s9  ;;  %v7971_v63 = vsub.s32 0, %v7963_v1 }
0x1d61   :  { %v6728_v18 = vpop.eup %6727 }
0x1d62   :  { %3177 = vrot.lane.b32.xlu0 %v6728_v18, %s7046_s9 }
0x1dd2   :  { %v3273_v12 = vpop.permute.xlu1 %3272 }
0x1dd3   :  { %v3275_v23 = vmul.f32 %v6722_v59, %v3273_v12 }
0x1dd4   :  { %v3178_v17 = vpop.permute.xlu0 %3177 }
0x1dd5   :  { %v7909_v19 = vmul.f32 %v6724_v37, %v3178_v17  ;;  %3352 = vrot.lane.b32.xlu1 %v3275_v23, %s7047_s18  ;;  %v7048_v37 = vmov 1966171168  }
0x1dd6   :  { %v5072_v15 = vunpack.c.l.s4 %v7048_v37 }
0x1dd7   :  { %3277 = vrot.lane.b32.xlu0 %v7909_v19, %s7047_s18 }
0x1dd8   :  { %v5073_v11 = vunpack.c.0.s8 %v5072_v15 }
0x1dda   :  { %v7966_v5 = vsub.s32 %v5073_v11, %v7963_v1 }
0x1ddc   :  { %v5077_v56 = vrot.slane %v7909_v19, %v7966_v5 }
0x1dde   :  { %v5078_v12 = vcombine.high %v5077_v56, %v5077_v56 }
0x1e47   :  { %v3353_v24 = vpop.permute.xlu1 %3352 }
0x1e48   :  { %6279 = vmatmul.mubr.msk.f32.vlgmr.msra.gmra.mxu0 %vm241_vm3, %v3353_v24 }
0x1e49   :  { %v3278_v22 = vpop.permute.xlu0 %3277  ;;  %6293 = vmatpush3.msra.mxu0 %v7825_v7  ;;  %6300 = vmatprep.mubr.msk.f32.mxu0 %vm7045_vm0, %v7044_v0 }
0x1e4a   :  { %6268 = vmatmul.mubr.msk.f32.vlgmr.msra.gmra.mxu1 %vm241_vm3, %v3278_v22  ;;  %6294 = vmatprep.subr.mxu0 %v7044_v0  ;;  %v5085_v22 = vrot.slane %v5077_v56, %v7966_v5 }
0x1e4b   :  { %6282 = vmatpush3.msra.mxu1 %v7790_v3  ;;  %6289 = vmatprep.mubr.msk.f32.mxu1 %vm7045_vm0, %v7044_v0 }
0x1e4c   :  { %6283 = vmatprep.subr.mxu1 %v7044_v0  ;;  %6295 = vmatpush3.msra.mxu0 %v7827_v32 }
0x1e4d   :  { %6284 = vmatpush3.msra.mxu1 %v7794_v6  ;;  %6296 = vmatprep.subr.mxu0 %v7044_v0 }
0x1e4e   :  { %6285 = vmatprep.subr.mxu1 %v7044_v0  ;;  %6297 = vmatpush3.msra.mxu0 %v7835_v16 }
0x1e4f   :  { %6286 = vmatpush3.msra.mxu1 %v7800_v10  ;;  %6298 = vmatprep.subr.mxu0 %v7044_v0 }
0x1e50   :  { %6287 = vmatprep.subr.mxu1 %v7044_v0  ;;  %6299 = vmatpush3.msra.mxu0 %v7843_v46 }
0x1e51   :  { %6288 = vmatpush3.msra.mxu1 %v7806_v13  ;;  %6314 = vmatprep.subr.mxu0 %v7044_v0 }
0x1e52   :  { %6290 = vmatmul.mubr.msk.f32.vlgmr.msra.gmra.mxu1 %vm241_vm3, %v3353_v24  ;;  %6303 = vmatprep.subr.mxu1 %v7044_v0 }
0x1e53   :  { %6304 = vmatpush3.msra.mxu1 %v7830_v9  ;;  %6311 = vmatprep.mubr.msk.f32.mxu1 %vm7045_vm0, %v7044_v0 }
0x1e54   :  { %6305 = vmatprep.subr.mxu1 %v7044_v0 }
0x1e55   :  { %6306 = vmatpush3.msra.mxu1 %v7832_v39 }
0x1e56   :  { %6307 = vmatprep.subr.mxu1 %v7044_v0 }
0x1e57   :  { %6308 = vmatpush3.msra.mxu1 %v7840_v27 }
0x1e58   :  { %6309 = vmatprep.subr.mxu1 %v7044_v0 }
0x1e59   :  { %6310 = vmatpush3.msra.mxu1 %v7850_v48 }
0x1e5a   :  { %6325 = vmatprep.subr.mxu1 %v7044_v0 }
0x1f08   :  { %v3422_v25 = vpop.f32.mrf.mxu0 }
0x1f0a   :  { %v3347_v26 = vpop.f32.mrf.mxu1  ;;  %v6280_v2 = vpop.f32.mrf.mxu0 }
0x1f0b   :  { %v3423_v4 = vadd.f32 %v3422_v25, %v3347_v26  ;;  %v5092_v2 = vrot.slane %v5078_v12, %v7966_v5 }
0x1f0c   :  { %v6269_v8 = vpop.f32.mrf.mxu1 }
0x1f0d   :  { %v3426_v28 = vadd.f32 %v7892_v58, %v3423_v4 }
0x1f0f   :  { %6729 = vtanh.f32 %v3426_v28  ;;  %v5628_v35 = vmul.f32 -1.442695, %v3426_v28 }
0x1f12   :  { %v3517_v20 = vpop.f32.mrf.mxu1 }
0x1f13   :  { %v3521_v47 = vadd.f32 %v3517_v20, %v7817_v21 }
0x1f14   :  { %v6291_v49 = vpop.f32.mrf.mxu1 }
0x1f15   :  { %6731 = vtanh.f32 %v3521_v47  ;;  %v5630_v38 = vmul.f32 -1.442695, %v3521_v47 }
0x1f16   :  { %6733 = vpow2.f32 %v5628_v35 }
0x1f17   :  { %6735 = vpow2.f32 %v5630_v38 }
0x1f1c   :  { %v6730_v50 = vpop.eup %6729 }
0x1f1d   :  { %3436 = vrot.lane.b32.xlu0 %v6730_v50, %s7046_s9 }
0x1f22   :  { %v6732_v53 = vpop.eup %6731 }
0x1f23   :  { %3531 = vrot.lane.b32.xlu1 %v6732_v53, %s7046_s9  ;;  %v6734_v55 = vpop.eup %6733 }
0x1f24   :  { %v3430_v29 = vadd.f32 1.0, %v6734_v55  ;;  %v6736_v30 = vpop.eup %6735 }
0x1f25   :  { %v3525_v31 = vadd.f32 1.0, %v6736_v30 }
0x1f26   :  { %6737 = vrcp.f32 %v3430_v29 }
0x1f27   :  { %6739 = vrcp.f32 %v3525_v31 }
0x1f33   :  { %v6738_v33 = vpop.eup %6737 }
0x1f34   :  { %v6740_v42 = vpop.eup %6739  ;;  %v3434_v36 = vmul.f32 %v6738_v33, %v7904_v60 }
0x1f35   :  { %v3529_v54 = vmul.f32 %v6740_v42, %v7901_v52 }
0x1f8f   :  { %v3437_v40 = vpop.permute.xlu0 %3436 }
0x1f90   :  { %v3439_v41 = vmul.f32 %v6738_v33, %v3437_v40 }
0x1f92   :  { %3441 = vrot.lane.b32.xlu0 %v3439_v41, %s7047_s18 }
0x1f95   :  { %v3532_v43 = vpop.permute.xlu1 %3531 }
0x1f96   :  { %v3534_v34 = vmul.f32 %v6740_v42, %v3532_v43 }
0x1f98   :  { %3536 = vrot.lane.b32.xlu1 %v3534_v34, %s7047_s18 }
0x2004   :  { %v3442_v44 = vpop.permute.xlu0 %3441 }
0x2005   :  { %v7954_v45 = vadd.f32 %v3442_v44, %v3434_v36 }
0x2007   :  { %6741 = vtanh.f32 %v7954_v45 }
0x200a   :  { %v3537_v57 = vpop.permute.xlu1 %3536 }
0x200b   :  { %v7958_v59 = vadd.f32 %v3537_v57, %v3529_v54 }
0x200d   :  { %6743 = vtanh.f32 %v7958_v59 }
0x2014   :  { %v6742_v61 = vpop.eup %6741 }
0x2015   :  { %3447 = vrot.lane.b32.xlu0 %v6742_v61, %s7046_s9 }
0x201a   :  { %v6744_v62 = vpop.eup %6743 }
0x201b   :  { %3542 = vrot.lane.b32.xlu1 %v6744_v62, %s7046_s9 }
0x2087   :  { %v3448_v52 = vpop.permute.xlu0 %3447 }
0x2088   :  { %v3450_v60 = vmul.f32 %v6738_v33, %v3448_v52 }
0x208a   :  { %v5101_v18 = vrot.slane %v3450_v60, %v7966_v5  ;;  %3547 = vrot.lane.b32.xlu0 %v3450_v60, %s7047_s18 }
0x208c   :  { %v5102_v23 = vcombine.high %v5101_v18, %v5101_v18  ;;  %v5109_v17 = vrot.slane %v5101_v18, %v7966_v5 }
0x208d   :  { %v3543_v24 = vpop.permute.xlu1 %3542 }
0x208e   :  { %v5116_v25 = vrot.slane %v5102_v23, %v7966_v5  ;;  %v5253_v19 = vrot.slane %v5109_v17, %v7971_v63  ;;  %v3545_v26 = vmul.f32 %v6740_v42, %v3543_v24 }
0x2090   :  { %v5257_v4 = vrot.slane %v5116_v25, %v7971_v63  ;;  %v7981_v8 = vsel %vm5320_vm4, %v5085_v22, %v5253_v19  ;;  %3622 = vrot.lane.b32.xlu1 %v3545_v26, %s7047_s18 }
0x2092   :  { %v7984_v28 = vsel %vm5320_vm4, %v5092_v2, %v5257_v4 }
0x20fc   :  { %v3548_v20 = vpop.permute.xlu0 %3547 }
0x20fd   :  { %6301 = vmatmul.mubr.msk.f32.vlgmr.msra.gmra.mxu0 %vm241_vm3, %v3548_v20 }
0x20fe   :  { %6315 = vmatpush3.msra.mxu0 %v7790_v3  ;;  %6322 = vmatprep.mubr.msk.f32.mxu0 %vm7045_vm0, %v7044_v0 }
0x20ff   :  { %6316 = vmatprep.subr.mxu0 %v7044_v0 }
0x2100   :  { %6317 = vmatpush3.msra.mxu0 %v7794_v6 }
0x2101   :  { %6318 = vmatprep.subr.mxu0 %v7044_v0 }
0x2102   :  { %6319 = vmatpush3.msra.mxu0 %v7800_v10  ;;  %v3623_v47 = vpop.permute.xlu1 %3622 }
0x2103   :  { %6312 = vmatmul.mubr.msk.f32.vlgmr.msra.gmra.mxu1 %vm241_vm3, %v3623_v47  ;;  %6320 = vmatprep.subr.mxu0 %v7044_v0 }
0x2104   :  { %6321 = vmatpush3.msra.mxu0 %v7806_v13  ;;  %6326 = vmatpush3.msra.mxu1 %v7825_v7 }
0x2105   :  { %6323 = vmatmul.mubr.msk.f32.vlgmr.msra.gmra.mxu0 %vm241_vm3, %v3623_v47  ;;  %6336 = vmatprep.subr.mxu0 %v7044_v0 }
0x2106   :  { %6327 = vmatprep.subr.mxu1 %v7044_v0  ;;  %6337 = vmatpush3.msra.mxu0 %v7830_v9 }
0x2107   :  { %6328 = vmatpush3.msra.mxu1 %v7827_v32  ;;  %6338 = vmatprep.subr.mxu0 %v7044_v0 }
0x2108   :  { %6329 = vmatprep.subr.mxu1 %v7044_v0  ;;  %6339 = vmatpush3.msra.mxu0 %v7832_v39 }
0x2109   :  { %6330 = vmatpush3.msra.mxu1 %v7835_v16  ;;  %6340 = vmatprep.subr.mxu0 %v7044_v0 }
0x210a   :  { %6331 = vmatprep.subr.mxu1 %v7044_v0  ;;  %6341 = vmatpush3.msra.mxu0 %v7840_v27 }
0x210b   :  { %6332 = vmatpush3.msra.mxu1 %v7843_v46  ;;  %6342 = vmatprep.subr.mxu0 %v7044_v0 }
0x210c   :  { %6343 = vmatpush3.msra.mxu0 %v7850_v48  ;;  %6344 = vmatprep.mubr.msk.f32.mxu0 %vm7045_vm0, %v7044_v0 }
0x210d   :  { %6333 = vmatprep.mubr.msk.f32.mxu1 %vm7045_vm0, %v7044_v0  ;;  %6347 = vmatprep.subr.mxu1 %v7044_v0 }
0x210e   :  { %6358 = vmatprep.subr.mxu0 %v7044_v0 }
0x21bd   :  { %v3617_v49 = vpop.f32.mrf.mxu0 }
0x21bf   :  { %v6302_v50 = vpop.f32.mrf.mxu0 }
0x21c3   :  { %v3692_v53 = vpop.f32.mrf.mxu1 }
0x21c4   :  { %v3693_v35 = vadd.f32 %v3692_v53, %v3617_v49 }
0x21c5   :  { %v6313_v38 = vpop.f32.mrf.mxu1  ;;  %v3787_v55 = vpop.f32.mrf.mxu0 }
0x21c6   :  { %v3696_v29 = vadd.f32 %v7892_v58, %v3693_v35  ;;  %v3791_v30 = vadd.f32 %v3787_v55, %v7817_v21 }
0x21c7   :  { %v6324_v31 = vpop.f32.mrf.mxu0 }
0x21c8   :  { %6745 = vtanh.f32 %v3696_v29  ;;  %v5633_v41 = vmul.f32 -1.442695, %v3696_v29  ;;  %v5635_v42 = vmul.f32 -1.442695, %v3791_v30 }
0x21c9   :  { %6747 = vtanh.f32 %v3791_v30 }
0x21ca   :  { %6749 = vpow2.f32 %v5633_v41 }
0x21cb   :  { %6751 = vpow2.f32 %v5635_v42 }
0x21d5   :  { %v6746_v33 = vpop.eup %6745 }
0x21d6   :  { %v6748_v40 = vpop.eup %6747  ;;  %3706 = vrot.lane.b32.xlu0 %v6746_v33, %s7046_s9 }
0x21d7   :  { %3801 = vrot.lane.b32.xlu1 %v6748_v40, %s7046_s9  ;;  %v6750_v43 = vpop.eup %6749 }
0x21d8   :  { %v6752_v34 = vpop.eup %6751  ;;  %v3700_v36 = vadd.f32 1.0, %v6750_v43 }
0x21d9   :  { %v3795_v44 = vadd.f32 1.0, %v6752_v34 }
0x21da   :  { %6753 = vrcp.f32 %v3700_v36 }
0x21db   :  { %6755 = vrcp.f32 %v3795_v44 }
0x21e7   :  { %v6754_v54 = vpop.eup %6753 }
0x21e8   :  { %v6756_v61 = vpop.eup %6755  ;;  %v3704_v51 = vmul.f32 %v6754_v54, %v7954_v45 }
0x21e9   :  { %v3799_v11 = vmul.f32 %v6756_v61, %v7958_v59 }
0x2248   :  { %v3707_v57 = vpop.permute.xlu0 %3706 }
0x2249   :  { %v3802_v62 = vpop.permute.xlu1 %3801  ;;  %v3709_v37 = vmul.f32 %v6754_v54, %v3707_v57 }
0x224a   :  { %v3804_v15 = vmul.f32 %v6756_v61, %v3802_v62 }
0x224b   :  { %3711 = vrot.lane.b32.xlu0 %v3709_v37, %s7047_s18 }
0x224c   :  { %3806 = vrot.lane.b32.xlu1 %v3804_v15, %s7047_s18 }
0x22bd   :  { %v3712_v52 = vpop.permute.xlu0 %3711 }
0x22be   :  { %v3807_v56 = vpop.permute.xlu1 %3806  ;;  %v8027_v60 = vadd.f32 %v3712_v52, %v3704_v51 }
0x22bf   :  { %v8029_v18 = vadd.f32 %v3807_v56, %v3799_v11 }
0x22c0   :  { %6757 = vtanh.f32 %v8027_v60 }
0x22c1   :  { %6759 = vtanh.f32 %v8029_v18 }
0x22cd   :  { %v6758_v12 = vpop.eup %6757 }
0x22ce   :  { %v6760_v23 = vpop.eup %6759  ;;  %3717 = vrot.lane.b32.xlu0 %v6758_v12, %s7046_s9 }
0x22cf   :  { %3812 = vrot.lane.b32.xlu1 %v6760_v23, %s7046_s9 }
0x2340   :  { %v3718_v17 = vpop.permute.xlu0 %3717 }
0x2341   :  { %v3813_v45 = vpop.permute.xlu1 %3812  ;;  %v3720_v24 = vmul.f32 %v6754_v54, %v3718_v17 }
0x2342   :  { %v3815_v59 = vmul.f32 %v6756_v61, %v3813_v45 }
0x2343   :  { %v5123_v22 = vrot.slane %v3720_v24, %v7966_v5  ;;  %3817 = vrot.lane.b32.xlu0 %v3720_v24, %s7047_s18 }
0x2344   :  { %3892 = vrot.lane.b32.xlu1 %v3815_v59, %s7047_s18 }
0x2345   :  { %v5124_v25 = vcombine.high %v5123_v22, %v5123_v22  ;;  %v5131_v19 = vrot.slane %v5123_v22, %v7966_v5 }
0x2347   :  { %v5138_v26 = vrot.slane %v5124_v25, %v7966_v5  ;;  %v5263_v2 = vrot.slane %v5131_v19, %v7971_v63 }
0x2349   :  { %v5267_v4 = vrot.slane %v5138_v26, %v7971_v63  ;;  %v8043_v20 = vsel %vm5323_vm5, %v7981_v8, %v5263_v2 }
0x234b   :  { %v8046_v47 = vsel %vm5323_vm5, %v7984_v28, %v5267_v4 }
0x23b5   :  { %v3818_v49 = vpop.permute.xlu0 %3817 }
0x23b6   :  { %v3893_v50 = vpop.permute.xlu1 %3892  ;;  %6334 = vmatmul.mubr.msk.f32.vlgmr.msra.gmra.mxu1 %vm241_vm3, %v3818_v49 }
0x23b7   :  { %6345 = vmatmul.mubr.msk.f32.vlgmr.msra.gmra.mxu0 %vm241_vm3, %v3893_v50  ;;  %6348 = vmatpush3.msra.mxu1 %v7790_v3 }
0x23b8   :  { %6349 = vmatprep.subr.mxu1 %v7044_v0  ;;  %6355 = vmatprep.mubr.msk.f32.mxu1 %vm7045_vm0, %v7044_v0 }
0x23b9   :  { %6350 = vmatpush3.msra.mxu1 %v7794_v6  ;;  %6359 = vmatpush3.msra.mxu0 %v7825_v7 }
0x23ba   :  { %6351 = vmatprep.subr.mxu1 %v7044_v0  ;;  %6360 = vmatprep.subr.mxu0 %v7044_v0 }
0x23bb   :  { %6352 = vmatpush3.msra.mxu1 %v7800_v10  ;;  %6361 = vmatpush3.msra.mxu0 %v7827_v32 }
0x23bc   :  { %6353 = vmatprep.subr.mxu1 %v7044_v0  ;;  %6362 = vmatprep.subr.mxu0 %v7044_v0 }
0x23bd   :  { %6354 = vmatpush3.msra.mxu1 %v7806_v13  ;;  %6363 = vmatpush3.msra.mxu0 %v7835_v16 }
0x23be   :  { %6356 = vmatmul.mubr.msk.f32.vlgmr.msra.gmra.mxu1 %vm241_vm3, %v3893_v50  ;;  %6364 = vmatprep.subr.mxu0 %v7044_v0 }
0x23bf   :  { %6369 = vmatprep.subr.mxu1 %v7044_v0  ;;  %6365 = vmatpush3.msra.mxu0 %v7843_v46 }
0x23c0   :  { %6370 = vmatpush3.msra.mxu1 %v7830_v9  ;;  %6366 = vmatprep.mubr.msk.f32.mxu0 %vm7045_vm0, %v7044_v0 }
0x23c1   :  { %6371 = vmatprep.subr.mxu1 %v7044_v0  ;;  %6380 = vmatprep.subr.mxu0 %v7044_v0 }
0x23c2   :  { %6372 = vmatpush3.msra.mxu1 %v7832_v39  ;;  %6377 = vmatprep.mubr.msk.f32.mxu1 %vm7045_vm0, %v7044_v0 }
0x23c3   :  { %6373 = vmatprep.subr.mxu1 %v7044_v0 }
0x23c4   :  { %6374 = vmatpush3.msra.mxu1 %v7840_v27 }
0x23c5   :  { %6375 = vmatprep.subr.mxu1 %v7044_v0 }
0x23c6   :  { %6376 = vmatpush3.msra.mxu1 %v7850_v48 }
0x23c7   :  { %6391 = vmatprep.subr.mxu1 %v7044_v0 }
0x2476   :  { %v3887_v8 = vpop.f32.mrf.mxu1 }
0x2477   :  { %v3962_v28 = vpop.f32.mrf.mxu0 }
0x2478   :  { %v3963_v53 = vadd.f32 %v3962_v28, %v3887_v8  ;;  %v6335_v35 = vpop.f32.mrf.mxu1 }
0x2479   :  { %v6346_v38 = vpop.f32.mrf.mxu0 }
0x247a   :  { %v3966_v55 = vadd.f32 %v7892_v58, %v3963_v53 }
0x247c   :  { %6761 = vtanh.f32 %v3966_v55  ;;  %v5638_v41 = vmul.f32 -1.442695, %v3966_v55 }
0x247e   :  { %v4057_v29 = vpop.f32.mrf.mxu1 }
0x247f   :  { %v4061_v30 = vadd.f32 %v4057_v29, %v7817_v21 }
0x2480   :  { %v6357_v31 = vpop.f32.mrf.mxu1 }
0x2481   :  { %6763 = vtanh.f32 %v4061_v30  ;;  %v5640_v42 = vmul.f32 -1.442695, %v4061_v30 }
0x2482   :  { %6765 = vpow2.f32 %v5638_v41 }
0x2483   :  { %6767 = vpow2.f32 %v5640_v42 }
0x2489   :  { %v6762_v33 = vpop.eup %6761 }
0x248a   :  { %3976 = vrot.lane.b32.xlu0 %v6762_v33, %s7046_s9 }
0x248e   :  { %v6764_v40 = vpop.eup %6763 }
0x248f   :  { %4071 = vrot.lane.b32.xlu1 %v6764_v40, %s7046_s9  ;;  %v6766_v43 = vpop.eup %6765 }
0x2490   :  { %v3970_v34 = vadd.f32 1.0, %v6766_v43  ;;  %v6768_v36 = vpop.eup %6767 }
0x2491   :  { %v4065_v44 = vadd.f32 1.0, %v6768_v36 }
0x2492   :  { %6769 = vrcp.f32 %v3970_v34 }
0x2493   :  { %6771 = vrcp.f32 %v4065_v44 }
0x249f   :  { %v6770_v54 = vpop.eup %6769 }
0x24a0   :  { %v6772_v62 = vpop.eup %6771  ;;  %v3974_v51 = vmul.f32 %v6770_v54, %v8027_v60 }
0x24a1   :  { %v4069_v56 = vmul.f32 %v6772_v62, %v8029_v18 }
0x24fc   :  { %v3977_v57 = vpop.permute.xlu0 %3976 }
0x24fd   :  { %v3979_v61 = vmul.f32 %v6770_v54, %v3977_v57 }
0x24ff   :  { %3981 = vrot.lane.b32.xlu0 %v3979_v61, %s7047_s18 }
0x2501   :  { %v4072_v37 = vpop.permute.xlu1 %4071 }
0x2502   :  { %v4074_v15 = vmul.f32 %v6772_v62, %v4072_v37 }
0x2504   :  { %4076 = vrot.lane.b32.xlu1 %v4074_v15, %s7047_s18 }
0x2571   :  { %v3982_v11 = vpop.permute.xlu0 %3981 }
0x2572   :  { %v8088_v52 = vadd.f32 %v3982_v11, %v3974_v51 }
0x2574   :  { %6773 = vtanh.f32 %v8088_v52 }
0x2576   :  { %v4077_v12 = vpop.permute.xlu1 %4076 }
0x2577   :  { %v8092_v23 = vadd.f32 %v4077_v12, %v4069_v56 }
0x2579   :  { %6775 = vtanh.f32 %v8092_v23 }
0x2581   :  { %v6774_v17 = vpop.eup %6773 }
0x2582   :  { %3987 = vrot.lane.b32.xlu0 %v6774_v17, %s7046_s9 }
0x2586   :  { %v6776_v45 = vpop.eup %6775 }
0x2587   :  { %4082 = vrot.lane.b32.xlu1 %v6776_v45, %s7046_s9 }
0x25f4   :  { %v3988_v24 = vpop.permute.xlu0 %3987 }
0x25f5   :  { %v3990_v60 = vmul.f32 %v6770_v54, %v3988_v24 }
0x25f7   :  { %v5145_v59 = vrot.slane %v3990_v60, %v7966_v5  ;;  %4087 = vrot.lane.b32.xlu0 %v3990_v60, %s7047_s18 }
0x25f9   :  { %v5146_v22 = vcombine.high %v5145_v59, %v5145_v59  ;;  %v5153_v18 = vrot.slane %v5145_v59, %v7966_v5  ;;  %v4083_v25 = vpop.permute.xlu1 %4082 }
0x25fa   :  { %v4085_v19 = vmul.f32 %v6772_v62, %v4083_v25 }
0x25fb   :  { %v5160_v26 = vrot.slane %v5146_v22, %v7966_v5  ;;  %v5273_v2 = vrot.slane %v5153_v18, %v7971_v63 }
0x25fc   :  { %4162 = vrot.lane.b32.xlu1 %v4085_v19, %s7047_s18 }
0x25fd   :  { %v5277_v4 = vrot.slane %v5160_v26, %v7971_v63  ;;  %v8105_v49 = vsel %vm5326_vm6, %v8043_v20, %v5273_v2 }
0x25ff   :  { %v8108_v50 = vsel %vm5326_vm6, %v8046_v47, %v5277_v4  ;;  %v8174_v4 = vld [vmem:[#allocation8 + $0x18] sm:$0xff] }
0x2669   :  { %v4088_v8 = vpop.permute.xlu0 %4087 }
0x266a   :  { %6367 = vmatmul.mubr.msk.f32.vlgmr.msra.gmra.mxu0 %vm241_vm3, %v4088_v8  ;;  %v8192_v8 = vld [vmem:[#allocation8] sm:$0xff] }
0x266b   :  { %6381 = vmatpush3.msra.mxu0 %v7790_v3  ;;  %6388 = vmatprep.mubr.msk.f32.mxu0 %vm7045_vm0, %v7044_v0 }
0x266c   :  { %6382 = vmatprep.subr.mxu0 %v7044_v0 }
0x266d   :  { %6383 = vmatpush3.msra.mxu0 %v7794_v6 }
0x266e   :  { %6384 = vmatprep.subr.mxu0 %v7044_v0  ;;  %v4163_v28 = vpop.permute.xlu1 %4162 }
0x266f   :  { %6385 = vmatpush3.msra.mxu0 %v7800_v10  ;;  %6378 = vmatmul.mubr.msk.f32.vlgmr.msra.gmra.mxu1 %vm241_vm3, %v4163_v28 }
0x2670   :  { %6386 = vmatprep.subr.mxu0 %v7044_v0  ;;  %6392 = vmatpush3.msra.mxu1 %v7825_v7 }
0x2671   :  { %6387 = vmatpush3.msra.mxu0 %v7806_v13  ;;  %6393 = vmatprep.subr.mxu1 %v7044_v0 }
0x2672   :  { %6389 = vmatmul.mubr.msk.f32.vlgmr.msra.gmra.mxu0 %vm241_vm3, %v4163_v28  ;;  %6402 = vmatprep.subr.mxu0 %v7044_v0 }
0x2673   :  { %6403 = vmatpush3.msra.mxu0 %v7830_v9  ;;  %6394 = vmatpush3.msra.mxu1 %v7827_v32 }
0x2674   :  { %6404 = vmatprep.subr.mxu0 %v7044_v0  ;;  %6395 = vmatprep.subr.mxu1 %v7044_v0 }
0x2675   :  { %6405 = vmatpush3.msra.mxu0 %v7832_v39  ;;  %6396 = vmatpush3.msra.mxu1 %v7835_v16 }
0x2676   :  { %6406 = vmatprep.subr.mxu0 %v7044_v0  ;;  %6397 = vmatprep.subr.mxu1 %v7044_v0 }
0x2677   :  { %6407 = vmatpush3.msra.mxu0 %v7840_v27  ;;  %6398 = vmatpush3.msra.mxu1 %v7843_v46 }
0x2678   :  { %6408 = vmatprep.subr.mxu0 %v7044_v0  ;;  %6410 = vmatprep.mubr.msk.f32.mxu0 %vm7045_vm0, %v7044_v0 }
0x2679   :  { %6409 = vmatpush3.msra.mxu0 %v7850_v48  ;;  %6399 = vmatprep.mubr.msk.f32.mxu1 %vm7045_vm0, %v7044_v0 }
0x267a   :  { %6413 = vmatprep.subr.mxu1 %v7044_v0  ;;  %6424 = vmatprep.subr.mxu0 %v7044_v0 }
0x272a   :  { %v4157_v3 = vpop.f32.mrf.mxu0 }
0x272c   :  { %v6368_v6 = vpop.f32.mrf.mxu0 }
0x272f   :  { %v4232_v10 = vpop.f32.mrf.mxu1 }
0x2730   :  { %v4233_v13 = vadd.f32 %v4232_v10, %v4157_v3 }
0x2731   :  { %v6379_v39 = vpop.f32.mrf.mxu1 }
0x2732   :  { %v4236_v20 = vadd.f32 %v7892_v58, %v4233_v13  ;;  %v4327_v47 = vpop.f32.mrf.mxu0 }
0x2733   :  { %v4331_v53 = vadd.f32 %v4327_v47, %v7817_v21 }
0x2734   :  { %6777 = vtanh.f32 %v4236_v20  ;;  %v6390_v35 = vpop.f32.mrf.mxu0  ;;  %v5643_v29 = vmul.f32 -1.442695, %v4236_v20 }
0x2735   :  { %6779 = vtanh.f32 %v4331_v53  ;;  %v5645_v30 = vmul.f32 -1.442695, %v4331_v53 }
0x2736   :  { %6781 = vpow2.f32 %v5643_v29 }
0x2737   :  { %6783 = vpow2.f32 %v5645_v30 }
0x2741   :  { %v6778_v38 = vpop.eup %6777 }
0x2742   :  { %v6780_v55 = vpop.eup %6779  ;;  %4246 = vrot.lane.b32.xlu0 %v6778_v38, %s7046_s9 }
0x2743   :  { %4341 = vrot.lane.b32.xlu1 %v6780_v55, %s7046_s9  ;;  %v6782_v31 = vpop.eup %6781 }
0x2744   :  { %v6784_v33 = vpop.eup %6783  ;;  %v4240_v40 = vadd.f32 1.0, %v6782_v31 }
0x2745   :  { %v4335_v41 = vadd.f32 1.0, %v6784_v33 }
0x2746   :  { %6785 = vrcp.f32 %v4240_v40 }
0x2747   :  { %6787 = vrcp.f32 %v4335_v41 }
0x2753   :  { %v6786_v42 = vpop.eup %6785 }
0x2754   :  { %v6788_v34 = vpop.eup %6787  ;;  %v4244_v57 = vmul.f32 %v6786_v42, %v8088_v52 }
0x2755   :  { %v4339_v61 = vmul.f32 %v6788_v34, %v8092_v23 }
0x27b4   :  { %v4247_v43 = vpop.permute.xlu0 %4246 }
0x27b5   :  { %v4342_v36 = vpop.permute.xlu1 %4341  ;;  %v4249_v44 = vmul.f32 %v6786_v42, %v4247_v43 }
0x27b6   :  { %v4344_v54 = vmul.f32 %v6788_v34, %v4342_v36 }
0x27b7   :  { %4251 = vrot.lane.b32.xlu0 %v4249_v44, %s7047_s18 }
0x27b8   :  { %4346 = vrot.lane.b32.xlu1 %v4344_v54, %s7047_s18 }
0x2829   :  { %v4252_v62 = vpop.permute.xlu0 %4251 }
0x282a   :  { %v4347_v37 = vpop.permute.xlu1 %4346  ;;  %v8151_v15 = vadd.f32 %v4252_v62, %v4244_v57 }
0x282b   :  { %v8153_v51 = vadd.f32 %v4347_v37, %v4339_v61 }
0x282c   :  { %6789 = vtanh.f32 %v8151_v15 }
0x282d   :  { %6791 = vtanh.f32 %v8153_v51 }
0x2839   :  { %v6790_v11 = vpop.eup %6789 }
0x283a   :  { %v6792_v56 = vpop.eup %6791  ;;  %4257 = vrot.lane.b32.xlu0 %v6790_v11, %s7046_s9 }
0x283b   :  { %4352 = vrot.lane.b32.xlu1 %v6792_v56, %s7046_s9 }
0x28ac   :  { %v4258_v12 = vpop.permute.xlu0 %4257 }
0x28ad   :  { %v4353_v52 = vpop.permute.xlu1 %4352  ;;  %v4260_v17 = vmul.f32 %v6786_v42, %v4258_v12 }
0x28ae   :  { %v4355_v23 = vmul.f32 %v6788_v34, %v4353_v52 }
0x28af   :  { %v5167_v45 = vrot.slane %v4260_v17, %v7966_v5  ;;  %4357 = vrot.lane.b32.xlu0 %v4260_v17, %s7047_s18 }
0x28b0   :  { %4432 = vrot.lane.b32.xlu1 %v4355_v23, %s7047_s18 }
0x28b1   :  { %v5168_v24 = vcombine.high %v5167_v45, %v5167_v45  ;;  %v5175_v60 = vrot.slane %v5167_v45, %v7966_v5 }
0x28b3   :  { %v5182_v59 = vrot.slane %v5168_v24, %v7966_v5  ;;  %v5283_v22 = vrot.slane %v5175_v60, %v7971_v63  ;;  %v6855_v60 = vld [vmem:[#allocation8 + $0x38] sm:$0xff] }
0x28b5   :  { %v5287_v18 = vrot.slane %v5182_v59, %v7971_v63  ;;  %v8167_v25 = vsel %vm5329_vm7, %v8105_v49, %v5283_v22  ;;  %v8180_v49 = vld [vmem:[#allocation8 + $0x10] sm:$0xff]  ;;  %v6856_v59 = vld [vmem:[#allocation7 + $0x38] sm:$0xff] }
0x28b6   :  { %v6857_v22 = vld [vmem:[#allocation8 + $0x30] sm:$0xff] }
0x28b7   :  { %v8170_v19 = vsel %vm5329_vm7, %v8108_v50, %v5287_v18  ;;  %v8186_v50 = vld [vmem:[#allocation8 + $0x8] sm:$0xff] }
0x28b8   :  { %v6858_v18 = vld [vmem:[#allocation8 + $0x28] sm:$0xff] }
0x2921   :  { %v4358_v26 = vpop.permute.xlu0 %4357 }
0x2922   :  { %v4433_v2 = vpop.permute.xlu1 %4432  ;;  %6400 = vmatmul.mubr.msk.f32.vlgmr.msra.gmra.mxu1 %vm241_vm3, %v4358_v26  ;;  %v6861_v26 = vld [vmem:[#allocation7 + $0x20] sm:$0xff] }
0x2923   :  { %6411 = vmatmul.mubr.msk.f32.vlgmr.msra.gmra.mxu0 %vm241_vm3, %v4433_v2  ;;  %6414 = vmatpush3.msra.mxu1 %v8174_v4 }
0x2924   :  { %6415 = vmatprep.subr.mxu1 %v7044_v0  ;;  %6421 = vmatprep.mubr.msk.f32.mxu1 %vm7045_vm0, %v7044_v0 }
0x2925   :  { %6416 = vmatpush3.msra.mxu1 %v8180_v49  ;;  %6425 = vmatpush3.msra.mxu0 %v7825_v7  ;;  %v8205_v7 = vld [vmem:[#allocation7 + $0x30] sm:$0xff] }
0x2926   :  { %6417 = vmatprep.subr.mxu1 %v7044_v0  ;;  %6426 = vmatprep.subr.mxu0 %v7044_v0 }
0x2927   :  { %6418 = vmatpush3.msra.mxu1 %v8186_v50  ;;  %6427 = vmatpush3.msra.mxu0 %v7827_v32 }
0x2928   :  { %6419 = vmatprep.subr.mxu1 %v7044_v0  ;;  %6428 = vmatprep.subr.mxu0 %v7044_v0 }
0x2929   :  { %6420 = vmatpush3.msra.mxu1 %v8192_v8  ;;  %6429 = vmatpush3.msra.mxu0 %v7835_v16 }
0x292a   :  { %6422 = vmatmul.mubr.msk.f32.vlgmr.msra.gmra.mxu1 %vm241_vm3, %v4433_v2  ;;  %6430 = vmatprep.subr.mxu0 %v7044_v0 }
0x292b   :  { %6435 = vmatprep.subr.mxu1 %v7044_v0  ;;  %6431 = vmatpush3.msra.mxu0 %v7843_v46 }
0x292c   :  { %6436 = vmatpush3.msra.mxu1 %v7830_v9  ;;  %6432 = vmatprep.mubr.msk.f32.mxu0 %vm7045_vm0, %v7044_v0 }
0x292d   :  { %6437 = vmatprep.subr.mxu1 %v7044_v0  ;;  %6446 = vmatprep.subr.mxu0 %v7044_v0 }
0x292e   :  { %6438 = vmatpush3.msra.mxu1 %v8205_v7  ;;  %6443 = vmatprep.mubr.msk.f32.mxu1 %vm7045_vm0, %v7044_v0 }
0x292f   :  { %6439 = vmatprep.subr.mxu1 %v7044_v0 }
0x2930   :  { %6440 = vmatpush3.msra.mxu1 %v7840_v27 }
0x2931   :  { %6441 = vmatprep.subr.mxu1 %v7044_v0 }
0x2932   :  { %6442 = vmatpush3.msra.mxu1 %v7850_v48 }
0x2933   :  { %6457 = vmatprep.subr.mxu1 %v7044_v0 }
0x29e2   :  { %v4427_v32 = vpop.f32.mrf.mxu1 }
0x29e3   :  { %v4502_v9 = vpop.f32.mrf.mxu0 }
0x29e4   :  { %v4503_v16 = vadd.f32 %v4502_v9, %v4427_v32  ;;  %v6401_v46 = vpop.f32.mrf.mxu1 }
0x29e5   :  { %v6412_v28 = vpop.f32.mrf.mxu0 }
0x29e6   :  { %v4506_v3 = vadd.f32 %v7892_v58, %v4503_v16 }
0x29e8   :  { %6793 = vtanh.f32 %v4506_v3  ;;  %v5648_v48 = vmul.f32 -1.442695, %v4506_v3 }
0x29ea   :  { %v4597_v6 = vpop.f32.mrf.mxu1 }
0x29eb   :  { %v4601_v10 = vadd.f32 %v4597_v6, %v7817_v21 }
0x29ec   :  { %v6423_v13 = vpop.f32.mrf.mxu1 }
0x29ed   :  { %6795 = vtanh.f32 %v4601_v10  ;;  %v5650_v20 = vmul.f32 -1.442695, %v4601_v10 }
0x29ee   :  { %6797 = vpow2.f32 %v5648_v48 }
0x29ef   :  { %6799 = vpow2.f32 %v5650_v20 }
0x29f5   :  { %v6794_v27 = vpop.eup %6793 }
0x29f6   :  { %4516 = vrot.lane.b32.xlu0 %v6794_v27, %s7046_s9 }
0x29fa   :  { %v6796_v39 = vpop.eup %6795 }
0x29fb   :  { %4611 = vrot.lane.b32.xlu1 %v6796_v39, %s7046_s9  ;;  %v6798_v47 = vpop.eup %6797 }
0x29fc   :  { %v4510_v53 = vadd.f32 1.0, %v6798_v47  ;;  %v6800_v35 = vpop.eup %6799 }
0x29fd   :  { %v4605_v58 = vadd.f32 1.0, %v6800_v35 }
0x29fe   :  { %6801 = vrcp.f32 %v4510_v53 }
0x29ff   :  { %6803 = vrcp.f32 %v4605_v58 }
0x2a0b   :  { %v6802_v38 = vpop.eup %6801 }
0x2a0c   :  { %v6804_v30 = vpop.eup %6803  ;;  %v4514_v40 = vmul.f32 %v6802_v38, %v8151_v15 }
0x2a0d   :  { %v4609_v43 = vmul.f32 %v6804_v30, %v8153_v51 }
0x2a68   :  { %v4517_v55 = vpop.permute.xlu0 %4516 }
0x2a69   :  { %v4519_v29 = vmul.f32 %v6802_v38, %v4517_v55 }
0x2a6b   :  { %4521 = vrot.lane.b32.xlu0 %v4519_v29, %s7047_s18 }
0x2a6d   :  { %v4612_v31 = vpop.permute.xlu1 %4611 }
0x2a6e   :  { %v4614_v33 = vmul.f32 %v6804_v30, %v4612_v31 }
0x2a70   :  { %4616 = vrot.lane.b32.xlu1 %v4614_v33, %s7047_s18 }
0x2add   :  { %v4522_v41 = vpop.permute.xlu0 %4521 }
0x2ade   :  { %v8222_v42 = vadd.f32 %v4522_v41, %v4514_v40 }
0x2ae0   :  { %6805 = vtanh.f32 %v8222_v42 }
0x2ae2   :  { %v4617_v34 = vpop.permute.xlu1 %4616 }
0x2ae3   :  { %v8226_v36 = vadd.f32 %v4617_v34, %v4609_v43 }
0x2ae5   :  { %6807 = vtanh.f32 %v8226_v36 }
0x2aed   :  { %v6806_v44 = vpop.eup %6805 }
0x2aee   :  { %4527 = vrot.lane.b32.xlu0 %v6806_v44, %s7046_s9 }
0x2af2   :  { %v6808_v54 = vpop.eup %6807 }
0x2af3   :  { %4622 = vrot.lane.b32.xlu1 %v6808_v54, %s7046_s9 }
0x2b60   :  { %v4528_v57 = vpop.permute.xlu0 %4527 }
0x2b61   :  { %v4530_v61 = vmul.f32 %v6802_v38, %v4528_v57 }
0x2b63   :  { %v5189_v62 = vrot.slane %v4530_v61, %v7966_v5  ;;  %4627 = vrot.lane.b32.xlu0 %v4530_v61, %s7047_s18 }
0x2b65   :  { %v5190_v37 = vcombine.high %v5189_v62, %v5189_v62  ;;  %v5197_v15 = vrot.slane %v5189_v62, %v7966_v5  ;;  %v4623_v51 = vpop.permute.xlu1 %4622 }
0x2b66   :  { %v4625_v11 = vmul.f32 %v6804_v30, %v4623_v51 }
0x2b67   :  { %v5204_v56 = vrot.slane %v5190_v37, %v7966_v5  ;;  %v5293_v12 = vrot.slane %v5197_v15, %v7971_v63 }
0x2b68   :  { %4702 = vrot.lane.b32.xlu1 %v4625_v11, %s7047_s18 }
0x2b69   :  { %v5297_v52 = vrot.slane %v5204_v56, %v7971_v63  ;;  %v8239_v17 = vsel %vm5332_vm8, %v8167_v25, %v5293_v12  ;;  %v6859_v25 = vld [vmem:[#allocation7 + $0x28] sm:$0xff] }
0x2b6b   :  { %v8242_v23 = vsel %vm5332_vm8, %v8170_v19, %v5297_v52  ;;  %v6860_v19 = vld [vmem:[#allocation8 + $0x20] sm:$0xff] }
0x2bd5   :  { %v4628_v45 = vpop.permute.xlu0 %4627 }
0x2bd6   :  { %6433 = vmatmul.mubr.msk.f32.vlgmr.msra.gmra.mxu0 %vm241_vm3, %v4628_v45 }
0x2bd7   :  { %6447 = vmatpush3.msra.mxu0 %v8174_v4  ;;  %6454 = vmatprep.mubr.msk.f32.mxu0 %vm7045_vm0, %v7044_v0 }
0x2bd8   :  { %6448 = vmatprep.subr.mxu0 %v7044_v0 }
0x2bd9   :  { %6449 = vmatpush3.msra.mxu0 %v8180_v49 }
0x2bda   :  { %6450 = vmatprep.subr.mxu0 %v7044_v0  ;;  %v4703_v24 = vpop.permute.xlu1 %4702 }
0x2bdb   :  { %6451 = vmatpush3.msra.mxu0 %v8186_v50  ;;  %6444 = vmatmul.mubr.msk.f32.vlgmr.msra.gmra.mxu1 %vm241_vm3, %v4703_v24 }
0x2bdc   :  { %6452 = vmatprep.subr.mxu0 %v7044_v0  ;;  %6458 = vmatpush3.msra.mxu1 %v6855_v60 }
0x2bdd   :  { %6453 = vmatpush3.msra.mxu0 %v8192_v8  ;;  %6459 = vmatprep.subr.mxu1 %v7044_v0 }
0x2bde   :  { %6455 = vmatmul.mubr.msk.f32.vlgmr.msra.gmra.mxu0 %vm241_vm3, %v4703_v24  ;;  %6468 = vmatprep.subr.mxu0 %v7044_v0 }
0x2bdf   :  { %6469 = vmatpush3.msra.mxu0 %v6856_v59  ;;  %6460 = vmatpush3.msra.mxu1 %v6857_v22 }
0x2be0   :  { %6470 = vmatprep.subr.mxu0 %v7044_v0  ;;  %6461 = vmatprep.subr.mxu1 %v7044_v0 }
0x2be1   :  { %6471 = vmatpush3.msra.mxu0 %v8205_v7  ;;  %6462 = vmatpush3.msra.mxu1 %v6858_v18  ;;  %v8268_v7 = vld [vmem:[#allocation10 + $0x1] ss:$0 sm:$0xff] }
0x2be2   :  { %6472 = vmatprep.subr.mxu0 %v7044_v0  ;;  %6463 = vmatprep.subr.mxu1 %v7044_v0 }
0x2be3   :  { %6473 = vmatpush3.msra.mxu0 %v6859_v25  ;;  %6476 = vmatprep.mubr.msk.f32.mxu0 %vm7045_vm0, %v7044_v0 }
0x2be4   :  { %6474 = vmatprep.subr.mxu0 %v7044_v0  ;;  %6464 = vmatpush3.msra.mxu1 %v6860_v19 }
0x2be5   :  { %6475 = vmatpush3.msra.mxu0 %v6861_v26  ;;  %6465 = vmatprep.mubr.msk.f32.mxu1 %vm7045_vm0, %v7044_v0 }
0x2c96   :  { %v4697_v2 = vpop.f32.mrf.mxu0 }
0x2c98   :  { %v6434_v4 = vpop.f32.mrf.mxu0 }
0x2c9b   :  { %v4772_v49 = vpop.f32.mrf.mxu1 }
0x2c9c   :  { %v4773_v50 = vadd.f32 %v4772_v49, %v4697_v2 }
0x2c9d   :  { %v6445_v8 = vpop.f32.mrf.mxu1 }
0x2c9e   :  { %v4776_v32 = vadd.f32 %v8268_v7, %v4773_v50  ;;  %v4867_v9 = vpop.f32.mrf.mxu0  ;;  %v5344_v8 = vld [vmem:[%s8349_s10 + $0x18] sm:$0xff] }
0x2c9f   :  { %v4871_v16 = vadd.f32 %v4867_v9, %v7817_v21  ;;  %6479 = vmatprep.subr.mxu1 %v5344_v8  ;;  %v5341_v9 = vld [vmem:[%s8349_s10] sm:$0xff] }
0x2ca0   :  { %6809 = vtanh.f32 %v4776_v32  ;;  %v6456_v46 = vpop.f32.mrf.mxu0  ;;  %v5653_v6 = vmul.f32 -1.442695, %v4776_v32  ;;  %v5342_v32 = vld [vmem:[%s8349_s10 + $0x8] sm:$0xff] }
0x2ca1   :  { %6811 = vtanh.f32 %v4871_v16  ;;  %v5655_v10 = vmul.f32 -1.442695, %v4871_v16 }
0x2ca2   :  { %6813 = vpow2.f32 %v5653_v6 }
0x2ca3   :  { %6815 = vpow2.f32 %v5655_v10 }
0x2cad   :  { %v6810_v28 = vpop.eup %6809 }
0x2cae   :  { %v6812_v3 = vpop.eup %6811  ;;  %4786 = vrot.lane.b32.xlu0 %v6810_v28, %s7046_s9 }
0x2caf   :  { %4881 = vrot.lane.b32.xlu1 %v6812_v3, %s7046_s9  ;;  %v6814_v13 = vpop.eup %6813 }
0x2cb0   :  { %v6816_v27 = vpop.eup %6815  ;;  %v4780_v39 = vadd.f32 1.0, %v6814_v13 }
0x2cb1   :  { %v4875_v48 = vadd.f32 1.0, %v6816_v27 }
0x2cb2   :  { %6817 = vrcp.f32 %v4780_v39 }
0x2cb3   :  { %6819 = vrcp.f32 %v4875_v48 }
0x2cbf   :  { %v6818_v21 = vpop.eup %6817 }
0x2cc0   :  { %v6820_v47 = vpop.eup %6819  ;;  %v4784_v38 = vmul.f32 %v6818_v21, %v8222_v42 }
0x2cc1   :  { %v4879_v55 = vmul.f32 %v6820_v47, %v8226_v36 }
0x2d20   :  { %v4787_v20 = vpop.permute.xlu0 %4786 }
0x2d21   :  { %v4882_v53 = vpop.permute.xlu1 %4881  ;;  %v4789_v35 = vmul.f32 %v6818_v21, %v4787_v20 }
0x2d22   :  { %v4884_v58 = vmul.f32 %v6820_v47, %v4882_v53 }
0x2d23   :  { %4791 = vrot.lane.b32.xlu0 %v4789_v35, %s7047_s18 }
0x2d24   :  { %4886 = vrot.lane.b32.xlu1 %v4884_v58, %s7047_s18 }
0x2d95   :  { %v4792_v29 = vpop.permute.xlu0 %4791 }
0x2d96   :  { %v4887_v30 = vpop.permute.xlu1 %4886  ;;  %v4794_v31 = vadd.f32 %v4792_v29, %v4784_v38  ;;  %v7049_v29 = vmov 1983009808  }
0x2d97   :  { %v4889_v33 = vadd.f32 %v4887_v30, %v4879_v55 }
0x2d98   :  { %6821 = vtanh.f32 %v4794_v31 }
0x2d99   :  { %6823 = vtanh.f32 %v4889_v33 }
0x2da5   :  { %v6822_v40 = vpop.eup %6821 }
0x2da6   :  { %v6824_v41 = vpop.eup %6823  ;;  %4797 = vrot.lane.b32.xlu0 %v6822_v40, %s7046_s9  ;;  %v5659_v40 = vld [vmem:[#allocation13] ss:$0 sm:$0xff] }
0x2da7   :  { %4892 = vrot.lane.b32.xlu1 %v6824_v41, %s7046_s9 }
0x2e18   :  { %v4798_v43 = vpop.permute.xlu0 %4797 }
0x2e19   :  { %v4893_v34 = vpop.permute.xlu1 %4892  ;;  %v4800_v44 = vmul.f32 %v6818_v21, %v4798_v43  ;;  %v5616_v21 = vld [vmem:[#allocation11] ss:$0 sm:$0xff] }
0x2e1a   :  { %v4895_v54 = vmul.f32 %v6820_v47, %v4893_v34  ;;  %v2800_v20 = vadd.f32 %v5616_v21, %v7815_v14  ;;  %v5439_v14 = vunpack.c.l.s4 %v7049_v29 }
0x2e1b   :  { %v5211_v42 = vrot.slane %v4800_v44, %v7966_v5  ;;  %4897 = vrot.lane.b32.xlu0 %v4800_v44, %s7047_s18 }
0x2e1c   :  { %4972 = vrot.lane.b32.xlu1 %v4895_v54, %s7047_s18  ;;  %v2804_v47 = vsel %vm2803_vm11, %v2800_v20, -inf  ;;  %v5440_v30 = vunpack.c.0.s8 %v5439_v14 }
0x2e1d   :  { %v5212_v36 = vcombine.high %v5211_v42, %v5211_v42  ;;  %v5219_v57 = vrot.slane %v5211_v42, %v7966_v5 }
0x2e1e   :  { %v5443_v34 = vsub.s32 %v5440_v30, %v7963_v1 }
0x2e1f   :  { %v5226_v61 = vrot.slane %v5212_v36, %v7966_v5  ;;  %v5303_v62 = vrot.slane %v5219_v57, %v7971_v63 }
0x2e21   :  { %v5307_v37 = vrot.slane %v5226_v61, %v7971_v63  ;;  %v5336_v15 = vsel %vm5335_vm9, %v8239_v17, %v5303_v62 }
0x2e23   :  { %v5337_v51 = vsel %vm5335_vm9, %v8242_v23, %v5307_v37 }
0x2e8d   :  { %v4898_v11 = vpop.permute.xlu0 %4897 }
0x2e8e   :  { %v4973_v56 = vpop.permute.xlu1 %4972  ;;  %6466 = vmatmul.mubr.msk.f32.vlgmr.msra.gmra.mxu1 %vm241_vm3, %v4898_v11 }
0x2e8f   :  { %6477 = vmatmul.mubr.msk.f32.vlgmr.msra.gmra.mxu0 %vm241_vm3, %v4973_v56  ;;  %6480 = vmatpush3.msra.mxu1 %v5344_v8 }
0x2f4e   :  { %v4967_v12 = vpop.f32.mrf.mxu1 }
0x2f4f   :  { %v5042_v52 = vpop.f32.mrf.mxu0 }
0x2f50   :  { %v5043_v45 = vadd.f32 %v5042_v52, %v4967_v12  ;;  %v6467_v24 = vpop.f32.mrf.mxu1 }
0x2f51   :  { %v6478_v60 = vpop.f32.mrf.mxu0 }
0x2f52   :  { %v5046_v59 = vadd.f32 %v8268_v7, %v5043_v45  ;;  %v5343_v7 = vld [vmem:[%s8349_s10 + $0x10] sm:$0xff]  ;;  %s7051_s10 = smov 48  }
0x2f53   :  { %6481 = vmatprep.subr.mxu1 %v5343_v7 }
0x2f54   :  { %6825 = vtanh.f32 %v5046_v59  ;;  %v5658_v17 = vmul.f32 -1.442695, %v5046_v59  ;;  %6482 = vmatpush3.msra.mxu1 %v5343_v7 }
0x2f55   :  { %6483 = vmatprep.subr.mxu1 %v5342_v32 }
0x2f56   :  { %6827 = vpow2.f32 %v5658_v17  ;;  %6484 = vmatpush3.msra.mxu1 %v5342_v32 }
0x2f57   :  { %6485 = vmatprep.subr.mxu1 %v5341_v9 }
0x2f58   :  { %6486 = vmatpush3.msra.mxu1 %v5341_v9 }
0x2f61   :  { %v6826_v22 = vpop.eup %6825 }
0x2f62   :  { %5056 = vrot.lane.b32.xlu0 %v6826_v22, %s7046_s9 }
0x2f63   :  { %v6828_v23 = vpop.eup %6827 }
0x2f64   :  { %v5050_v18 = vadd.f32 1.0, %v6828_v23 }
0x2f66   :  { %6829 = vrcp.f32 %v5050_v18 }
0x2f73   :  { %v6830_v25 = vpop.eup %6829 }
0x2f74   :  { %v5054_v2 = vmul.f32 %v6830_v25, %v4794_v31  ;;  %v7050_v31 = vmov 1934713408  }
0x2f75   :  { %v5470_v33 = vunpack.c.l.s4 %v7050_v31 }
0x2f77   :  { %v5471_v44 = vunpack.c.0.s8 %v5470_v33 }
0x2f79   :  { %v5474_v37 = vsub.s32 %v5471_v44, %v7963_v1 }
0x2fd4   :  { %v5057_v19 = vpop.permute.xlu0 %5056 }
0x2fd5   :  { %v5059_v26 = vmul.f32 %v6830_v25, %v5057_v19 }
0x2fd7   :  { %5061 = vrot.lane.b32.xlu1 %v5059_v26, %s7047_s18 }
0x3049   :  { %v5062_v4 = vpop.permute.xlu1 %5061 }
0x304a   :  { %v5064_v49 = vadd.f32 %v5062_v4, %v5054_v2 }
0x304c   :  { %6831 = vtanh.f32 %v5064_v49 }
0x3059   :  { %v6832_v50 = vpop.eup %6831 }
0x305a   :  { %5067 = vrot.lane.b32.xlu0 %v6832_v50, %s7046_s9 }
0x30cc   :  { %v5068_v16 = vpop.permute.xlu0 %5067 }
0x30cd   :  { %v5070_v46 = vmul.f32 %v6830_v25, %v5068_v16 }
0x30cf   :  { %v5234_v28 = vrot.slane %v5070_v46, %v7966_v5 }
0x30d1   :  { %v5235_v3 = vcombine.high %v5234_v28, %v5234_v28  ;;  %v5242_v6 = vrot.slane %v5234_v28, %v7966_v5 }
0x30d3   :  { %v5249_v10 = vrot.slane %v5235_v3, %v7966_v5  ;;  %v5313_v13 = vrot.slane %v5242_v6, %v7971_v63 }
0x30d5   :  { %v5339_v27 = vsel %vm5338_vm10, %v5336_v15, %v5313_v13  ;;  %v5317_v39 = vrot.slane %v5249_v10, %v7971_v63 }
0x30d6   :  { %5354 = vrot.lane.b32.xlu1 %v5339_v27, %s7047_s18 }
0x30d7   :  { %v5340_v48 = vsel %vm5338_vm10, %v5337_v51, %v5317_v39 }
0x30d8   :  { %5356 = vrot.lane.b32.xlu0 %v5340_v48, %s7047_s18 }
0x30fa   :  { %2805 = vmax.xlane.f32.xlu1 %v2804_v47 }
0x3148   :  { %v5355_v53 = vpop.permute.xlu1 %5354 }
0x3149   :  { %6487 = vmatprep.mubr.msk.f32.mxu1 %vm241_vm3, %v5355_v53 }
0x314a   :  { %v5357_v5 = vpop.permute.xlu0 %5356 }
0x314b   :  { %6488 = vmatmul.mubr.msk.f32.vlgmr.msra.gmra.mxu1 %vm241_vm3, %v5357_v5 }
0x3183   :  { %v2806_v35 = vpop.xlane.xlu1 %2805 }
0x3184   :  { %v2807_v63 = vsub.f32 %v2800_v20, %v2806_v35 }
0x3186   :  { %v2808_v58 = vmul.f32 1.442695, %v2807_v63 }
0x3188   :  { %6833 = vpow2.f32 %v2808_v58 }
0x3195   :  { %v6834_v38 = vpop.eup %6833 }
0x3196   :  { %v2810_v55 = vsel %vm2803_vm11, %v6834_v38, 0.0 }
0x3197   :  { %2811 = vadd.xlane.f32.xlu0 %v2810_v55 }
0x320b   :  { %v6489_v41 = vpop.f32.mrf.mxu1 }
0x320c   :  { %v5434_v43 = vadd.f32 %v6489_v41, %v5659_v40 }
0x320d   :  { %v5428_v54 = vpop.f32.mrf.mxu1 }
0x320e   :  { %v5452_v42 = vcombine.high %v5434_v43, %v7044_v0  ;;  %v5429_v36 = vadd.f32 %v5659_v40, %v5428_v54  ;;  %v5459_v57 = vrot.slane %v5434_v43, %v5443_v34 }
0x3210   :  { %v5437_v61 = vcombine.high %v5429_v36, %v7044_v0  ;;  %v5444_v62 = vrot.slane %v5429_v36, %v5443_v34  ;;  %v5466_v15 = vrot.slane %v5452_v42, %v5443_v34 }
0x3212   :  { %v5451_v51 = vrot.slane %v5437_v61, %v5443_v34  ;;  %v5467_v11 = vcombine.low %v5444_v62, %v5459_v57  ;;  %v5468_v56 = vcombine.high %v5444_v62, %v5459_v57 }
0x3214   :  { %v5482_v12 = vrot.slane %v5468_v56, %v5474_v37  ;;  %v5483_v52 = vcombine.low %v5451_v51, %v5466_v15  ;;  %v5475_v45 = vrot.slane %v5467_v11, %v5474_v37  ;;  %v5484_v60 = vcombine.high %v5451_v51, %v5466_v15 }
0x3216   :  { %5508 = vrot.lane.b32.xlu1 %v5482_v12, %s7047_s18  ;;  %v5499_v24 = vcombine.high %v5475_v45, %v7044_v0  ;;  %v5500_v59 = vcombine.high %v5482_v12, %v7044_v0  ;;  %v5491_v22 = vrot.slane %v5483_v52, %v5474_v37  ;;  %v5498_v17 = vrot.slane %v5484_v60, %v5474_v37  ;;  %s7054_s18 = smov 112  }
0x3218   :  { %5504 = vrot.lane.b32.xlu0 %v5499_v24, %s7041_s20  ;;  %v5501_v1 = vcombine.high %v5491_v22, %v7044_v0  ;;  %v5502_v18 = vcombine.high %v5498_v17, %v7044_v0  ;;  %s7055_s20 = smov [#allocation14]  }
0x3219   :  { %s5552_s28 = sshll.u32 %s7055_s20, 4  ;;  %s5553_s28 = int_to_ptr.vmem [resolvable:$true] %s5552_s28 }
0x321a   :  { %5512 = vrot.lane.b32.xlu1 %v5500_v59, %s7051_s10  ;;  %p7008_p8 = scmp.lt.s32.totalorder %s5553_s28, %s5553_s28 }
0x321c   :  { %5516 = vrot.lane.b32.xlu0 %v5491_v22, %s7046_s9  ;;  %s7003_s9 = scalar_lea.vmem %s5553_s28, 32 }
0x321d   :  { %p7004_p7 = scmp.ne.s32.totalorder %s5553_s28, %s7003_s9  ;;  %p7009_p9 = scmp.lt.s32.totalorder %s7003_s9, %s7003_s9 }
0x321e   :  { %5520 = vrot.lane.b32.xlu1 %v5501_v1, %s7052_s27 }
0x321f   :  { %p7010_p10 = por %p7009_p9, %p7008_p8 }
0x3220   :  { %v2812_v23 = vpop.xlane.xlu0 %2811  ;;  %5524 = vrot.lane.b32.xlu0 %v5498_v17, %s7053_s6 }
0x3221   :  { %6835 = vrcp.f32 %v2812_v23  ;;  %p7011_p11 = pnand %p7010_p10, %p7004_p7 }
0x3222   :  { %5528 = vrot.lane.b32.xlu1 %v5502_v18, %s7054_s18 }
0x322e   :  { %v6836_v25 = vpop.eup %6835 }
0x322f   :  { %v2814_v19 = vmul.f32 %v6836_v25, %v6834_v38 }
0x3231   :  { %2815 = vst.msk [vmem:[#allocation14] sm:$0x3] %vm2803_vm11, %v2814_v19 }
0x3232   :  { %7014 = shalt.err (!%p7011_p11)
}
0x3233   :  { %5555 = dma.vmem_to_hbm [thread:$0]  %s5553_s28, 32, %s8352_s13, [#allocation4]   ;;  %vm5533_vm12 = vcmask 392192   ;;  %vm5535_vm13 = vcmask 523264   ;;  %vm5537_vm14 = vcmask 654336   ;;  %vm5539_vm15 = vcmask 785408  }
0x3234   :  { %vm5541_vm0 = vcmask 916480  }
0x3288   :  { %v5509_v0 = vpop.permute.xlu1 %5508 }
0x328a   :  { %v5505_v26 = vpop.permute.xlu0 %5504 }
0x328b   :  { %v5531_v2 = vsel %vm159_vm1, %v5475_v45, %v5505_v26 }
0x328c   :  { %v5513_v4 = vpop.permute.xlu1 %5512  ;;  %v5532_v49 = vsel %vm241_vm3, %v5531_v2, %v5509_v0 }
0x328d   :  { %v5534_v50 = vsel %vm5533_vm12, %v5532_v49, %v5513_v4 }
0x328e   :  { %v5517_v8 = vpop.permute.xlu0 %5516 }
0x328f   :  { %v5536_v7 = vsel %vm5535_vm13, %v5534_v50, %v5517_v8 }
0x3290   :  { %v5521_v32 = vpop.permute.xlu1 %5520 }
0x3291   :  { %v5538_v9 = vsel %vm5537_vm14, %v5536_v7, %v5521_v32 }
0x3292   :  { %v5525_v16 = vpop.permute.xlu0 %5524 }
0x3293   :  { %v5540_v46 = vsel %vm5539_vm15, %v5538_v9, %v5525_v16 }
0x3294   :  { %v5529_v28 = vpop.permute.xlu1 %5528 }
0x3295   :  { %v5542_v3 = vsel %vm5541_vm0, %v5540_v46, %v5529_v28 }
0x3296   :  { %5543 = vst [vmem:[%s8351_s12] sm:$0x3] %v5542_v3 }
0x3297   :  { %7031 = dma.done.wait [#allocation4], 32  }
0x3298   :  { %7032 = vsyncadd [#allocation4], 4294967264 }
0x3299   :  { %5561 = vsyncpa [#allocation3], 1 }
0x329a   :  { %5562 = vsyncpa [#allocation6], 1 }
0x329b   :  { %5563 = vsyncpa [#allocation9], 1 }
0x329c   :  { %5564 = vsyncpa [#allocation12], 1 }
0x329d   :  { %5565 = vsyncpa [#allocation4], 1 }

</bundles_post_ra>
